<compile_context>
chip_gen: v7x
topology: tpu7x:2x2x1
jax: 0.10.0
libtpu: 0.0.40
codegen_flags: <defaults>
</compile_context>

<pallas_src>
import functools
import math

import jax
import jax.numpy as jnp
from jax.experimental import pallas as pl
from jax.experimental.pallas import tpu as pltpu

# ---- synthetic (small) CLIP-vision config ----------------------------------
IN_CH = 3
PATCH = 4
TOWER_IMG = 16                       # tower image size == s2_split_size
S2_SCALES = [16, 32]                 # sorted; largest == s2_image_size
HIDDEN = 32
N_HEADS = 2
HEAD_DIM = HIDDEN // N_HEADS
INTER = 64
N_LAYERS = 2
SELECT_LAYER = -2                    # mm_vision_select_layer
SELECT_FEATURE = "patch"             # drop CLS token
PATCHES_PER_SIDE = TOWER_IMG // PATCH
NUM_PATCHES = PATCHES_PER_SIDE ** 2
PATCH_DIM = IN_CH * PATCH * PATCH    # 48
PATCH_DIM_PAD = 128                  # zero-padded to a full lane tile
SEQ = NUM_PATCHES + 1                # +1 CLS token
SEQ_PAD = ((SEQ + 7) // 8) * 8       # 24: pad sequence to a sublane multiple
LN_EPS = 1e-5
CROP_BLOCK = 8                       # crops per grid step (192 MXU rows/step)

# Encoder layers that actually feed hidden_states[SELECT_LAYER].
N_LAYERS_RUN = (N_LAYERS + 1 + SELECT_LAYER) if SELECT_LAYER < 0 else SELECT_LAYER

# ---- packed f32 constant slab layout (rows x HIDDEN) ------------------------
ROW_POS = 0                          # rows [0, NUM_PATCHES): patch pos-emb
ROW_CLS = NUM_PATCHES                # rows [NP, SEQ_PAD): cls+pos0, then zeros
ROW_PRE_G = SEQ_PAD                  # pre_layrnorm gamma
ROW_PRE_B = SEQ_PAD + 1              # pre_layrnorm beta
CONST_ROWS = SEQ_PAD + 8             # padded to a sublane multiple (32 rows)

# ---- packed per-layer f32 bias slab layout (L, 8, 128) ----------------------
LB_LN1_G, LB_LN1_B, LB_QKV_B, LB_O_B = 0, 1, 2, 3
LB_LN2_G, LB_LN2_B, LB_FC1_B, LB_FC2_B = 4, 5, 6, 7
LBIAS_ROWS, LBIAS_LANES = 8, 128

_LAYER_WEIGHT_NAMES = ("lbias", "qkv_w", "o_w", "fc1_w", "fc2_w")


# =============================================================================
# Fused CLIP-vision-tower Pallas kernel
# =============================================================================
def _clip_tower_kernel(
    patches_ref,                  # (CB*NUM_PATCHES, PATCH_DIM_PAD)  f32
    patch_w_ref,                  # (PATCH_DIM_PAD, H)               bf16
    const_ref,                    # (CONST_ROWS, H)                  f32
    lbias_ref,                    # (Lrun, 8, 128)                   f32
    qkv_w_ref,                    # (Lrun, H, 3H)                    bf16
    o_w_ref,                      # (Lrun, H, H)                     bf16
    fc1_w_ref,                    # (Lrun, H, I)                     bf16
    fc2_w_ref,                    # (Lrun, I, H)                     bf16
    out_ref,                      # (CB, NUM_PATCHES, H)             f32
    *, n_layers_run):
  """Whole tower for a block of CROP_BLOCK crops, resident in VMEM."""
  cb = out_ref.shape[0]
  f32, bf16 = jnp.float32, jnp.bfloat16

  def layernorm(t, g, b):                      # f32 elementwise
    mu = jnp.mean(t, axis=-1, keepdims=True)
    var = jnp.mean(jnp.square(t - mu), axis=-1, keepdims=True)
    return (t - mu) * jax.lax.rsqrt(var + LN_EPS) * g + b

  # ---- patch embedding: Conv2d(k=stride=PATCH, no bias) == matmul ----------
  # Input is pre-flattened + zero-padded to 128 lanes -> fully aligned loads.
  pe = jnp.dot(patches_ref[...].astype(bf16), patch_w_ref[...],
               preferred_element_type=f32)                   # (cb*NP, H)
  pe = pe.reshape(cb, NUM_PATCHES, HIDDEN) + const_ref[ROW_POS:ROW_CLS, :][None]

  # Token layout: [patch 0..NP-1 | CLS | zero pad] -> all slices sublane-aligned.
  tail = jnp.broadcast_to(const_ref[ROW_CLS:SEQ_PAD, :][None],
                          (cb, SEQ_PAD - NUM_PATCHES, HIDDEN))
  h = jnp.concatenate([pe, tail], axis=1)                    # (cb, SEQ_PAD, H)
  h = layernorm(h, const_ref[ROW_PRE_G:ROW_PRE_G + 1, :],
                const_ref[ROW_PRE_B:ROW_PRE_B + 1, :])       # pre_layrnorm

  # Key-padding bias: tokens with index >= SEQ are padding rows.
  kmask = jnp.where(
      jax.lax.broadcasted_iota(jnp.int32, (SEQ_PAD, SEQ_PAD), 1) < SEQ,
      0.0, -1e30)

  for l in range(n_layers_run):
    lb = lbias_ref[l]                                        # (8, 128) f32
    ln1_g = lb[LB_LN1_G:LB_LN1_G + 1, :HIDDEN]
    ln1_b = lb[LB_LN1_B:LB_LN1_B + 1, :HIDDEN]
    qkv_b = lb[LB_QKV_B:LB_QKV_B + 1, :3 * HIDDEN]
    o_b = lb[LB_O_B:LB_O_B + 1, :HIDDEN]
    ln2_g = lb[LB_LN2_G:LB_LN2_G + 1, :HIDDEN]
    ln2_b = lb[LB_LN2_B:LB_LN2_B + 1, :HIDDEN]
    fc1_b = lb[LB_FC1_B:LB_FC1_B + 1, :INTER]
    fc2_b = lb[LB_FC2_B:LB_FC2_B + 1, :HIDDEN]

    # ---- self-attention block ----
    res = h
    hn = layernorm(h, ln1_g, ln1_b)
    qkv = jnp.dot(hn.reshape(cb * SEQ_PAD, HIDDEN).astype(bf16), qkv_w_ref[l],
                  preferred_element_type=f32) + qkv_b
    qkv = qkv.reshape(cb, SEQ_PAD, 3 * HIDDEN)
    ctxs = []
    for hh in range(N_HEADS):                                # static lane slices
      # softmax scale already folded into the Q columns of qkv_w / qkv_b
      q = qkv[:, :, hh * HEAD_DIM:(hh + 1) * HEAD_DIM]
      k = qkv[:, :, HIDDEN + hh * HEAD_DIM:HIDDEN + (hh + 1) * HEAD_DIM]
      v = qkv[:, :, 2 * HIDDEN + hh * HEAD_DIM:2 * HIDDEN + (hh + 1) * HEAD_DIM]
      s = jnp.einsum("bqd,bkd->bqk", q.astype(bf16), k.astype(bf16),
                     preferred_element_type=f32) + kmask[None]
      s = s - jnp.max(s, axis=-1, keepdims=True)
      p = jnp.exp(s)
      p = p * pl.reciprocal(jnp.sum(p, axis=-1, keepdims=True), approx=True)
      ctxs.append(jnp.einsum("bqk,bkd->bqd", p.astype(bf16), v.astype(bf16),
                             preferred_element_type=f32))
    # merged out-projection: concat head contexts along lanes, one matmul.
    ctx = jnp.concatenate(ctxs, axis=-1).reshape(cb * SEQ_PAD, HIDDEN)
    proj = jnp.dot(ctx.astype(bf16), o_w_ref[l],
                   preferred_element_type=f32) + o_b
    h = res + proj.reshape(cb, SEQ_PAD, HIDDEN)

    # ---- MLP block ----
    res2 = h
    hn2 = layernorm(h, ln2_g, ln2_b)
    m = jnp.dot(hn2.reshape(cb * SEQ_PAD, HIDDEN).astype(bf16), fc1_w_ref[l],
                preferred_element_type=f32) + fc1_b
    m = m * jax.nn.sigmoid(1.702 * m)                        # quick_gelu (f32)
    m2 = jnp.dot(m.astype(bf16), fc2_w_ref[l],
                 preferred_element_type=f32) + fc2_b
    h = res2 + m2.reshape(cb, SEQ_PAD, HIDDEN)

  # select_feature == 'patch': patch tokens occupy rows [0, NUM_PATCHES).
  # TODO(synk): select_feature == 'cls_patch' would additionally keep the CLS row.
  out_ref[...] = h[:, :NUM_PATCHES, :].astype(out_ref.dtype)


def _full_spec(a):
  """Whole-array VMEM block with a constant index map (DMA'd once)."""
  return pl.BlockSpec(a.shape, lambda i, _nd=a.ndim: (0,) * _nd)


def clip_tower(patches, params):
  """patches: (N*NUM_PATCHES, PATCH_DIM_PAD), N % CROP_BLOCK == 0."""
  n = patches.shape[0] // NUM_PATCHES
  assert n % CROP_BLOCK == 0
  lr = N_LAYERS_RUN
  # Slice stacked per-layer weights to the layers actually executed, so unused
  # layers are never DMA'd / double-buffered.
  weights = [params["patch_w"], params["const"]]
  weights += [params[k][:lr] for k in _LAYER_WEIGHT_NAMES]

  flops = n * (2 * NUM_PATCHES * PATCH_DIM_PAD * HIDDEN + lr * (
      2 * SEQ_PAD * HIDDEN * 3 * HIDDEN + 4 * SEQ_PAD * SEQ_PAD * HIDDEN
      + 2 * SEQ_PAD * HIDDEN * HIDDEN + 4 * SEQ_PAD * HIDDEN * INTER))
  transc = n * lr * (N_HEADS * SEQ_PAD * SEQ_PAD + SEQ_PAD * INTER)
  bytes_acc = int(patches.nbytes + sum(int(w.nbytes) for w in weights)
                  + n * NUM_PATCHES * HIDDEN * 4)

  return pl.pallas_call(
      functools.partial(_clip_tower_kernel, n_layers_run=lr),
      out_shape=jax.ShapeDtypeStruct((n, NUM_PATCHES, HIDDEN), jnp.float32),
      grid=(n // CROP_BLOCK,),
      in_specs=([pl.BlockSpec((CROP_BLOCK * NUM_PATCHES, PATCH_DIM_PAD),
                              lambda i: (i, 0))]
                + [_full_spec(w) for w in weights]),
      out_specs=pl.BlockSpec((CROP_BLOCK, NUM_PATCHES, HIDDEN),
                             lambda i: (i, 0, 0)),
      compiler_params=pltpu.CompilerParams(dimension_semantics=("parallel",)),
      cost_estimate=pl.CostEstimate(flops=flops, transcendentals=transc,
                                    bytes_accessed=bytes_acc),
  )(patches, *weights)


# =============================================================================
# CLIPVisionTowerS2.forward_feature  (one fused tower call for a crop batch)
# =============================================================================
def forward_feature(crops, params):
  """crops: (N, 3, TOWER_IMG, TOWER_IMG) NCHW -> (N, NUM_PATCHES, HIDDEN)."""
  assert SELECT_FEATURE == "patch"
  total = crops.shape[0]
  pad = (-total) % CROP_BLOCK
  if pad:
    crops = jnp.concatenate(
        [crops, jnp.zeros((pad,) + crops.shape[1:], crops.dtype)], axis=0)
  n = crops.shape[0]
  # patch extraction: per-patch (c, ph, pw) flatten, row-major over patches,
  # pre-flattened and zero-padded 48 -> 128 lanes for aligned kernel loads.
  x = crops.reshape(n, IN_CH, PATCHES_PER_SIDE, PATCH, PATCHES_PER_SIDE, PATCH)
  x = x.transpose(0, 2, 4, 1, 3, 5).reshape(n * NUM_PATCHES, PATCH_DIM)
  x = jnp.pad(x, ((0, 0), (0, PATCH_DIM_PAD - PATCH_DIM)))
  feats = clip_tower(x, params)                    # (n, NUM_PATCHES, HIDDEN)
  return feats[:total]


# =============================================================================
# s2wrapper.forward (multiscale_forward) semantics
# =============================================================================
def split_chessboard(x, ns):
  B, C, H, W = x.shape
  h, w = H // ns, W // ns
  return jnp.concatenate(
      [x[:, :, i * h:(i + 1) * h, j * w:(j + 1) * w]
       for i in range(ns) for j in range(ns)], axis=0)


def merge_chessboard(x, ns):
  B = x.shape[0]
  b = B // (ns * ns)
  rows = [jnp.concatenate([x[(i * ns + j) * b:(i * ns + j + 1) * b]
                           for j in range(ns)], axis=-1)
          for i in range(ns)]
  return jnp.concatenate(rows, axis=-2)


def s2_forward(images, params):
  """images: (B, 3, s2_image_size, s2_image_size) NCHW float32.
  Returns (B, NUM_PATCHES, HIDDEN * len(S2_SCALES))  — 'b (h w) c'."""
  b = images.shape[0]
  num_splits = [math.ceil(s / TOWER_IMG) for s in S2_SCALES]

  # Resize + chessboard-split every scale, then run ALL crops of ALL scales
  # through a single fused tower call.
  crops, counts = [], []
  for size, ns in zip(S2_SCALES, num_splits):
    # TODO(synk): torch bicubic uses a=-0.75 cubic kernel; jax 'cubic' uses a=-0.5
    x = jax.image.resize(images, (b, IN_CH, size, size),
                         method="cubic", antialias=False)
    x = split_chessboard(x, ns)                      # (b*ns*ns, 3, 16, 16)
    crops.append(x)
    counts.append(x.shape[0])
  feats = forward_feature(jnp.concatenate(crops, axis=0), params)

  outs, off = [], 0
  for ns, cnt in zip(num_splits, counts):
    f = feats[off:off + cnt]
    off += cnt
    hh = PATCHES_PER_SIDE
    f = f.reshape(cnt, hh, hh, HIDDEN).transpose(0, 3, 1, 2)
    outs.append(merge_chessboard(f, ns))             # (b, HIDDEN, hh*ns, hh*ns)
  out_size = outs[0].shape[-1]                       # resize_output_to_idx = 0
  merged = []
  for o in outs:
    r = o.shape[-1] // out_size                      # integer ratio -> exact 'area'
    merged.append(o.reshape(b, HIDDEN, out_size, r, out_size, r).mean(axis=(3, 5)))
  out = jnp.concatenate(merged, axis=1)              # (b, HIDDEN*n_scales, h, w)
  return out.transpose(0, 2, 3, 1).reshape(b, out_size * out_size,
                                           HIDDEN * len(S2_SCALES))


# =============================================================================
# deterministic synthetic parameters (packed / fused-QKV layout, bf16 weights)
# =============================================================================
def init_params(key):
  ks = jax.random.split(key, 3 + N_LAYERS)

  def nrm(k, shape):
    return 0.02 * jax.random.normal(k, shape, jnp.float32)

  patch_w = nrm(ks[0], (PATCH_DIM, HIDDEN))
  patch_w = jnp.pad(patch_w, ((0, PATCH_DIM_PAD - PATCH_DIM), (0, 0)))
  class_emb = nrm(ks[1], (HIDDEN,))
  pos_emb = nrm(ks[2], (SEQ, HIDDEN))

  # f32 constant slab: [pos_patch | cls+pos0, zeros | pre_g | pre_b | pad]
  const = jnp.zeros((CONST_ROWS, HIDDEN), jnp.float32)
  const = const.at[ROW_POS:ROW_CLS].set(pos_emb[1:])
  const = const.at[ROW_CLS].set(class_emb + pos_emb[0])
  const = const.at[ROW_PRE_G].set(1.0)               # pre_layrnorm gamma
  # ROW_PRE_B stays zero                             # pre_layrnorm beta

  scale = HEAD_DIM ** -0.5
  qkv_w, o_w, fc1_w, fc2_w, lbias = [], [], [], [], []
  for li in range(N_LAYERS):
    lk = jax.random.split(ks[3 + li], 12)
    qw, kw, vw = (nrm(lk[0], (HIDDEN, HIDDEN)), nrm(lk[1], (HIDDEN, HIDDEN)),
                  nrm(lk[2], (HIDDEN, HIDDEN)))
    qb, kb, vb = nrm(lk[3], (HIDDEN,)), nrm(lk[4], (HIDDEN,)), nrm(lk[5], (HIDDEN,))
    # softmax scale folded into the Q columns / bias -> no runtime multiply.
    qkv_w.append(jnp.concatenate([qw * scale, kw, vw], axis=1))   # (H, 3H)
    qkv_b = jnp.concatenate([qb * scale, kb, vb])
    o_w.append(nrm(lk[6], (HIDDEN, HIDDEN)))
    o_b = nrm(lk[7], (HIDDEN,))
    fc1_w.append(nrm(lk[8], (HIDDEN, INTER)))
    fc1_b = nrm(lk[9], (INTER,))
    fc2_w.append(nrm(lk[10], (INTER, HIDDEN)))
    fc2_b = nrm(lk[11], (HIDDEN,))

    lb = jnp.zeros((LBIAS_ROWS, LBIAS_LANES), jnp.float32)
    lb = lb.at[LB_LN1_G, :HIDDEN].set(1.0)
    # LB_LN1_B stays zero
    lb = lb.at[LB_QKV_B, :3 * HIDDEN].set(qkv_b)
    lb = lb.at[LB_O_B, :HIDDEN].set(o_b)
    lb = lb.at[LB_LN2_G, :HIDDEN].set(1.0)
    # LB_LN2_B stays zero
    lb = lb.at[LB_FC1_B, :INTER].set(fc1_b)
    lb = lb.at[LB_FC2_B, :HIDDEN].set(fc2_b)
    lbias.append(lb)

  return dict(
      patch_w=patch_w.astype(jnp.bfloat16),          # (PATCH_DIM_PAD, H)
      const=const,                                   # (CONST_ROWS, H) f32
      lbias=jnp.stack(lbias),                        # (L, 8, 128)     f32
      qkv_w=jnp.stack(qkv_w).astype(jnp.bfloat16),   # (L, H, 3H)
      o_w=jnp.stack(o_w).astype(jnp.bfloat16),       # (L, H, H)
      fc1_w=jnp.stack(fc1_w).astype(jnp.bfloat16),   # (L, H, I)
      fc2_w=jnp.stack(fc2_w).astype(jnp.bfloat16),   # (L, I, H)
  )


if __name__ == "__main__":
  key = jax.random.PRNGKey(0)
  pkey, xkey = jax.random.split(key)
  params = init_params(pkey)
  # input images arrive at the S2 image size (largest scale), NCHW
  images = jax.random.normal(
      xkey, (2, IN_CH, S2_SCALES[-1], S2_SCALES[-1]), jnp.float32)

  out = jax.jit(s2_forward)(images, params)
  out = jax.block_until_ready(out)

  expected = (2, NUM_PATCHES, HIDDEN * len(S2_SCALES))   # hidden_size property
  assert out.shape == expected, (out.shape, expected)
  assert bool(jnp.all(jnp.isfinite(out)))
  print("KERNEL_OK")
</pallas_src>

<mosaic_0001>
module attributes {stable_mosaic.version = 11 : i64} {
  func.func @_clip_tower_kernel(%arg0: i32, %arg1: memref<128x128xf32, #tpu.memory_space<vmem>>, %arg2: memref<128x32xbf16, #tpu.memory_space<vmem>>, %arg3: memref<32x32xf32, #tpu.memory_space<vmem>>, %arg4: memref<1x8x128xf32, #tpu.memory_space<vmem>>, %arg5: memref<1x32x96xbf16, #tpu.memory_space<vmem>>, %arg6: memref<1x32x32xbf16, #tpu.memory_space<vmem>>, %arg7: memref<1x32x64xbf16, #tpu.memory_space<vmem>>, %arg8: memref<1x64x32xbf16, #tpu.memory_space<vmem>>, %arg9: memref<8x16x32xf32, #tpu.memory_space<vmem>>) attributes {dimension_semantics = [#tpu.dimension_semantics<parallel>], iteration_bounds = array<i64: 2>, scalar_prefetch = 0 : i64, scratch_operands = 0 : i64, tpu.core_type = #tpu.core_type<tc>, window_params = [{transform_indices = @transform_0, window_bounds = array<i64: 128, 128>}, {pipeline_mode = #tpu.pipeline_mode<synchronous>, transform_indices = @transform_1, window_bounds = array<i64: 128, 32>}, {pipeline_mode = #tpu.pipeline_mode<synchronous>, transform_indices = @transform_2, window_bounds = array<i64: 32, 32>}, {pipeline_mode = #tpu.pipeline_mode<synchronous>, transform_indices = @transform_3, window_bounds = array<i64: 1, 8, 128>}, {pipeline_mode = #tpu.pipeline_mode<synchronous>, transform_indices = @transform_4, window_bounds = array<i64: 1, 32, 96>}, {pipeline_mode = #tpu.pipeline_mode<synchronous>, transform_indices = @transform_5, window_bounds = array<i64: 1, 32, 32>}, {pipeline_mode = #tpu.pipeline_mode<synchronous>, transform_indices = @transform_6, window_bounds = array<i64: 1, 32, 64>}, {pipeline_mode = #tpu.pipeline_mode<synchronous>, transform_indices = @transform_7, window_bounds = array<i64: 1, 64, 32>}, {transform_indices = @transform_8, window_bounds = array<i64: 8, 16, 32>}]} {
    %c0 = arith.constant 0 : index
    %c0_0 = arith.constant 0 : index
    %0 = vector.load %arg1[%c0, %c0_0] : memref<128x128xf32, #tpu.memory_space<vmem>>, vector<128x128xf32>
    %1 = arith.truncf %0 : vector<128x128xf32> to vector<128x128xbf16>
    %c0_1 = arith.constant 0 : index
    %c0_2 = arith.constant 0 : index
    %2 = vector.load %arg2[%c0_1, %c0_2] : memref<128x32xbf16, #tpu.memory_space<vmem>>, vector<128x32xbf16>
    %cst = arith.constant dense<0.000000e+00> : vector<128x32xf32>
    %3 = tpu.matmul %1, %2, %cst {dimension_numbers = #tpu.dot_dimension_numbers<[1], [0], [0], [1], [0, 0, 1, 1], [], []>} : vector<128x128xbf16>, vector<128x32xbf16>, vector<128x32xf32> -> vector<128x32xf32>
    %4 = vector.shape_cast %3 : vector<128x32xf32> to vector<8x16x32xf32>
    %c0_3 = arith.constant 0 : index
    %c0_4 = arith.constant 0 : index
    %5 = vector.load %arg3[%c0_3, %c0_4] : memref<32x32xf32, #tpu.memory_space<vmem>>, vector<16x32xf32>
    %6 = vector.shape_cast %5 : vector<16x32xf32> to vector<1x16x32xf32>
    %7 = vector.broadcast %6 : vector<1x16x32xf32> to vector<8x16x32xf32>
    %8 = arith.addf %4, %7 : vector<8x16x32xf32>
    %c16 = arith.constant 16 : index
    %c0_5 = arith.constant 0 : index
    %9 = vector.load %arg3[%c16, %c0_5] : memref<32x32xf32, #tpu.memory_space<vmem>>, vector<8x32xf32>
    %10 = vector.shape_cast %9 : vector<8x32xf32> to vector<1x8x32xf32>
    %11 = vector.shape_cast %10 : vector<1x8x32xf32> to vector<1x8x32xf32>
    %12 = vector.broadcast %11 : vector<1x8x32xf32> to vector<8x8x32xf32>
    %13 = tpu.concatenate %8, %12 in 1 : vector<8x16x32xf32>, vector<8x8x32xf32> -> vector<8x24x32xf32>
    %c24 = arith.constant 24 : index
    %c0_6 = arith.constant 0 : index
    %14 = vector.load %arg3[%c24, %c0_6] : memref<32x32xf32, #tpu.memory_space<vmem>>, vector<1x32xf32>
    %c25 = arith.constant 25 : index
    %c0_7 = arith.constant 0 : index
    %15 = vector.load %arg3[%c25, %c0_7] : memref<32x32xf32, #tpu.memory_space<vmem>>, vector<1x32xf32>
    %cst_8 = arith.constant dense<0.000000e+00> : vector<8x24xf32>
    %16 = vector.multi_reduction <add>, %13, %cst_8 [2] : vector<8x24x32xf32> to vector<8x24xf32>
    %17 = vector.shape_cast %16 : vector<8x24xf32> to vector<8x24x1xf32>
    %cst_9 = arith.constant 3.200000e+01 : f32
    %18 = vector.broadcast %cst_9 : f32 to vector<8x24x1xf32>
    %19 = arith.divf %17, %18 : vector<8x24x1xf32>
    %20 = vector.broadcast %19 : vector<8x24x1xf32> to vector<8x24x32xf32>
    %21 = arith.subf %13, %20 : vector<8x24x32xf32>
    %22 = arith.mulf %21, %21 : vector<8x24x32xf32>
    %cst_10 = arith.constant dense<0.000000e+00> : vector<8x24xf32>
    %23 = vector.multi_reduction <add>, %22, %cst_10 [2] : vector<8x24x32xf32> to vector<8x24xf32>
    %24 = vector.shape_cast %23 : vector<8x24xf32> to vector<8x24x1xf32>
    %cst_11 = arith.constant 3.200000e+01 : f32
    %25 = vector.broadcast %cst_11 : f32 to vector<8x24x1xf32>
    %26 = arith.divf %24, %25 : vector<8x24x1xf32>
    %27 = vector.broadcast %19 : vector<8x24x1xf32> to vector<8x24x32xf32>
    %28 = arith.subf %13, %27 : vector<8x24x32xf32>
    %cst_12 = arith.constant 9.99999974E-6 : f32
    %29 = vector.broadcast %cst_12 : f32 to vector<8x24x1xf32>
    %30 = arith.addf %26, %29 : vector<8x24x1xf32>
    %31 = math.rsqrt %30 : vector<8x24x1xf32>
    %32 = vector.broadcast %31 : vector<8x24x1xf32> to vector<8x24x32xf32>
    %33 = arith.mulf %28, %32 : vector<8x24x32xf32>
    %34 = vector.shape_cast %14 : vector<1x32xf32> to vector<1x1x32xf32>
    %35 = vector.broadcast %34 : vector<1x1x32xf32> to vector<8x24x32xf32>
    %36 = arith.mulf %33, %35 : vector<8x24x32xf32>
    %37 = vector.shape_cast %15 : vector<1x32xf32> to vector<1x1x32xf32>
    %38 = vector.broadcast %37 : vector<1x1x32xf32> to vector<8x24x32xf32>
    %39 = arith.addf %36, %38 : vector<8x24x32xf32>
    %40 = tpu.iota {dimensions = array<i32: 1>} : vector<24x24xi32>
    %c17_i32 = arith.constant 17 : i32
    %41 = vector.broadcast %c17_i32 : i32 to vector<24x24xi32>
    %42 = arith.cmpi slt, %40, %41 : vector<24x24xi32>
    %cst_13 = arith.constant 0.000000e+00 : f32
    %cst_14 = arith.constant -1.000000e+30 : f32
    %43 = vector.broadcast %cst_13 : f32 to vector<24x24xf32>
    %44 = vector.broadcast %cst_14 : f32 to vector<24x24xf32>
    %45 = arith.select %42, %43, %44 : vector<24x24xi1>, vector<24x24xf32>
    %c0_15 = arith.constant 0 : index
    %c0_16 = arith.constant 0 : index
    %c0_17 = arith.constant 0 : index
    %46 = vector.load %arg4[%c0_15, %c0_16, %c0_17] : memref<1x8x128xf32, #tpu.memory_space<vmem>>, vector<1x8x128xf32>
    %47 = vector.shape_cast %46 : vector<1x8x128xf32> to vector<8x128xf32>
    %48 = vector.extract_strided_slice %47 {offsets = [0, 0], sizes = [1, 32], strides = [1, 1]} : vector<8x128xf32> to vector<1x32xf32>
    %49 = vector.extract_strided_slice %47 {offsets = [1, 0], sizes = [1, 32], strides = [1, 1]} : vector<8x128xf32> to vector<1x32xf32>
    %50 = vector.extract_strided_slice %47 {offsets = [2, 0], sizes = [1, 96], strides = [1, 1]} : vector<8x128xf32> to vector<1x96xf32>
    %51 = vector.extract_strided_slice %47 {offsets = [3, 0], sizes = [1, 32], strides = [1, 1]} : vector<8x128xf32> to vector<1x32xf32>
    %52 = vector.extract_strided_slice %47 {offsets = [4, 0], sizes = [1, 32], strides = [1, 1]} : vector<8x128xf32> to vector<1x32xf32>
    %53 = vector.extract_strided_slice %47 {offsets = [5, 0], sizes = [1, 32], strides = [1, 1]} : vector<8x128xf32> to vector<1x32xf32>
    %54 = vector.extract_strided_slice %47 {offsets = [6, 0], sizes = [1, 64], strides = [1, 1]} : vector<8x128xf32> to vector<1x64xf32>
    %55 = vector.extract_strided_slice %47 {offsets = [7, 0], sizes = [1, 32], strides = [1, 1]} : vector<8x128xf32> to vector<1x32xf32>
    %cst_18 = arith.constant dense<0.000000e+00> : vector<8x24xf32>
    %56 = vector.multi_reduction <add>, %39, %cst_18 [2] : vector<8x24x32xf32> to vector<8x24xf32>
    %57 = vector.shape_cast %56 : vector<8x24xf32> to vector<8x24x1xf32>
    %cst_19 = arith.constant 3.200000e+01 : f32
    %58 = vector.broadcast %cst_19 : f32 to vector<8x24x1xf32>
    %59 = arith.divf %57, %58 : vector<8x24x1xf32>
    %60 = vector.broadcast %59 : vector<8x24x1xf32> to vector<8x24x32xf32>
    %61 = arith.subf %39, %60 : vector<8x24x32xf32>
    %62 = arith.mulf %61, %61 : vector<8x24x32xf32>
    %cst_20 = arith.constant dense<0.000000e+00> : vector<8x24xf32>
    %63 = vector.multi_reduction <add>, %62, %cst_20 [2] : vector<8x24x32xf32> to vector<8x24xf32>
    %64 = vector.shape_cast %63 : vector<8x24xf32> to vector<8x24x1xf32>
    %cst_21 = arith.constant 3.200000e+01 : f32
    %65 = vector.broadcast %cst_21 : f32 to vector<8x24x1xf32>
    %66 = arith.divf %64, %65 : vector<8x24x1xf32>
    %67 = vector.broadcast %59 : vector<8x24x1xf32> to vector<8x24x32xf32>
    %68 = arith.subf %39, %67 : vector<8x24x32xf32>
    %cst_22 = arith.constant 9.99999974E-6 : f32
    %69 = vector.broadcast %cst_22 : f32 to vector<8x24x1xf32>
    %70 = arith.addf %66, %69 : vector<8x24x1xf32>
    %71 = math.rsqrt %70 : vector<8x24x1xf32>
    %72 = vector.broadcast %71 : vector<8x24x1xf32> to vector<8x24x32xf32>
    %73 = arith.mulf %68, %72 : vector<8x24x32xf32>
    %74 = vector.shape_cast %48 : vector<1x32xf32> to vector<1x1x32xf32>
    %75 = vector.broadcast %74 : vector<1x1x32xf32> to vector<8x24x32xf32>
    %76 = arith.mulf %73, %75 : vector<8x24x32xf32>
    %77 = vector.shape_cast %49 : vector<1x32xf32> to vector<1x1x32xf32>
    %78 = vector.broadcast %77 : vector<1x1x32xf32> to vector<8x24x32xf32>
    %79 = arith.addf %76, %78 : vector<8x24x32xf32>
    %80 = vector.shape_cast %79 : vector<8x24x32xf32> to vector<192x32xf32>
    %81 = arith.truncf %80 : vector<192x32xf32> to vector<192x32xbf16>
    %c0_23 = arith.constant 0 : index
    %c0_24 = arith.constant 0 : index
    %c0_25 = arith.constant 0 : index
    %82 = vector.load %arg5[%c0_23, %c0_24, %c0_25] : memref<1x32x96xbf16, #tpu.memory_space<vmem>>, vector<1x32x96xbf16>
    %83 = vector.shape_cast %82 : vector<1x32x96xbf16> to vector<32x96xbf16>
    %cst_26 = arith.constant dense<0.000000e+00> : vector<192x96xf32>
    %84 = tpu.matmul %81, %83, %cst_26 {dimension_numbers = #tpu.dot_dimension_numbers<[1], [0], [0], [1], [0, 0, 1, 1], [], []>} : vector<192x32xbf16>, vector<32x96xbf16>, vector<192x96xf32> -> vector<192x96xf32>
    %85 = vector.broadcast %50 : vector<1x96xf32> to vector<192x96xf32>
    %86 = arith.addf %84, %85 : vector<192x96xf32>
    %87 = vector.shape_cast %86 : vector<192x96xf32> to vector<8x24x96xf32>
    %88 = vector.extract_strided_slice %87 {offsets = [0, 0, 0], sizes = [8, 24, 16], strides = [1, 1, 1]} : vector<8x24x96xf32> to vector<8x24x16xf32>
    %89 = vector.extract_strided_slice %87 {offsets = [0, 0, 32], sizes = [8, 24, 16], strides = [1, 1, 1]} : vector<8x24x96xf32> to vector<8x24x16xf32>
    %90 = vector.extract_strided_slice %87 {offsets = [0, 0, 64], sizes = [8, 24, 16], strides = [1, 1, 1]} : vector<8x24x96xf32> to vector<8x24x16xf32>
    %91 = arith.truncf %88 : vector<8x24x16xf32> to vector<8x24x16xbf16>
    %92 = arith.truncf %89 : vector<8x24x16xf32> to vector<8x24x16xbf16>
    "tpu.trace_start"() <{level = 10 : i32, message = "bqd,bkd->bqk"}> : () -> ()
    %cst_27 = arith.constant dense<0.000000e+00> : vector<8x24x24xf32>
    %93 = tpu.matmul %91, %92, %cst_27 {dimension_numbers = #tpu.dot_dimension_numbers<[2], [2], [1], [1], [0, 0, 0, 1, 1, 1], [0], [0]>} : vector<8x24x16xbf16>, vector<8x24x16xbf16>, vector<8x24x24xf32> -> vector<8x24x24xf32>
    "tpu.trace_stop"() : () -> ()
    %94 = vector.shape_cast %45 : vector<24x24xf32> to vector<1x24x24xf32>
    %95 = vector.broadcast %94 : vector<1x24x24xf32> to vector<8x24x24xf32>
    %96 = arith.addf %93, %95 : vector<8x24x24xf32>
    %cst_28 = arith.constant dense<0xFF800000> : vector<8x24xf32>
    %97 = vector.multi_reduction <maximumf>, %96, %cst_28 [2] : vector<8x24x24xf32> to vector<8x24xf32>
    %98 = vector.shape_cast %97 : vector<8x24xf32> to vector<8x24x1xf32>
    %99 = vector.broadcast %98 : vector<8x24x1xf32> to vector<8x24x24xf32>
    %100 = arith.subf %96, %99 : vector<8x24x24xf32>
    %101 = math.exp %100 : vector<8x24x24xf32>
    %cst_29 = arith.constant dense<0.000000e+00> : vector<8x24xf32>
    %102 = vector.multi_reduction <add>, %101, %cst_29 [2] : vector<8x24x24xf32> to vector<8x24xf32>
    %103 = vector.shape_cast %102 : vector<8x24xf32> to vector<8x24x1xf32>
    %104 = tpu.reciprocal %103 {approx = true} : vector<8x24x1xf32> -> vector<8x24x1xf32>
    %105 = vector.broadcast %104 : vector<8x24x1xf32> to vector<8x24x24xf32>
    %106 = arith.mulf %101, %105 : vector<8x24x24xf32>
    %107 = arith.truncf %106 : vector<8x24x24xf32> to vector<8x24x24xbf16>
    %108 = arith.truncf %90 : vector<8x24x16xf32> to vector<8x24x16xbf16>
    "tpu.trace_start"() <{level = 10 : i32, message = "bqk,bkd->bqd"}> : () -> ()
    %cst_30 = arith.constant dense<0.000000e+00> : vector<8x24x16xf32>
    %109 = tpu.matmul %107, %108, %cst_30 {dimension_numbers = #tpu.dot_dimension_numbers<[2], [1], [1], [2], [0, 0, 0, 1, 1, 2], [0], [0]>} : vector<8x24x24xbf16>, vector<8x24x16xbf16>, vector<8x24x16xf32> -> vector<8x24x16xf32>
    "tpu.trace_stop"() : () -> ()
    %110 = vector.extract_strided_slice %87 {offsets = [0, 0, 16], sizes = [8, 24, 16], strides = [1, 1, 1]} : vector<8x24x96xf32> to vector<8x24x16xf32>
    %111 = vector.extract_strided_slice %87 {offsets = [0, 0, 48], sizes = [8, 24, 16], strides = [1, 1, 1]} : vector<8x24x96xf32> to vector<8x24x16xf32>
    %112 = vector.extract_strided_slice %87 {offsets = [0, 0, 80], sizes = [8, 24, 16], strides = [1, 1, 1]} : vector<8x24x96xf32> to vector<8x24x16xf32>
    %113 = arith.truncf %110 : vector<8x24x16xf32> to vector<8x24x16xbf16>
    %114 = arith.truncf %111 : vector<8x24x16xf32> to vector<8x24x16xbf16>
    "tpu.trace_start"() <{level = 10 : i32, message = "bqd,bkd->bqk"}> : () -> ()
    %cst_31 = arith.constant dense<0.000000e+00> : vector<8x24x24xf32>
    %115 = tpu.matmul %113, %114, %cst_31 {dimension_numbers = #tpu.dot_dimension_numbers<[2], [2], [1], [1], [0, 0, 0, 1, 1, 1], [0], [0]>} : vector<8x24x16xbf16>, vector<8x24x16xbf16>, vector<8x24x24xf32> -> vector<8x24x24xf32>
    "tpu.trace_stop"() : () -> ()
    %116 = vector.shape_cast %45 : vector<24x24xf32> to vector<1x24x24xf32>
    %117 = vector.broadcast %116 : vector<1x24x24xf32> to vector<8x24x24xf32>
    %118 = arith.addf %115, %117 : vector<8x24x24xf32>
    %cst_32 = arith.constant dense<0xFF800000> : vector<8x24xf32>
    %119 = vector.multi_reduction <maximumf>, %118, %cst_32 [2] : vector<8x24x24xf32> to vector<8x24xf32>
    %120 = vector.shape_cast %119 : vector<8x24xf32> to vector<8x24x1xf32>
    %121 = vector.broadcast %120 : vector<8x24x1xf32> to vector<8x24x24xf32>
    %122 = arith.subf %118, %121 : vector<8x24x24xf32>
    %123 = math.exp %122 : vector<8x24x24xf32>
    %cst_33 = arith.constant dense<0.000000e+00> : vector<8x24xf32>
    %124 = vector.multi_reduction <add>, %123, %cst_33 [2] : vector<8x24x24xf32> to vector<8x24xf32>
    %125 = vector.shape_cast %124 : vector<8x24xf32> to vector<8x24x1xf32>
    %126 = tpu.reciprocal %125 {approx = true} : vector<8x24x1xf32> -> vector<8x24x1xf32>
    %127 = vector.broadcast %126 : vector<8x24x1xf32> to vector<8x24x24xf32>
    %128 = arith.mulf %123, %127 : vector<8x24x24xf32>
    %129 = arith.truncf %128 : vector<8x24x24xf32> to vector<8x24x24xbf16>
    %130 = arith.truncf %112 : vector<8x24x16xf32> to vector<8x24x16xbf16>
    "tpu.trace_start"() <{level = 10 : i32, message = "bqk,bkd->bqd"}> : () -> ()
    %cst_34 = arith.constant dense<0.000000e+00> : vector<8x24x16xf32>
    %131 = tpu.matmul %129, %130, %cst_34 {dimension_numbers = #tpu.dot_dimension_numbers<[2], [1], [1], [2], [0, 0, 0, 1, 1, 2], [0], [0]>} : vector<8x24x24xbf16>, vector<8x24x16xbf16>, vector<8x24x16xf32> -> vector<8x24x16xf32>
    "tpu.trace_stop"() : () -> ()
    %132 = tpu.concatenate %109, %131 in 2 : vector<8x24x16xf32>, vector<8x24x16xf32> -> vector<8x24x32xf32>
    %133 = vector.shape_cast %132 : vector<8x24x32xf32> to vector<192x32xf32>
    %134 = arith.truncf %133 : vector<192x32xf32> to vector<192x32xbf16>
    %c0_35 = arith.constant 0 : index
    %c0_36 = arith.constant 0 : index
    %c0_37 = arith.constant 0 : index
    %135 = vector.load %arg6[%c0_35, %c0_36, %c0_37] : memref<1x32x32xbf16, #tpu.memory_space<vmem>>, vector<1x32x32xbf16>
    %136 = vector.shape_cast %135 : vector<1x32x32xbf16> to vector<32x32xbf16>
    %cst_38 = arith.constant dense<0.000000e+00> : vector<192x32xf32>
    %137 = tpu.matmul %134, %136, %cst_38 {dimension_numbers = #tpu.dot_dimension_numbers<[1], [0], [0], [1], [0, 0, 1, 1], [], []>} : vector<192x32xbf16>, vector<32x32xbf16>, vector<192x32xf32> -> vector<192x32xf32>
    %138 = vector.broadcast %51 : vector<1x32xf32> to vector<192x32xf32>
    %139 = arith.addf %137, %138 : vector<192x32xf32>
    %140 = vector.shape_cast %139 : vector<192x32xf32> to vector<8x24x32xf32>
    %141 = arith.addf %39, %140 : vector<8x24x32xf32>
    %cst_39 = arith.constant dense<0.000000e+00> : vector<8x24xf32>
    %142 = vector.multi_reduction <add>, %141, %cst_39 [2] : vector<8x24x32xf32> to vector<8x24xf32>
    %143 = vector.shape_cast %142 : vector<8x24xf32> to vector<8x24x1xf32>
    %cst_40 = arith.constant 3.200000e+01 : f32
    %144 = vector.broadcast %cst_40 : f32 to vector<8x24x1xf32>
    %145 = arith.divf %143, %144 : vector<8x24x1xf32>
    %146 = vector.broadcast %145 : vector<8x24x1xf32> to vector<8x24x32xf32>
    %147 = arith.subf %141, %146 : vector<8x24x32xf32>
    %148 = arith.mulf %147, %147 : vector<8x24x32xf32>
    %cst_41 = arith.constant dense<0.000000e+00> : vector<8x24xf32>
    %149 = vector.multi_reduction <add>, %148, %cst_41 [2] : vector<8x24x32xf32> to vector<8x24xf32>
    %150 = vector.shape_cast %149 : vector<8x24xf32> to vector<8x24x1xf32>
    %cst_42 = arith.constant 3.200000e+01 : f32
    %151 = vector.broadcast %cst_42 : f32 to vector<8x24x1xf32>
    %152 = arith.divf %150, %151 : vector<8x24x1xf32>
    %153 = vector.broadcast %145 : vector<8x24x1xf32> to vector<8x24x32xf32>
    %154 = arith.subf %141, %153 : vector<8x24x32xf32>
    %cst_43 = arith.constant 9.99999974E-6 : f32
    %155 = vector.broadcast %cst_43 : f32 to vector<8x24x1xf32>
    %156 = arith.addf %152, %155 : vector<8x24x1xf32>
    %157 = math.rsqrt %156 : vector<8x24x1xf32>
    %158 = vector.broadcast %157 : vector<8x24x1xf32> to vector<8x24x32xf32>
    %159 = arith.mulf %154, %158 : vector<8x24x32xf32>
    %160 = vector.shape_cast %52 : vector<1x32xf32> to vector<1x1x32xf32>
    %161 = vector.broadcast %160 : vector<1x1x32xf32> to vector<8x24x32xf32>
    %162 = arith.mulf %159, %161 : vector<8x24x32xf32>
    %163 = vector.shape_cast %53 : vector<1x32xf32> to vector<1x1x32xf32>
    %164 = vector.broadcast %163 : vector<1x1x32xf32> to vector<8x24x32xf32>
    %165 = arith.addf %162, %164 : vector<8x24x32xf32>
    %166 = vector.shape_cast %165 : vector<8x24x32xf32> to vector<192x32xf32>
    %167 = arith.truncf %166 : vector<192x32xf32> to vector<192x32xbf16>
    %c0_44 = arith.constant 0 : index
    %c0_45 = arith.constant 0 : index
    %c0_46 = arith.constant 0 : index
    %168 = vector.load %arg7[%c0_44, %c0_45, %c0_46] : memref<1x32x64xbf16, #tpu.memory_space<vmem>>, vector<1x32x64xbf16>
    %169 = vector.shape_cast %168 : vector<1x32x64xbf16> to vector<32x64xbf16>
    %cst_47 = arith.constant dense<0.000000e+00> : vector<192x64xf32>
    %170 = tpu.matmul %167, %169, %cst_47 {dimension_numbers = #tpu.dot_dimension_numbers<[1], [0], [0], [1], [0, 0, 1, 1], [], []>} : vector<192x32xbf16>, vector<32x64xbf16>, vector<192x64xf32> -> vector<192x64xf32>
    %171 = vector.broadcast %54 : vector<1x64xf32> to vector<192x64xf32>
    %172 = arith.addf %170, %171 : vector<192x64xf32>
    %cst_48 = arith.constant 1.702000e+00 : f32
    %173 = vector.broadcast %cst_48 : f32 to vector<192x64xf32>
    %174 = arith.mulf %173, %172 : vector<192x64xf32>
    %175 = arith.negf %174 : vector<192x64xf32>
    %176 = math.exp %175 : vector<192x64xf32>
    %cst_49 = arith.constant 1.000000e+00 : f32
    %177 = vector.broadcast %cst_49 : f32 to vector<192x64xf32>
    %178 = arith.addf %177, %176 : vector<192x64xf32>
    %179 = arith.divf %177, %178 : vector<192x64xf32>
    %180 = arith.mulf %172, %179 : vector<192x64xf32>
    %181 = arith.truncf %180 : vector<192x64xf32> to vector<192x64xbf16>
    %c0_50 = arith.constant 0 : index
    %c0_51 = arith.constant 0 : index
    %c0_52 = arith.constant 0 : index
    %182 = vector.load %arg8[%c0_50, %c0_51, %c0_52] : memref<1x64x32xbf16, #tpu.memory_space<vmem>>, vector<1x64x32xbf16>
    %183 = vector.shape_cast %182 : vector<1x64x32xbf16> to vector<64x32xbf16>
    %cst_53 = arith.constant dense<0.000000e+00> : vector<192x32xf32>
    %184 = tpu.matmul %181, %183, %cst_53 {dimension_numbers = #tpu.dot_dimension_numbers<[1], [0], [0], [1], [0, 0, 1, 1], [], []>} : vector<192x64xbf16>, vector<64x32xbf16>, vector<192x32xf32> -> vector<192x32xf32>
    %185 = vector.broadcast %55 : vector<1x32xf32> to vector<192x32xf32>
    %186 = arith.addf %184, %185 : vector<192x32xf32>
    %187 = vector.shape_cast %186 : vector<192x32xf32> to vector<8x24x32xf32>
    %188 = arith.addf %141, %187 : vector<8x24x32xf32>
    %189 = vector.extract_strided_slice %188 {offsets = [0, 0, 0], sizes = [8, 16, 32], strides = [1, 1, 1]} : vector<8x24x32xf32> to vector<8x16x32xf32>
    %c0_54 = arith.constant 0 : index
    %c0_55 = arith.constant 0 : index
    %c0_56 = arith.constant 0 : index
    %190 = vector.load %arg9[%c0_54, %c0_55, %c0_56] : memref<8x16x32xf32, #tpu.memory_space<vmem>>, vector<8x16x32xf32>
    tpu.vector_store %arg9[%c0_54, %c0_55, %c0_56], %189 {strides = array<i32>} : memref<8x16x32xf32, #tpu.memory_space<vmem>>, vector<8x16x32xf32>,
    return
  }
  func.func @transform_0(%arg0: i32) -> (i32, i32) {
    %c0_i32 = arith.constant 0 : i32
    %c0_i32_0 = arith.constant 0 : i32
    return %arg0, %c0_i32 : i32, i32
  }
  func.func @transform_1(%arg0: i32) -> (i32, i32) {
    %c0_i32 = arith.constant 0 : i32
    %c0_i32_0 = arith.constant 0 : i32
    %c0_i32_1 = arith.constant 0 : i32
    return %c0_i32, %c0_i32_0 : i32, i32
  }
  func.func @transform_2(%arg0: i32) -> (i32, i32) {
    %c0_i32 = arith.constant 0 : i32
    %c0_i32_0 = arith.constant 0 : i32
    %c0_i32_1 = arith.constant 0 : i32
    return %c0_i32, %c0_i32_0 : i32, i32
  }
  func.func @transform_3(%arg0: i32) -> (i32, i32, i32) {
    %c0_i32 = arith.constant 0 : i32
    %c0_i32_0 = arith.constant 0 : i32
    %c0_i32_1 = arith.constant 0 : i32
    %c0_i32_2 = arith.constant 0 : i32
    return %c0_i32, %c0_i32_0, %c0_i32_1 : i32, i32, i32
  }
  func.func @transform_4(%arg0: i32) -> (i32, i32, i32) {
    %c0_i32 = arith.constant 0 : i32
    %c0_i32_0 = arith.constant 0 : i32
    %c0_i32_1 = arith.constant 0 : i32
    %c0_i32_2 = arith.constant 0 : i32
    return %c0_i32, %c0_i32_0, %c0_i32_1 : i32, i32, i32
  }
  func.func @transform_5(%arg0: i32) -> (i32, i32, i32) {
    %c0_i32 = arith.constant 0 : i32
    %c0_i32_0 = arith.constant 0 : i32
    %c0_i32_1 = arith.constant 0 : i32
    %c0_i32_2 = arith.constant 0 : i32
    return %c0_i32, %c0_i32_0, %c0_i32_1 : i32, i32, i32
  }
  func.func @transform_6(%arg0: i32) -> (i32, i32, i32) {
    %c0_i32 = arith.constant 0 : i32
    %c0_i32_0 = arith.constant 0 : i32
    %c0_i32_1 = arith.constant 0 : i32
    %c0_i32_2 = arith.constant 0 : i32
    return %c0_i32, %c0_i32_0, %c0_i32_1 : i32, i32, i32
  }
  func.func @transform_7(%arg0: i32) -> (i32, i32, i32) {
    %c0_i32 = arith.constant 0 : i32
    %c0_i32_0 = arith.constant 0 : i32
    %c0_i32_1 = arith.constant 0 : i32
    %c0_i32_2 = arith.constant 0 : i32
    return %c0_i32, %c0_i32_0, %c0_i32_1 : i32, i32, i32
  }
  func.func @transform_8(%arg0: i32) -> (i32, i32, i32) {
    %c0_i32 = arith.constant 0 : i32
    %c0_i32_0 = arith.constant 0 : i32
    %c0_i32_1 = arith.constant 0 : i32
    return %arg0, %c0_i32, %c0_i32_0 : i32, i32, i32
  }
}

</mosaic_0001>

<bundles_post_ra>
// kernel: s2_forward.1
= control target key start
LH: loop header
LB: loop body
LE: loop exit
PB: predicated region body
PF: predicated region fallthrough
CT: control target
= control target key end

     0   :  { %s6671_s27 = smov 0   ;;  %s8983_s0 = inlined_call_operand.vmem [shape: f32[256,128], index: 0, kind: input, shape index: {}]   ;;  %s8984_s1 = inlined_call_operand.vmem [shape: bf16[128,32], index: 1, kind: input, shape index: {}]   ;;  %s8985_s2 = inlined_call_operand.vmem [shape: f32[32,32], index: 2, kind: input, shape index: {}]   ;;  %s8986_s3 = inlined_call_operand.vmem [shape: f32[1,8,128], index: 3, kind: input, shape index: {}]   ;;  %s8987_s4 = inlined_call_operand.vmem [shape: bf16[1,32,96], index: 4, kind: input, shape index: {}]   ;;  %s8988_s5 = inlined_call_operand.vmem [shape: bf16[1,32,32], index: 5, kind: input, shape index: {}]   ;;  %s8989_s6 = inlined_call_operand.vmem [shape: bf16[1,32,64], index: 6, kind: input, shape index: {}]   ;;  %s8990_s7 = inlined_call_operand.vmem [shape: bf16[1,64,32], index: 7, kind: input, shape index: {}]   ;;  %s8991_s8 = inlined_call_operand.vmem [shape: f32[16,16,32], index: 8, kind: output, shape index: {}]  }
   0x1 LB: > { %s5285_s28 = sadd.s32 4294967295, %s6617_s27   ;;  %p5289_p0 = scmp.ge.s32.totalorder %s6617_s27, 1  ;;  %s6617_s27 = sphi %s6671_s27, %s18_s27  }
   0x2   : > { %p263_p1 = scmp.lt.s32.totalorder %s6617_s27, 3 }
   0x4   : > { %p264_p2 = pnand %p5289_p0, %p263_p1 }
   0x6   : > { %267 = sbr.rel (%p264_p2) target bundleno = 3837 (0xefd), region = 52 }
   0xd   : > { %v6187_v0 = vld [vmem:[%s8984_s1] sm:$0xff]   ;;  %s5290_s9 = sshll.u32 %s5285_s28, 4  ;;  %v6188_v1 = vld [vmem:[%s8984_s1 + $0x8] sm:$0xff]   ;;  %v6189_v2 = vld [vmem:[%s8984_s1 + $0x10] sm:$0xff]   ;;  %vm518_vm0 = vcmask 261120   ;;  %s6619_s24 = smov 96  }
   0xe   : > { %p299_p3 = scmp.lt.s32.totalorder %s5290_s9, 31  ;;  %5656 = vmatprep.subr.bf16.mxu0 %v6187_v0  ;;  %v6190_v3 = vld [vmem:[%s8984_s1 + $0x18] sm:$0xff]   ;;  %v6191_v7 = vld [vmem:[%s8984_s1 + $0x20] sm:$0xff]   ;;  %v6706_v8 = vld [vmem:[%s8985_s2 + $0x10] sm:$0xff]  ;;  %vm1270_vm1 = vcmask 130048   ;;  %s6620_s25 = smov 64  }
   0xf   : > { %5657 = vmatpush3.bf16.msra.mxu0 %v6187_v0  ;;  %v6192_v9 = vld [vmem:[%s8984_s1 + $0x28] sm:$0xff]   ;;  %v525_v10 = vsel %vm518_vm0, %v6706_v8, 0.0  ;;  %v6193_v11 = vld [vmem:[%s8984_s1 + $0x30] sm:$0xff]   ;;  %v6194_v12 = vld [vmem:[%s8984_s1 + $0x38] sm:$0xff]   ;;  %vm2085_vm2 = vcmask 1043456   ;;  %vm1793_vm4 = vcmask 195584  }
  0x10   : > { %s9075_s9 = smov (!%p299_p3, %s5290_s9), 31  ;;  %5658 = vmatprep.subr.bf16.mxu0 %v6188_v1  ;;  %526 = vadd.xlane.f32.xlu1 %v525_v10  ;;  %v497_v34 = vld [vmem:[%s8985_s2] sm:$0xff]  ;;  %v498_v38 = vld [vmem:[%s8985_s2 + $0x8] sm:$0xff]  ;;  %s6622_s26 = smov 80   ;;  %vm5037_vm5 = vcmask 523264  }
  0x11   : > { %s5291_s14 = sshll.u32 %s9075_s9, 3  ;;  %s6623_s29 = smov 112  }
  0x12   : > { %s6693_s17 = scalar_lea.vmem %s8983_s0, %s5291_s14  ;;  %s6624_s30 = smov 48  }
  0x13   : > { %5659 = vmatpush3.bf16.msra.mxu0 %v6188_v1  ;;  %v312_v4 = vld [vmem:[%s6693_s17] sm:$0xff]  ;;  %v313_v5 = vld [vmem:[%s6693_s17 + $0x8] sm:$0xff]  ;;  %v314_v13 = vld [vmem:[%s6693_s17 + $0x10] sm:$0xff]  ;;  %s6625_s11 = smov 16  }
  0x14   : > { %5660 = vmatprep.subr.bf16.mxu0 %v6189_v2  ;;  %v328_v6 = vpack.c.bf16 %v313_v5, %v312_v4  ;;  %v315_v14 = vld [vmem:[%s6693_s17 + $0x18] sm:$0xff]  ;;  %v316_v15 = vld [vmem:[%s6693_s17 + $0x20] sm:$0xff]  ;;  %v317_v16 = vld [vmem:[%s6693_s17 + $0x28] sm:$0xff] }
  0x15   : > { %v329_v17 = vpack.c.bf16 %v315_v14, %v314_v13  ;;  %v330_v18 = vpack.c.bf16 %v317_v16, %v316_v15  ;;  %v318_v19 = vld [vmem:[%s6693_s17 + $0x30] sm:$0xff]  ;;  %v319_v20 = vld [vmem:[%s6693_s17 + $0x38] sm:$0xff]  ;;  %v320_v21 = vld [vmem:[%s6693_s17 + $0x40] sm:$0xff] }
  0x16   : > { %5672 = vmatprep.mubr.bf16.mxu0 %v328_v6  ;;  %v321_v22 = vld [vmem:[%s6693_s17 + $0x48] sm:$0xff]  ;;  %v331_v23 = vpack.c.bf16 %v319_v20, %v318_v19  ;;  %v322_v25 = vld [vmem:[%s6693_s17 + $0x50] sm:$0xff]  ;;  %v323_v26 = vld [vmem:[%s6693_s17 + $0x58] sm:$0xff] }
  0x17   : > { %5661 = vmatpush3.bf16.msra.mxu0 %v6189_v2  ;;  %v332_v24 = vpack.c.bf16 %v321_v22, %v320_v21  ;;  %v324_v27 = vld [vmem:[%s6693_s17 + $0x60] sm:$0xff]  ;;  %v325_v28 = vld [vmem:[%s6693_s17 + $0x68] sm:$0xff]  ;;  %v333_v29 = vpack.c.bf16 %v323_v26, %v322_v25  ;;  %v326_v31 = vld [vmem:[%s6693_s17 + $0x70] sm:$0xff] }
  0x18   : > { %5662 = vmatprep.subr.bf16.mxu0 %v6190_v3  ;;  %v334_v30 = vpack.c.bf16 %v325_v28, %v324_v27  ;;  %v327_v32 = vld [vmem:[%s6693_s17 + $0x78] sm:$0xff] }
  0x19   : > { %v335_v33 = vpack.c.bf16 %v327_v32, %v326_v31 }
  0x1b   : > { %5663 = vmatpush3.bf16.msra.mxu0 %v6190_v3 }
  0x1c   : > { %5664 = vmatprep.subr.bf16.mxu0 %v6191_v7 }
  0x1f   : > { %5665 = vmatpush3.bf16.msra.mxu0 %v6191_v7 }
  0x20   : > { %5666 = vmatprep.subr.bf16.mxu0 %v6192_v9 }
  0x23   : > { %5667 = vmatpush3.bf16.msra.mxu0 %v6192_v9 }
  0x24   : > { %5668 = vmatprep.subr.bf16.mxu0 %v6193_v11 }
  0x27   : > { %5669 = vmatpush3.bf16.msra.mxu0 %v6193_v11 }
  0x28   : > { %5670 = vmatprep.subr.bf16.mxu0 %v6194_v12 }
  0x2b   : > { %5671 = vmatpush3.bf16.msra.mxu0 %v6194_v12 }
  0x2e   : > { %5673 = vmatmul.mubr.bf16.vlgmr.msra.gmra.mrb[0].mxu0 %v329_v17 }
  0x2f   : > { %5676 = vmatprep.mubr.bf16.mxu0 %v330_v18 }
  0x36   : > { %5677 = vmatmul.mubr.bf16.gmra.mrb[4].mxu0 %v331_v23 }
  0x37   : > { %5680 = vmatprep.mubr.bf16.mxu0 %v332_v24 }
  0x3e   : > { %5681 = vmatmul.mubr.bf16.gmra.mrb[8].mxu0 %v333_v29 }
  0x3f   : > { %5684 = vmatprep.mubr.bf16.mxu0 %v334_v30 }
  0x46   : > { %5685 = vmatmul.mubr.bf16.gmra.mrb[12].mxu0 %v335_v33 }
  0x9d   : > { %v527_v21 = vpop.xlane.xlu1 %526 }
  0x9e   : > { %v573_v22 = vmul.f32 0.03125, %v527_v21 }
  0xa0   : > { %v6804_v25 = vsub.f32 %v6706_v8, %v573_v22 }
  0xa2   : > { %v607_v32 = vmul.f32 %v6804_v25, %v6804_v25 }
 0x101   : > { %v5674_v35 = vpop.f32.mrb[0].mxu0 }
 0x102   : > { %v6736_v36 = vadd.f32 %v5674_v35, %v497_v34  ;;  %v434_v37 = vpop.f32.mrb[1].mxu0 }
 0x103   : > { %v6741_v39 = vadd.f32 %v497_v34, %v434_v37  ;;  %v5675_v40 = vpop.f32.mrb[2].mxu0 }
 0x104   : > { %v437_v41 = vpop.f32.mrb[3].mxu0  ;;  %v528_v42 = vsel %vm518_vm0, %v6736_v36, 0.0  ;;  %v6749_v45 = vadd.f32 %v5675_v40, %v498_v38  ;;  %v628_v40 = vsel %vm518_vm0, %v607_v32, 0.0 }
 0x105   : > { %v6745_v43 = vadd.f32 %v498_v38, %v437_v41  ;;  %529 = vadd.xlane.f32.xlu1 %v528_v42  ;;  %v519_v44 = vsel %vm518_vm0, %v6741_v39, 0.0 }
 0x106   : > { %520 = vadd.xlane.f32.xlu0 %v519_v44  ;;  %v531_v53 = vsel %vm518_vm0, %v6749_v45, 0.0 }
 0x107   : > { %v522_v47 = vsel %vm518_vm0, %v6745_v43, 0.0 }
 0x109   : > { %v5678_v46 = vpop.f32.mrb[4].mxu0 }
 0x10a   : > { %523 = vadd.xlane.f32.xlu0 %v522_v47  ;;  %v450_v48 = vpop.f32.mrb[5].mxu0  ;;  %v6753_v49 = vadd.f32 %v5678_v46, %v497_v34 }
 0x10b   : > { %v6755_v50 = vadd.f32 %v497_v34, %v450_v48  ;;  %v5679_v51 = vpop.f32.mrb[6].mxu0 }
 0x10c   : > { %v453_v52 = vpop.f32.mrb[7].mxu0  ;;  %v6763_v56 = vadd.f32 %v5679_v51, %v498_v38  ;;  %v540_v57 = vsel %vm518_vm0, %v6753_v49, 0.0 }
 0x10d   : > { %v534_v54 = vsel %vm518_vm0, %v6755_v50, 0.0  ;;  %v6761_v55 = vadd.f32 %v498_v38, %v453_v52 }
 0x10e   : > { %532 = vadd.xlane.f32.xlu0 %v531_v53  ;;  %535 = vadd.xlane.f32.xlu1 %v534_v54  ;;  %v543_v0 = vsel %vm518_vm0, %v6763_v56, 0.0 }
 0x10f   : > { %v537_v58 = vsel %vm518_vm0, %v6761_v55, 0.0 }
 0x111   : > { %v5682_v59 = vpop.f32.mrb[8].mxu0 }
 0x112   : > { %541 = vadd.xlane.f32.xlu1 %v540_v57  ;;  %538 = vadd.xlane.f32.xlu0 %v537_v58  ;;  %v466_v60 = vpop.f32.mrb[9].mxu0  ;;  %v6769_v61 = vadd.f32 %v5682_v59, %v497_v34 }
 0x113   : > { %v6771_v62 = vadd.f32 %v497_v34, %v466_v60  ;;  %v5683_v63 = vpop.f32.mrb[10].mxu0 }
 0x114   : > { %v469_v1 = vpop.f32.mrb[11].mxu0  ;;  %v6779_v4 = vadd.f32 %v5683_v63, %v498_v38  ;;  %v552_v5 = vsel %vm518_vm0, %v6769_v61, 0.0 }
 0x115   : > { %v546_v2 = vsel %vm518_vm0, %v6771_v62, 0.0  ;;  %v6777_v3 = vadd.f32 %v498_v38, %v469_v1 }
 0x116   : > { %544 = vadd.xlane.f32.xlu0 %v543_v0  ;;  %547 = vadd.xlane.f32.xlu1 %v546_v2  ;;  %v555_v13 = vsel %vm518_vm0, %v6779_v4, 0.0 }
 0x117   : > { %v549_v6 = vsel %vm518_vm0, %v6777_v3, 0.0 }
 0x119   : > { %v5686_v7 = vpop.f32.mrb[12].mxu0 }
 0x11a   : > { %553 = vadd.xlane.f32.xlu1 %v552_v5  ;;  %550 = vadd.xlane.f32.xlu0 %v549_v6  ;;  %v482_v9 = vpop.f32.mrb[13].mxu0  ;;  %v6785_v10 = vadd.f32 %v5686_v7, %v497_v34 }
 0x11b   : > { %v6787_v11 = vadd.f32 %v497_v34, %v482_v9  ;;  %v5687_v12 = vpop.f32.mrb[14].mxu0 }
 0x11c   : > { %v485_v14 = vpop.f32.mrb[15].mxu0  ;;  %v6795_v17 = vadd.f32 %v5687_v12, %v498_v38  ;;  %v564_v18 = vsel %vm518_vm0, %v6785_v10, 0.0 }
 0x11d   : > { %v558_v15 = vsel %vm518_vm0, %v6787_v11, 0.0  ;;  %v6793_v16 = vadd.f32 %v498_v38, %v485_v14 }
 0x11e   : > { %556 = vadd.xlane.f32.xlu0 %v555_v13  ;;  %559 = vadd.xlane.f32.xlu1 %v558_v15  ;;  %v567_v20 = vsel %vm518_vm0, %v6795_v17, 0.0 }
 0x11f   : > { %v561_v19 = vsel %vm518_vm0, %v6793_v16, 0.0 }
 0x122   : > { %565 = vadd.xlane.f32.xlu1 %v564_v18  ;;  %562 = vadd.xlane.f32.xlu0 %v561_v19 }
 0x126   : > { %568 = vadd.xlane.f32.xlu0 %v567_v20 }
 0x192   : > { %v530_v23 = vpop.xlane.xlu1 %529 }
 0x193   : > { %v521_v24 = vpop.xlane.xlu0 %520  ;;  %v574_v27 = vmul.f32 0.03125, %v530_v23 }
 0x194   : > { %v571_v26 = vmul.f32 0.03125, %v521_v24 }
 0x195   : > { %v6814_v33 = vsub.f32 %v6736_v36, %v574_v27 }
 0x196   : > { %v6807_v28 = vsub.f32 %v6741_v39, %v571_v26 }
 0x197   : > { %v524_v29 = vpop.xlane.xlu0 %523  ;;  %v608_v42 = vmul.f32 %v6814_v33, %v6814_v33 }
 0x198   : > { %v572_v30 = vmul.f32 0.03125, %v524_v29  ;;  %v605_v31 = vmul.f32 %v6807_v28, %v6807_v28 }
 0x199   : > { %v631_v53 = vsel %vm518_vm0, %v608_v42, 0.0 }
 0x19a   : > { %v6817_v34 = vsub.f32 %v6745_v43, %v572_v30  ;;  %v622_v8 = vsel %vm518_vm0, %v605_v31, 0.0 }
 0x19b   : > { %v533_v35 = vpop.xlane.xlu0 %532  ;;  %v536_v37 = vpop.xlane.xlu1 %535  ;;  %623 = vadd.xlane.f32.xlu1 %v622_v8 }
 0x19c   : > { %v575_v38 = vmul.f32 0.03125, %v533_v35  ;;  %v576_v39 = vmul.f32 0.03125, %v536_v37  ;;  %v606_v41 = vmul.f32 %v6817_v34, %v6817_v34 }
 0x19e   : > { %v6826_v36 = vsub.f32 %v6749_v45, %v575_v38  ;;  %v6829_v43 = vsub.f32 %v6755_v50, %v576_v39  ;;  %v625_v44 = vsel %vm518_vm0, %v606_v41, 0.0 }
 0x19f   : > { %v542_v46 = vpop.xlane.xlu1 %541  ;;  %v539_v47 = vpop.xlane.xlu0 %538  ;;  %629 = vadd.xlane.f32.xlu1 %v628_v40  ;;  %626 = vadd.xlane.f32.xlu0 %v625_v44 }
 0x1a0   : > { %v578_v48 = vmul.f32 0.03125, %v542_v46  ;;  %v577_v51 = vmul.f32 0.03125, %v539_v47  ;;  %v609_v52 = vmul.f32 %v6826_v36, %v6826_v36  ;;  %v610_v57 = vmul.f32 %v6829_v43, %v6829_v43 }
 0x1a2   : > { %v6836_v54 = vsub.f32 %v6753_v49, %v578_v48  ;;  %v6839_v45 = vsub.f32 %v6761_v55, %v577_v51  ;;  %v634_v50 = vsel %vm518_vm0, %v609_v52, 0.0  ;;  %v637_v5 = vsel %vm518_vm0, %v610_v57, 0.0 }
 0x1a3   : > { %v545_v58 = vpop.xlane.xlu0 %544  ;;  %v548_v59 = vpop.xlane.xlu1 %547  ;;  %635 = vadd.xlane.f32.xlu1 %v634_v50  ;;  %632 = vadd.xlane.f32.xlu0 %v631_v53 }
 0x1a4   : > { %v579_v60 = vmul.f32 0.03125, %v545_v58  ;;  %v580_v63 = vmul.f32 0.03125, %v548_v59  ;;  %v611_v0 = vmul.f32 %v6839_v45, %v6839_v45  ;;  %v612_v49 = vmul.f32 %v6836_v54, %v6836_v54 }
 0x1a6   : > { %v6849_v55 = vsub.f32 %v6763_v56, %v579_v60  ;;  %v6852_v1 = vsub.f32 %v6771_v62, %v580_v63  ;;  %v640_v2 = vsel %vm518_vm0, %v611_v0, 0.0  ;;  %v643_v14 = vsel %vm518_vm0, %v612_v49, 0.0 }
 0x1a7   : > { %v554_v6 = vpop.xlane.xlu1 %553  ;;  %v551_v7 = vpop.xlane.xlu0 %550  ;;  %641 = vadd.xlane.f32.xlu1 %v640_v2  ;;  %638 = vadd.xlane.f32.xlu0 %v637_v5 }
 0x1a8   : > { %v582_v9 = vmul.f32 0.03125, %v554_v6  ;;  %v581_v12 = vmul.f32 0.03125, %v551_v7  ;;  %v613_v13 = vmul.f32 %v6849_v55, %v6849_v55  ;;  %v614_v18 = vmul.f32 %v6852_v1, %v6852_v1 }
 0x1aa   : > { %v6860_v56 = vsub.f32 %v6769_v61, %v582_v9  ;;  %v6863_v62 = vsub.f32 %v6777_v3, %v581_v12  ;;  %v646_v15 = vsel %vm518_vm0, %v613_v13, 0.0  ;;  %v649_v27 = vsel %vm518_vm0, %v614_v18, 0.0 }
 0x1ab   : > { %v557_v19 = vpop.xlane.xlu0 %556  ;;  %647 = vadd.xlane.f32.xlu1 %v646_v15  ;;  %v560_v20 = vpop.xlane.xlu1 %559  ;;  %644 = vadd.xlane.f32.xlu0 %v643_v14  ;;  %v6908_v15 = vld [vmem:[%s8985_s2 + $0x18] ss:$0 sm:$0xff] }
 0x1ac   : > { %v583_v21 = vmul.f32 0.03125, %v557_v19  ;;  %v584_v22 = vmul.f32 0.03125, %v560_v20  ;;  %v615_v23 = vmul.f32 %v6863_v62, %v6863_v62  ;;  %v616_v61 = vmul.f32 %v6860_v56, %v6860_v56 }
 0x1ae   : > { %v6873_v3 = vsub.f32 %v6779_v4, %v583_v21  ;;  %v6876_v24 = vsub.f32 %v6787_v11, %v584_v22  ;;  %v652_v26 = vsel %vm518_vm0, %v615_v23, 0.0  ;;  %v655_v35 = vsel %vm518_vm0, %v616_v61, 0.0  ;;  %v6914_v23 = vld [vmem:[%s8985_s2 + $0x19] ss:$0 sm:$0xff] }
 0x1af   : > { %653 = vadd.xlane.f32.xlu1 %v652_v26  ;;  %v566_v29 = vpop.xlane.xlu1 %565  ;;  %650 = vadd.xlane.f32.xlu0 %v649_v27  ;;  %v563_v30 = vpop.xlane.xlu0 %562 }
 0x1b0   : > { %v586_v31 = vmul.f32 0.03125, %v566_v29  ;;  %v585_v32 = vmul.f32 0.03125, %v563_v30  ;;  %v617_v8 = vmul.f32 %v6873_v3, %v6873_v3  ;;  %v618_v38 = vmul.f32 %v6876_v24, %v6876_v24 }
 0x1b2   : > { %v6884_v4 = vsub.f32 %v6785_v10, %v586_v31  ;;  %v6887_v11 = vsub.f32 %v6793_v16, %v585_v32  ;;  %v658_v37 = vsel %vm518_vm0, %v617_v8, 0.0  ;;  %v661_v10 = vsel %vm518_vm0, %v618_v38, 0.0 }
 0x1b3   : > { %659 = vadd.xlane.f32.xlu1 %v658_v37  ;;  %656 = vadd.xlane.f32.xlu0 %v655_v35  ;;  %v569_v39 = vpop.xlane.xlu0 %568 }
 0x1b4   : > { %v587_v40 = vmul.f32 0.03125, %v569_v39  ;;  %v619_v41 = vmul.f32 %v6887_v11, %v6887_v11  ;;  %v620_v44 = vmul.f32 %v6884_v4, %v6884_v4 }
 0x1b6   : > { %v6895_v42 = vsub.f32 %v6795_v17, %v587_v40  ;;  %v664_v16 = vsel %vm518_vm0, %v619_v41, 0.0  ;;  %v667_v47 = vsel %vm518_vm0, %v620_v44, 0.0 }
 0x1b7   : > { %662 = vadd.xlane.f32.xlu0 %v661_v10  ;;  %665 = vadd.xlane.f32.xlu1 %v664_v16 }
 0x1b8   : > { %v621_v46 = vmul.f32 %v6895_v42, %v6895_v42 }
 0x1ba   : > { %v670_v48 = vsel %vm518_vm0, %v621_v46, 0.0 }
 0x1bb   : > { %668 = vadd.xlane.f32.xlu0 %v667_v47  ;;  %671 = vadd.xlane.f32.xlu1 %v670_v48 }
 0x228   : > { %v624_v17 = vpop.xlane.xlu1 %623 }
 0x229   : > { %v673_v51 = vmul.f32 0.03125, %v624_v17 }
 0x22b   : > { %v690_v52 = vadd.f32 1e-05, %v673_v51 }
 0x22c   : > { %v630_v53 = vpop.xlane.xlu1 %629  ;;  %v627_v50 = vpop.xlane.xlu0 %626 }
 0x22d   : > { %6205 = vrsqrt.f32 %v690_v52  ;;  %v675_v57 = vmul.f32 0.03125, %v630_v53  ;;  %v674_v58 = vmul.f32 0.03125, %v627_v50 }
 0x22f   : > { %v692_v59 = vadd.f32 1e-05, %v675_v57  ;;  %v691_v60 = vadd.f32 1e-05, %v674_v58 }
 0x230   : > { %v636_v63 = vpop.xlane.xlu1 %635  ;;  %v633_v0 = vpop.xlane.xlu0 %632 }
 0x231   : > { %6207 = vrsqrt.f32 %v692_v59  ;;  %v677_v49 = vmul.f32 0.03125, %v636_v63  ;;  %v676_v2 = vmul.f32 0.03125, %v633_v0 }
 0x232   : > { %6209 = vrsqrt.f32 %v691_v60 }
 0x233   : > { %v694_v5 = vadd.f32 1e-05, %v677_v49  ;;  %v693_v6 = vadd.f32 1e-05, %v676_v2 }
 0x234   : > { %v642_v7 = vpop.xlane.xlu1 %641  ;;  %v639_v9 = vpop.xlane.xlu0 %638 }
 0x235   : > { %6211 = vrsqrt.f32 %v694_v5  ;;  %v679_v12 = vmul.f32 0.03125, %v642_v7  ;;  %v678_v13 = vmul.f32 0.03125, %v639_v9 }
 0x236   : > { %6213 = vrsqrt.f32 %v693_v6 }
 0x237   : > { %v6206_v14 = vpop.eup %6205  ;;  %v696_v18 = vadd.f32 1e-05, %v679_v12  ;;  %v695_v19 = vadd.f32 1e-05, %v678_v13 }
 0x238   : > { %v648_v20 = vpop.xlane.xlu1 %647  ;;  %v645_v21 = vpop.xlane.xlu0 %644  ;;  %v724_v22 = vmul.f32 %v6206_v14, %v6807_v28 }
 0x239   : > { %6215 = vrsqrt.f32 %v696_v18  ;;  %v681_v61 = vmul.f32 0.03125, %v648_v20  ;;  %v680_v26 = vmul.f32 0.03125, %v645_v21 }
 0x23a   : > { %6217 = vrsqrt.f32 %v695_v19  ;;  %v745_v27 = vmul.f32 %v6908_v15, %v724_v22 }
 0x23b   : > { %v6208_v29 = vpop.eup %6207  ;;  %v698_v30 = vadd.f32 1e-05, %v681_v61  ;;  %v697_v31 = vadd.f32 1e-05, %v680_v26 }
 0x23c   : > { %v6210_v32 = vpop.eup %6209  ;;  %v726_v8 = vmul.f32 %v6208_v29, %v6804_v25  ;;  %v654_v35 = vpop.xlane.xlu1 %653  ;;  %v6919_v28 = vadd.f32 %v6914_v23, %v745_v27 }
 0x23d   : > { %v651_v37 = vpop.xlane.xlu0 %650  ;;  %6219 = vrsqrt.f32 %v698_v30  ;;  %v683_v38 = vmul.f32 0.03125, %v654_v35  ;;  %v725_v40 = vmul.f32 %v6210_v32, %v6817_v34 }
 0x23e   : > { %9016 = vst [vmem:[#allocation2_spill] sm:$0xff] %v6919_v28  ;;  %v682_v39 = vmul.f32 0.03125, %v651_v37  ;;  %v747_v41 = vmul.f32 %v6908_v15, %v726_v8  ;;  %6221 = vrsqrt.f32 %v697_v31  ;;  %v788_v10 = vsel %vm518_vm0, %v6919_v28, 0.0 }
 0x23f   : > { %v6212_v16 = vpop.eup %6211  ;;  %v700_v44 = vadd.f32 1e-05, %v683_v38  ;;  %789 = vadd.xlane.f32.xlu0 %v788_v10  ;;  %v746_v25 = vmul.f32 %v6908_v15, %v725_v40 }
 0x240   : > { %v699_v46 = vadd.f32 1e-05, %v682_v39  ;;  %v6214_v47 = vpop.eup %6213  ;;  %v6927_v48 = vadd.f32 %v6914_v23, %v747_v41  ;;  %v660_v17 = vpop.xlane.xlu1 %659  ;;  %v728_v34 = vmul.f32 %v6212_v16, %v6826_v36 }
 0x241   : > { %v657_v51 = vpop.xlane.xlu0 %656  ;;  %6223 = vrsqrt.f32 %v700_v44  ;;  %v685_v52 = vmul.f32 0.03125, %v660_v17  ;;  %v6931_v50 = vadd.f32 %v6914_v23, %v746_v25  ;;  %v727_v59 = vmul.f32 %v6214_v47, %v6814_v33 }
 0x242   : > { %9017 = vst [vmem:[#allocation3_spill] sm:$0xff] %v6927_v48  ;;  %v684_v53 = vmul.f32 0.03125, %v657_v51  ;;  %6225 = vrsqrt.f32 %v699_v46  ;;  %v794_v57 = vsel %vm518_vm0, %v6927_v48, 0.0  ;;  %v749_v58 = vmul.f32 %v6908_v15, %v728_v34 }
 0x243   : > { %9018 = vst [vmem:[#allocation4_spill] sm:$0xff] %v6931_v50  ;;  %v6216_v60 = vpop.eup %6215  ;;  %v702_v63 = vadd.f32 1e-05, %v685_v52  ;;  %795 = vadd.xlane.f32.xlu0 %v794_v57  ;;  %v791_v36 = vsel %vm518_vm0, %v6931_v50, 0.0  ;;  %v748_v7 = vmul.f32 %v6908_v15, %v727_v59 }
 0x244   : > { %v701_v0 = vadd.f32 1e-05, %v684_v53  ;;  %v6218_v49 = vpop.eup %6217  ;;  %792 = vadd.xlane.f32.xlu1 %v791_v36  ;;  %v666_v2 = vpop.xlane.xlu1 %665  ;;  %v6940_v6 = vadd.f32 %v6914_v23, %v749_v58  ;;  %v730_v9 = vmul.f32 %v6216_v60, %v6839_v45 }
 0x245   : > { %v663_v5 = vpop.xlane.xlu0 %662  ;;  %6227 = vrsqrt.f32 %v702_v63  ;;  %v687_v33 = vmul.f32 0.03125, %v666_v2  ;;  %v729_v13 = vmul.f32 %v6218_v49, %v6829_v43  ;;  %v6948_v18 = vadd.f32 %v6914_v23, %v748_v7 }
 0x246   : > { %9019 = vst [vmem:[#allocation5_spill] sm:$0xff] %v6940_v6  ;;  %v686_v12 = vmul.f32 0.03125, %v663_v5  ;;  %6229 = vrsqrt.f32 %v701_v0  ;;  %v800_v14 = vsel %vm518_vm0, %v6940_v6, 0.0  ;;  %v751_v19 = vmul.f32 %v6908_v15, %v730_v9 }
 0x247   : > { %9020 = vst [vmem:[#allocation6_spill] sm:$0xff] %v6948_v18  ;;  %v6220_v20 = vpop.eup %6219  ;;  %v704_v21 = vadd.f32 1e-05, %v687_v33  ;;  %801 = vadd.xlane.f32.xlu0 %v800_v14  ;;  %v750_v45 = vmul.f32 %v6908_v15, %v729_v13  ;;  %v797_v26 = vsel %vm518_vm0, %v6948_v18, 0.0 }
 0x248   : > { %v703_v22 = vadd.f32 1e-05, %v686_v12  ;;  %v6222_v61 = vpop.eup %6221  ;;  %v672_v43 = vpop.xlane.xlu1 %671  ;;  %v6955_v29 = vadd.f32 %v6914_v23, %v751_v19  ;;  %v732_v30 = vmul.f32 %v6220_v20, %v6849_v55  ;;  %798 = vadd.xlane.f32.xlu1 %v797_v26 }
 0x249   : > { %v669_v27 = vpop.xlane.xlu0 %668  ;;  %6231 = vrsqrt.f32 %v704_v21  ;;  %v689_v31 = vmul.f32 0.03125, %v672_v43  ;;  %v6959_v8 = vadd.f32 %v6914_v23, %v750_v45  ;;  %v731_v38 = vmul.f32 %v6222_v61, %v6836_v54 }
 0x24a   : > { %9021 = vst [vmem:[#allocation7_spill] sm:$0xff] %v6955_v29  ;;  %v688_v32 = vmul.f32 0.03125, %v669_v27  ;;  %6233 = vrsqrt.f32 %v703_v22  ;;  %v806_v35 = vsel %vm518_vm0, %v6955_v29, 0.0  ;;  %v753_v37 = vmul.f32 %v6908_v15, %v732_v30 }
 0x24b   : > { %9022 = vst [vmem:[#allocation8_spill] sm:$0xff] %v6959_v8  ;;  %v6224_v39 = vpop.eup %6223  ;;  %v706_v40 = vadd.f32 1e-05, %v689_v31  ;;  %807 = vadd.xlane.f32.xlu0 %v806_v35  ;;  %v803_v55 = vsel %vm518_vm0, %v6959_v8, 0.0  ;;  %v752_v44 = vmul.f32 %v6908_v15, %v731_v38 }
 0x24c   : > { %v705_v41 = vadd.f32 1e-05, %v688_v32  ;;  %v6226_v10 = vpop.eup %6225  ;;  %v6968_v16 = vadd.f32 %v6914_v23, %v753_v37  ;;  %v734_v46 = vmul.f32 %v6224_v39, %v6863_v62  ;;  %804 = vadd.xlane.f32.xlu1 %v803_v55 }
 0x24d   : > { %6235 = vrsqrt.f32 %v706_v40  ;;  %v733_v25 = vmul.f32 %v6226_v10, %v6852_v1  ;;  %v6976_v47 = vadd.f32 %v6914_v23, %v752_v44 }
 0x24e   : > { %9023 = vst [vmem:[#allocation9_spill] sm:$0xff] %v6968_v16  ;;  %6237 = vrsqrt.f32 %v705_v41  ;;  %v812_v54 = vsel %vm518_vm0, %v6968_v16, 0.0  ;;  %v755_v17 = vmul.f32 %v6908_v15, %v734_v46 }
 0x24f   : > { %9024 = vst [vmem:[#allocation10_spill] sm:$0xff] %v6976_v47  ;;  %v6228_v51 = vpop.eup %6227  ;;  %813 = vadd.xlane.f32.xlu0 %v812_v54  ;;  %v754_v34 = vmul.f32 %v6908_v15, %v733_v25  ;;  %v809_v62 = vsel %vm518_vm0, %v6976_v47, 0.0 }
 0x250   : > { %v6230_v52 = vpop.eup %6229  ;;  %v6983_v53 = vadd.f32 %v6914_v23, %v755_v17  ;;  %v736_v1 = vmul.f32 %v6228_v51, %v6873_v3  ;;  %810 = vadd.xlane.f32.xlu1 %v809_v62 }
 0x251   : > { %v6987_v57 = vadd.f32 %v6914_v23, %v754_v34  ;;  %v735_v58 = vmul.f32 %v6230_v52, %v6860_v56 }
 0x252   : > { %9025 = vst [vmem:[#allocation11_spill] sm:$0xff] %v6983_v53  ;;  %v818_v59 = vsel %vm518_vm0, %v6983_v53, 0.0  ;;  %v757_v60 = vmul.f32 %v6908_v15, %v736_v1 }
 0x253   : > { %9026 = vst [vmem:[#allocation12_spill] sm:$0xff] %v6987_v57  ;;  %v6232_v63 = vpop.eup %6231  ;;  %819 = vadd.xlane.f32.xlu0 %v818_v59  ;;  %v815_v0 = vsel %vm518_vm0, %v6987_v57, 0.0  ;;  %v756_v36 = vmul.f32 %v6908_v15, %v735_v58 }
 0x254   : > { %v6234_v49 = vpop.eup %6233  ;;  %v6997_v3 = vadd.f32 %v6914_v23, %v757_v60  ;;  %v738_v2 = vmul.f32 %v6232_v63, %v6887_v11  ;;  %816 = vadd.xlane.f32.xlu1 %v815_v0 }
 0x255   : > { %v7001_v56 = vadd.f32 %v6914_v23, %v756_v36  ;;  %v737_v5 = vmul.f32 %v6234_v49, %v6876_v24 }
 0x256   : > { %9027 = vst [vmem:[#allocation13_spill] sm:$0xff] %v6997_v3  ;;  %v824_v7 = vsel %vm518_vm0, %v6997_v3, 0.0  ;;  %v759_v9 = vmul.f32 %v6908_v15, %v738_v2 }
 0x257   : > { %9028 = vst [vmem:[#allocation14_spill] sm:$0xff] %v7001_v56  ;;  %v6236_v33 = vpop.eup %6235  ;;  %825 = vadd.xlane.f32.xlu0 %v824_v7  ;;  %v821_v12 = vsel %vm518_vm0, %v7001_v56, 0.0  ;;  %v758_v13 = vmul.f32 %v6908_v15, %v737_v5 }
 0x258   : > { %v6238_v14 = vpop.eup %6237  ;;  %v7011_v11 = vadd.f32 %v6914_v23, %v759_v9  ;;  %v740_v19 = vmul.f32 %v6236_v33, %v6895_v42  ;;  %822 = vadd.xlane.f32.xlu1 %v821_v12 }
 0x259   : > { %v7015_v24 = vadd.f32 %v6914_v23, %v758_v13  ;;  %v739_v20 = vmul.f32 %v6238_v14, %v6884_v4 }
 0x25a   : > { %9029 = vst [vmem:[#allocation15_spill] sm:$0xff] %v7011_v11  ;;  %v830_v21 = vsel %vm518_vm0, %v7011_v11, 0.0  ;;  %v761_v22 = vmul.f32 %v6908_v15, %v740_v19 }
 0x25b   : > { %9030 = vst [vmem:[#allocation16_spill] sm:$0xff] %v7015_v24  ;;  %831 = vadd.xlane.f32.xlu0 %v830_v21  ;;  %v827_v45 = vsel %vm518_vm0, %v7015_v24, 0.0  ;;  %v760_v61 = vmul.f32 %v6908_v15, %v739_v20 }
 0x25c   : > { %v7025_v26 = vadd.f32 %v6914_v23, %v761_v22  ;;  %828 = vadd.xlane.f32.xlu1 %v827_v45 }
 0x25d   : > { %v7028_v42 = vadd.f32 %v6914_v23, %v760_v61 }
 0x25e   : > { %9031 = vst [vmem:[#allocation17_spill] sm:$0xff] %v7025_v26  ;;  %v836_v4 = vsel %vm518_vm0, %v7025_v26, 0.0 }
 0x25f   : > { %9032 = vst [vmem:[#allocation18_spill] sm:$0xff] %v7028_v42  ;;  %837 = vadd.xlane.f32.xlu0 %v836_v4  ;;  %v833_v43 = vsel %vm518_vm0, %v7028_v42, 0.0 }
 0x260   : > { %834 = vadd.xlane.f32.xlu1 %v833_v43 }
 0x2cc   : > { %v790_v27 = vpop.xlane.xlu0 %789 }
 0x2cd   : > { %v839_v30 = vmul.f32 0.03125, %v790_v27 }
 0x2cf   : > { %v7035_v31 = vsub.f32 %v6919_v28, %v839_v30 }
 0x2d0   : > { %v796_v15 = vpop.xlane.xlu0 %795 }
 0x2d1   : > { %v793_v32 = vpop.xlane.xlu1 %792  ;;  %v841_v35 = vmul.f32 0.03125, %v796_v15  ;;  %v873_v23 = vmul.f32 %v7035_v31, %v7035_v31 }
 0x2d2   : > { %v840_v37 = vmul.f32 0.03125, %v793_v32 }
 0x2d3   : > { %v7040_v38 = vsub.f32 %v6927_v48, %v841_v35  ;;  %v890_v39 = vsel %vm518_vm0, %v873_v23, 0.0 }
 0x2d4   : > { %v7044_v40 = vsub.f32 %v6931_v50, %v840_v37  ;;  %891 = vadd.xlane.f32.xlu1 %v890_v39  ;;  %v802_v41 = vpop.xlane.xlu0 %801 }
 0x2d5   : > { %v843_v55 = vmul.f32 0.03125, %v802_v41  ;;  %v875_v10 = vmul.f32 %v7040_v38, %v7040_v38  ;;  %v799_v44 = vpop.xlane.xlu1 %798 }
 0x2d6   : > { %v874_v46 = vmul.f32 %v7044_v40, %v7044_v40  ;;  %v842_v25 = vmul.f32 0.03125, %v799_v44 }
 0x2d7   : > { %v7051_v54 = vsub.f32 %v6940_v6, %v843_v55  ;;  %v896_v17 = vsel %vm518_vm0, %v875_v10, 0.0 }
 0x2d8   : > { %v893_v51 = vsel %vm518_vm0, %v874_v46, 0.0  ;;  %897 = vadd.xlane.f32.xlu1 %v896_v17  ;;  %v808_v34 = vpop.xlane.xlu0 %807  ;;  %v7056_v52 = vsub.f32 %v6948_v18, %v842_v25 }
 0x2d9   : > { %894 = vadd.xlane.f32.xlu0 %v893_v51  ;;  %v845_v62 = vmul.f32 0.03125, %v808_v34  ;;  %v877_v1 = vmul.f32 %v7051_v54, %v7051_v54  ;;  %v805_v58 = vpop.xlane.xlu1 %804 }
 0x2da   : > { %v844_v59 = vmul.f32 0.03125, %v805_v58  ;;  %v876_v63 = vmul.f32 %v7056_v52, %v7056_v52 }
 0x2db   : > { %v7061_v60 = vsub.f32 %v6955_v29, %v845_v62  ;;  %v902_v0 = vsel %vm518_vm0, %v877_v1, 0.0 }
 0x2dc   : > { %903 = vadd.xlane.f32.xlu1 %v902_v0  ;;  %v814_v36 = vpop.xlane.xlu0 %813  ;;  %v7067_v49 = vsub.f32 %v6959_v8, %v844_v59  ;;  %v899_v2 = vsel %vm518_vm0, %v876_v63, 0.0 }
 0x2dd   : > { %v847_v5 = vmul.f32 0.03125, %v814_v36  ;;  %v879_v7 = vmul.f32 %v7061_v60, %v7061_v60  ;;  %900 = vadd.xlane.f32.xlu0 %v899_v2  ;;  %v811_v9 = vpop.xlane.xlu1 %810 }
 0x2de   : > { %v846_v33 = vmul.f32 0.03125, %v811_v9  ;;  %v878_v13 = vmul.f32 %v7067_v49, %v7067_v49 }
 0x2df   : > { %v7073_v12 = vsub.f32 %v6968_v16, %v847_v5  ;;  %v908_v14 = vsel %vm518_vm0, %v879_v7, 0.0 }
 0x2e0   : > { %909 = vadd.xlane.f32.xlu1 %v908_v14  ;;  %v820_v19 = vpop.xlane.xlu0 %819  ;;  %v7079_v20 = vsub.f32 %v6976_v47, %v846_v33  ;;  %v905_v21 = vsel %vm518_vm0, %v878_v13, 0.0 }
 0x2e1   : > { %v849_v22 = vmul.f32 0.03125, %v820_v19  ;;  %v881_v45 = vmul.f32 %v7073_v12, %v7073_v12  ;;  %906 = vadd.xlane.f32.xlu0 %v905_v21  ;;  %v817_v61 = vpop.xlane.xlu1 %816 }
 0x2e2   : > { %v848_v4 = vmul.f32 0.03125, %v817_v61  ;;  %v880_v27 = vmul.f32 %v7079_v20, %v7079_v20 }
 0x2e3   : > { %v7085_v43 = vsub.f32 %v6983_v53, %v849_v22  ;;  %v914_v30 = vsel %vm518_vm0, %v881_v45, 0.0 }
 0x2e4   : > { %915 = vadd.xlane.f32.xlu1 %v914_v30  ;;  %v826_v15 = vpop.xlane.xlu0 %825  ;;  %v7091_v32 = vsub.f32 %v6987_v57, %v848_v4  ;;  %v911_v35 = vsel %vm518_vm0, %v880_v27, 0.0  ;;  %v6195_v30 = vld [vmem:[%s8987_s4] sm:$0xff]  }
 0x2e5   : > { %v851_v23 = vmul.f32 0.03125, %v826_v15  ;;  %v883_v37 = vmul.f32 %v7085_v43, %v7085_v43  ;;  %912 = vadd.xlane.f32.xlu0 %v911_v35  ;;  %v823_v39 = vpop.xlane.xlu1 %822  ;;  %5688 = vmatprep.subr.bf16.mxu0 %v6195_v30  ;;  %v6196_v15 = vld [vmem:[%s8987_s4 + $0x8] sm:$0xff]  }
 0x2e6   : > { %v850_v41 = vmul.f32 0.03125, %v823_v39  ;;  %v882_v10 = vmul.f32 %v7091_v32, %v7091_v32  ;;  %6060 = vmatprep.subr.bf16.mxu1 %v6195_v30  ;;  %5689 = vmatpush3.bf16.msra.mxu0 %v6195_v30  ;;  %v783_v39 = vlaneseq }
 0x2e7   : > { %v7097_v55 = vsub.f32 %v6997_v3, %v851_v23  ;;  %v920_v44 = vsel %vm518_vm0, %v883_v37, 0.0  ;;  %6062 = vmatpush3.bf16.msra.mxu1 %v6195_v30  ;;  %5690 = vmatprep.subr.bf16.mxu0 %v6196_v15 }
 0x2e8   : > { %921 = vadd.xlane.f32.xlu1 %v920_v44  ;;  %v832_v46 = vpop.xlane.xlu0 %831  ;;  %v7103_v25 = vsub.f32 %v7001_v56, %v850_v41  ;;  %v917_v17 = vsel %vm518_vm0, %v882_v10, 0.0  ;;  %6061 = vmatprep.subr.bf16.mxu1 %v6196_v15 }
 0x2e9   : > { %v853_v51 = vmul.f32 0.03125, %v832_v46  ;;  %v885_v34 = vmul.f32 %v7097_v55, %v7097_v55  ;;  %918 = vadd.xlane.f32.xlu0 %v917_v17  ;;  %v829_v62 = vpop.xlane.xlu1 %828 }
 0x2ea   : > { %v852_v1 = vmul.f32 0.03125, %v829_v62  ;;  %v884_v59 = vmul.f32 %v7103_v25, %v7103_v25  ;;  %5691 = vmatpush3.bf16.msra.mxu0 %v6196_v15 }
 0x2eb   : > { %v7109_v58 = vsub.f32 %v7011_v11, %v853_v51  ;;  %v926_v63 = vsel %vm518_vm0, %v885_v34, 0.0  ;;  %6063 = vmatpush3.bf16.msra.mxu1 %v6196_v15  ;;  %v7143_v51 = vshrl.u32 %v783_v39, 7 }
 0x2ec   : > { %927 = vadd.xlane.f32.xlu1 %v926_v63  ;;  %v838_v0 = vpop.xlane.xlu0 %837  ;;  %v7115_v36 = vsub.f32 %v7015_v24, %v852_v1  ;;  %v923_v2 = vsel %vm518_vm0, %v884_v59, 0.0 }
 0x2ed   : > { %v855_v5 = vmul.f32 0.03125, %v838_v0  ;;  %v887_v7 = vmul.f32 %v7109_v58, %v7109_v58  ;;  %924 = vadd.xlane.f32.xlu0 %v923_v2  ;;  %v835_v9 = vpop.xlane.xlu1 %834  ;;  %9033 = vst [vmem:[#allocation19_spill] sm:$0xff] %v7143_v51  ;;  %v1011_v2 = vsub.s32 0, %v7143_v51 }
 0x2ee   : > { %v854_v33 = vmul.f32 0.03125, %v835_v9  ;;  %v886_v14 = vmul.f32 %v7115_v36, %v7115_v36 }
 0x2ef   : > { %v7121_v13 = vsub.f32 %v7025_v26, %v855_v5  ;;  %v932_v19 = vsel %vm518_vm0, %v887_v7, 0.0  ;;  %v7149_v7 = vld [vmem:[%s8986_s3] sm:$0xff] }
 0x2f0   : > { %933 = vadd.xlane.f32.xlu1 %v932_v19  ;;  %v7127_v21 = vsub.f32 %v7028_v42, %v854_v33  ;;  %v929_v22 = vsel %vm518_vm0, %v886_v14, 0.0 }
 0x2f1   : > { %v889_v45 = vmul.f32 %v7121_v13, %v7121_v13  ;;  %930 = vadd.xlane.f32.xlu0 %v929_v22 }
 0x2f2   : > { %v888_v61 = vmul.f32 %v7127_v21, %v7127_v21 }
 0x2f3   : > { %v938_v4 = vsel %vm518_vm0, %v889_v45, 0.0 }
 0x2f4   : > { %939 = vadd.xlane.f32.xlu1 %v938_v4  ;;  %v935_v27 = vsel %vm518_vm0, %v888_v61, 0.0  ;;  %v7152_v61 = vrot.slane %v7149_v7, %v1011_v2  ;;  %v1032_v4 = vsub.s32 1, %v7143_v51 }
 0x2f5   : > { %936 = vadd.xlane.f32.xlu0 %v935_v27 }
 0x361   : > { %v892_v35 = vpop.xlane.xlu1 %891 }
 0x362   : > { %v941_v23 = vmul.f32 0.03125, %v892_v35 }
 0x364   : > { %v958_v37 = vadd.f32 1e-05, %v941_v23 }
 0x365   : > { %v898_v41 = vpop.xlane.xlu1 %897 }
 0x366   : > { %6239 = vrsqrt.f32 %v958_v37  ;;  %v943_v10 = vmul.f32 0.03125, %v898_v41  ;;  %v895_v44 = vpop.xlane.xlu0 %894 }
 0x367   : > { %v942_v46 = vmul.f32 0.03125, %v895_v44 }
 0x368   : > { %v960_v17 = vadd.f32 1e-05, %v943_v10 }
 0x369   : > { %v959_v34 = vadd.f32 1e-05, %v942_v46  ;;  %v904_v62 = vpop.xlane.xlu1 %903  ;;  %v7157_v46 = vrot.slane %v7149_v7, %v1032_v4 }
 0x36a   : > { %6241 = vrsqrt.f32 %v960_v17  ;;  %v945_v1 = vmul.f32 0.03125, %v904_v62  ;;  %v901_v59 = vpop.xlane.xlu0 %900 }
 0x36b   : > { %6243 = vrsqrt.f32 %v959_v34  ;;  %v944_v0 = vmul.f32 0.03125, %v901_v59 }
 0x36c   : > { %v962_v63 = vadd.f32 1e-05, %v945_v1 }
 0x36d   : > { %v910_v5 = vpop.xlane.xlu1 %909  ;;  %v961_v9 = vadd.f32 1e-05, %v944_v0 }
 0x36e   : > { %6245 = vrsqrt.f32 %v962_v63  ;;  %v947_v33 = vmul.f32 0.03125, %v910_v5  ;;  %v907_v14 = vpop.xlane.xlu0 %906 }
 0x36f   : > { %6247 = vrsqrt.f32 %v961_v9  ;;  %v946_v45 = vmul.f32 0.03125, %v907_v14 }
 0x370   : > { %v6240_v19 = vpop.eup %6239  ;;  %v964_v22 = vadd.f32 1e-05, %v947_v33 }
 0x371   : > { %v916_v27 = vpop.xlane.xlu1 %915  ;;  %v992_v30 = vmul.f32 %v6240_v19, %v7035_v31  ;;  %v963_v15 = vadd.f32 1e-05, %v946_v45 }
 0x372   : > { %6249 = vrsqrt.f32 %v964_v22  ;;  %v949_v35 = vmul.f32 0.03125, %v916_v27  ;;  %v913_v23 = vpop.xlane.xlu0 %912 }
 0x373   : > { %6251 = vrsqrt.f32 %v963_v15  ;;  %v948_v10 = vmul.f32 0.03125, %v913_v23  ;;  %v1013_v62 = vmul.f32 %v7152_v61, %v992_v30 }
 0x374   : > { %v6242_v37 = vpop.eup %6241  ;;  %v966_v41 = vadd.f32 1e-05, %v949_v35 }
 0x375   : > { %v6244_v44 = vpop.eup %6243  ;;  %v994_v17 = vmul.f32 %v6242_v37, %v7040_v38  ;;  %v922_v34 = vpop.xlane.xlu1 %921  ;;  %v965_v1 = vadd.f32 1e-05, %v948_v10  ;;  %v1034_v38 = vadd.f32 %v7157_v46, %v1013_v62 }
 0x376   : > { %6253 = vrsqrt.f32 %v966_v41  ;;  %v951_v31 = vmul.f32 0.03125, %v922_v34  ;;  %v993_v59 = vmul.f32 %v6244_v44, %v7044_v40  ;;  %v919_v63 = vpop.xlane.xlu0 %918 }
 0x377   : > { %6255 = vrsqrt.f32 %v965_v1  ;;  %v950_v5 = vmul.f32 0.03125, %v919_v63  ;;  %v1015_v33 = vmul.f32 %v7152_v61, %v994_v17 }
 0x378   : > { %v6246_v0 = vpop.eup %6245  ;;  %v968_v2 = vadd.f32 1e-05, %v951_v31  ;;  %v1014_v9 = vmul.f32 %v7152_v61, %v993_v59 }
 0x379   : > { %v928_v14 = vpop.xlane.xlu1 %927  ;;  %v996_v19 = vmul.f32 %v6246_v0, %v7051_v54  ;;  %v6248_v22 = vpop.eup %6247  ;;  %v967_v45 = vadd.f32 1e-05, %v950_v5  ;;  %v7173_v62 = vadd.f32 %v7157_v46, %v1015_v33 }
 0x37a   : > { %6257 = vrsqrt.f32 %v968_v2  ;;  %v953_v4 = vmul.f32 0.03125, %v928_v14  ;;  %v1035_v40 = vadd.f32 %v7157_v46, %v1014_v9  ;;  %v995_v27 = vmul.f32 %v6248_v22, %v7056_v52  ;;  %v925_v30 = vpop.xlane.xlu0 %924 }
 0x37b   : > { %v1017_v15 = vmul.f32 %v7152_v61, %v996_v19  ;;  %6259 = vrsqrt.f32 %v967_v45  ;;  %v952_v37 = vmul.f32 0.03125, %v925_v30 }
 0x37c   : > { %v6250_v35 = vpop.eup %6249  ;;  %v970_v23 = vadd.f32 1e-05, %v953_v4  ;;  %v1051_v41 = vpack.c.bf16 %v1035_v40, %v1034_v38  ;;  %v1016_v10 = vmul.f32 %v7152_v61, %v995_v27 }
 0x37d   : > { %v934_v44 = vpop.xlane.xlu1 %933  ;;  %v1038_v54 = vadd.f32 %v7157_v46, %v1017_v15  ;;  %v998_v17 = vmul.f32 %v6250_v35, %v7061_v60  ;;  %v6252_v34 = vpop.eup %6251  ;;  %v969_v52 = vadd.f32 1e-05, %v952_v37 }
 0x37e   : > { %6261 = vrsqrt.f32 %v970_v23  ;;  %v955_v1 = vmul.f32 0.03125, %v934_v44  ;;  %5692 = vmatprep.mubr.msk.bf16.mxu0 %vm518_vm0, %v1051_v41  ;;  %v1037_v31 = vadd.f32 %v7157_v46, %v1016_v10  ;;  %v931_v59 = vpop.xlane.xlu0 %930  ;;  %v997_v63 = vmul.f32 %v6252_v34, %v7067_v49 }
 0x37f   : > { %v1019_v0 = vmul.f32 %v7152_v61, %v998_v17  ;;  %6263 = vrsqrt.f32 %v969_v52  ;;  %v954_v60 = vmul.f32 0.03125, %v931_v59  ;;  %v1053_v9 = vpack.c.bf16 %v7173_v62, %v1038_v54 }
 0x380   : > { %v6254_v2 = vpop.eup %6253  ;;  %v972_v5 = vadd.f32 1e-05, %v955_v1  ;;  %v1052_v14 = vpack.c.bf16 %v1037_v31, %v7173_v62  ;;  %v1018_v38 = vmul.f32 %v7152_v61, %v997_v63 }
 0x381   : > { %v940_v33 = vpop.xlane.xlu1 %939  ;;  %v1000_v19 = vmul.f32 %v6254_v2, %v7073_v12  ;;  %v6256_v22 = vpop.eup %6255  ;;  %v971_v45 = vadd.f32 1e-05, %v954_v60  ;;  %v1040_v40 = vadd.f32 %v7157_v46, %v1019_v0 }
 0x382   : > { %6265 = vrsqrt.f32 %v972_v5  ;;  %v957_v4 = vmul.f32 0.03125, %v940_v33  ;;  %5693 = vmatmul.mubr.msk.bf16.vlgmr.msra.gmra.mrb[16].mxu0 %vm518_vm0, %v1052_v14  ;;  %v937_v49 = vpop.xlane.xlu0 %936  ;;  %v999_v27 = vmul.f32 %v6256_v22, %v7079_v20  ;;  %v1039_v12 = vadd.f32 %v7157_v46, %v1018_v38 }
 0x383   : > { %v1021_v30 = vmul.f32 %v7152_v61, %v1000_v19  ;;  %6267 = vrsqrt.f32 %v971_v45  ;;  %v956_v23 = vmul.f32 0.03125, %v937_v49  ;;  %5696 = vmatprep.mubr.msk.bf16.mxu0 %vm518_vm0, %v1053_v9 }
 0x384   : > { %v6258_v15 = vpop.eup %6257  ;;  %v974_v35 = vadd.f32 1e-05, %v957_v4  ;;  %v1020_v37 = vmul.f32 %v7152_v61, %v999_v27  ;;  %v1054_v1 = vpack.c.bf16 %v1040_v40, %v1039_v12 }
 0x385   : > { %v1042_v41 = vadd.f32 %v7157_v46, %v1021_v30  ;;  %v1002_v10 = vmul.f32 %v6258_v15, %v7085_v43  ;;  %v6260_v44 = vpop.eup %6259  ;;  %v973_v54 = vadd.f32 1e-05, %v956_v23 }
 0x386   : > { %6269 = vrsqrt.f32 %v974_v35  ;;  %v1041_v20 = vadd.f32 %v7157_v46, %v1020_v37  ;;  %v1001_v17 = vmul.f32 %v6260_v44, %v7091_v32 }
 0x387   : > { %v1023_v34 = vmul.f32 %v7152_v61, %v1002_v10  ;;  %6271 = vrsqrt.f32 %v973_v54  ;;  %v1056_v31 = vpack.c.bf16 %v7173_v62, %v1042_v41  ;;  %v1069_v54 = vsub.s32 2, %v7143_v51 }
 0x388   : > { %v6262_v52 = vpop.eup %6261  ;;  %v1055_v59 = vpack.c.bf16 %v1041_v20, %v7173_v62  ;;  %v1022_v63 = vmul.f32 %v7152_v61, %v1001_v17 }
 0x389   : > { %v1044_v43 = vadd.f32 %v7157_v46, %v1023_v34  ;;  %v1004_v0 = vmul.f32 %v6262_v52, %v7097_v55  ;;  %v6264_v2 = vpop.eup %6263 }
 0x38a   : > { %5697 = vmatmul.mubr.msk.bf16.gmra.mrb[20].mxu0 %vm518_vm0, %v1054_v1  ;;  %5700 = vmatprep.mubr.msk.bf16.mxu1 %vm518_vm0, %v1055_v59  ;;  %v1043_v32 = vadd.f32 %v7157_v46, %v1022_v63  ;;  %v1003_v5 = vmul.f32 %v6264_v2, %v7103_v25 }
 0x38b   : > { %v1025_v60 = vmul.f32 %v7152_v61, %v1004_v0  ;;  %5701 = vmatmul.mubr.msk.bf16.vlgmr.msra.gmra.mrb[0].mxu1 %vm518_vm0, %v1056_v31 }
 0x38c   : > { %v6266_v9 = vpop.eup %6265  ;;  %v1057_v33 = vpack.c.bf16 %v1044_v43, %v1043_v32  ;;  %v1024_v14 = vmul.f32 %v7152_v61, %v1003_v5 }
 0x38d   : > { %v6268_v38 = vpop.eup %6267  ;;  %v1006_v55 = vmul.f32 %v6266_v9, %v7109_v58  ;;  %v1046_v22 = vadd.f32 %v7157_v46, %v1025_v60 }
 0x38e   : > { %5704 = vmatprep.mubr.msk.bf16.mxu1 %vm518_vm0, %v1057_v33  ;;  %v1045_v19 = vadd.f32 %v7157_v46, %v1024_v14  ;;  %v1005_v45 = vmul.f32 %v6268_v38, %v7115_v36 }
 0x38f   : > { %v1027_v27 = vmul.f32 %v7152_v61, %v1006_v55  ;;  %v1059_v30 = vpack.c.bf16 %v7173_v62, %v1046_v22 }
 0x390   : > { %v6270_v25 = vpop.eup %6269  ;;  %v1058_v4 = vpack.c.bf16 %v1045_v19, %v7173_v62  ;;  %v1026_v40 = vmul.f32 %v7152_v61, %v1005_v45 }
 0x391   : > { %v6272_v49 = vpop.eup %6271  ;;  %v1048_v35 = vadd.f32 %v7157_v46, %v1027_v27  ;;  %v1008_v23 = vmul.f32 %v6270_v25, %v7121_v13  ;;  %v7233_v13 = vrot.slane %v7149_v7, %v1069_v54 }
 0x392   : > { %v1007_v58 = vmul.f32 %v6272_v49, %v7127_v21  ;;  %v1047_v36 = vadd.f32 %v7157_v46, %v1026_v40 }
 0x393   : > { %5705 = vmatmul.mubr.msk.bf16.gmra.mrb[4].mxu1 %vm518_vm0, %v1058_v4  ;;  %v1029_v41 = vmul.f32 %v7152_v61, %v1008_v23 }
 0x394   : > { %5708 = vmatprep.mubr.msk.bf16.mxu1 %vm518_vm0, %v1059_v30  ;;  %v1028_v15 = vmul.f32 %v7152_v61, %v1007_v58  ;;  %v1060_v37 = vpack.c.bf16 %v1048_v35, %v1047_v36 }
 0x395   : > { %v1050_v21 = vadd.f32 %v7157_v46, %v1029_v41 }
 0x396   : > { %v1049_v12 = vadd.f32 %v7157_v46, %v1028_v15 }
 0x397   : > { %v1062_v44 = vpack.c.bf16 %v7173_v62, %v1050_v21 }
 0x398   : > { %v1061_v10 = vpack.c.bf16 %v1049_v12, %v7173_v62 }
 0x39b   : > { %5709 = vmatmul.mubr.msk.bf16.gmra.mrb[8].mxu1 %vm518_vm0, %v1060_v37 }
 0x39c   : > { %5712 = vmatprep.mubr.msk.bf16.mxu1 %vm518_vm0, %v1061_v10 }
 0x3a3   : > { %5713 = vmatmul.mubr.msk.bf16.gmra.mrb[12].mxu1 %vm518_vm0, %v1062_v44 }
 0x455   : > { %v5694_v20 = vpop.f32.mrb[16].mxu0 }
 0x456   : > { %v1162_v61 = vadd.f32 %v5694_v20, %v7233_v13  ;;  %v1153_v17 = vpop.f32.mrb[17].mxu0 }
 0x457   : > { %v5695_v34 = vpop.f32.mrb[18].mxu0  ;;  %v1154_v31 = vadd.f32 %v1153_v17, %v7233_v13 }
 0x458   : > { %v7236_v52 = vpack.c.bf16 %v1162_v61, %v1162_v61  ;;  %v1156_v1 = vpop.f32.mrb[19].mxu0  ;;  %v1165_v43 = vadd.f32 %v5695_v34, %v7233_v13 }
 0x459   : > { %v1157_v46 = vadd.f32 %v1156_v1, %v7233_v13 }
 0x45a   : > { %1268 = vrot.lane.b32.xlu1 %v7236_v52, %s6619_s24 }
 0x45b   : > { %v7242_v62 = vpack.c.bf16 %v1157_v46, %v1154_v31 }
 0x45d   : > { %1266 = vrot.lane.b32.xlu0 %v7242_v62, %s6619_s24  ;;  %v5698_v7 = vpop.f32.mrb[20].mxu0  ;;  %5720 = vmatprep.mubr.msk.bf16.mxu1 %vm1270_vm1, %v7242_v62 }
 0x45e   : > { %v1169_v59 = vpop.f32.mrb[21].mxu0  ;;  %v5702_v63 = vpop.f32.mrb[0].mxu1  ;;  %v1178_v5 = vadd.f32 %v5698_v7, %v7233_v13 }
 0x45f   : > { %v1170_v0 = vadd.f32 %v1169_v59, %v7233_v13  ;;  %v5699_v2 = vpop.f32.mrb[22].mxu0  ;;  %v1185_v32 = vpop.f32.mrb[1].mxu1  ;;  %v1194_v19 = vadd.f32 %v5702_v63, %v7233_v13 }
 0x460   : > { %v1181_v60 = vadd.f32 %v5699_v2, %v7233_v13  ;;  %v1172_v9 = vpop.f32.mrb[23].mxu0  ;;  %v5703_v33 = vpop.f32.mrb[2].mxu1  ;;  %v1186_v4 = vadd.f32 %v1185_v32, %v7233_v13 }
 0x461   : > { %v7252_v14 = vpack.c.bf16 %v1170_v0, %v1165_v43  ;;  %v1173_v38 = vadd.f32 %v1172_v9, %v7233_v13  ;;  %v1188_v55 = vpop.f32.mrb[3].mxu1  ;;  %v1197_v15 = vadd.f32 %v5703_v33, %v7233_v13 }
 0x462   : > { %v7256_v22 = vpack.c.bf16 %v1181_v60, %v1178_v5  ;;  %v1189_v45 = vadd.f32 %v1188_v55, %v7233_v13  ;;  %v7274_v58 = vpack.c.bf16 %v1186_v4, %v1186_v4 }
 0x463   : > { %1333 = vrot.lane.b32.xlu1 %v7252_v14, %s6619_s24  ;;  %5728 = vmatprep.mubr.msk.bf16.mxu0 %vm1270_vm1, %v7252_v14  ;;  %v7268_v49 = vpack.c.bf16 %v1173_v38, %v1173_v38  ;;  %v7283_v37 = vpack.c.bf16 %v1197_v15, %v1197_v15 }
 0x464   : > { %v7263_v25 = vpack.c.bf16 %v1194_v19, %v1189_v45  ;;  %1399 = vrot.lane.b32.xlu0 %v7256_v22, %s6619_s24 }
 0x466   : > { %v5706_v40 = vpop.f32.mrb[4].mxu1 }
 0x467   : > { %1335 = vrot.lane.b32.xlu1 %v7268_v49, %s6619_s24  ;;  %v1201_v27 = vpop.f32.mrb[5].mxu1  ;;  %v1210_v41 = vadd.f32 %v5706_v40, %v7233_v13 }
 0x468   : > { %1465 = vrot.lane.b32.xlu0 %v7263_v25, %s6619_s24  ;;  %v5707_v30 = vpop.f32.mrb[6].mxu1  ;;  %v1202_v35 = vadd.f32 %v1201_v27, %v7233_v13 }
 0x469   : > { %v1204_v36 = vpop.f32.mrb[7].mxu1  ;;  %v1213_v44 = vadd.f32 %v5707_v30, %v7233_v13  ;;  %v7292_v61 = vpack.c.bf16 %v1210_v41, %v1210_v41 }
 0x46a   : > { %v1205_v23 = vadd.f32 %v1204_v36, %v7233_v13 }
 0x46b   : > { %1401 = vrot.lane.b32.xlu1 %v7274_v58, %s6619_s24 }
 0x46c   : > { %v7281_v12 = vpack.c.bf16 %v1205_v23, %v1202_v35 }
 0x46e   : > { %1531 = vrot.lane.b32.xlu0 %v7281_v12, %s6619_s24  ;;  %v5710_v10 = vpop.f32.mrb[8].mxu1 }
 0x46f   : > { %1467 = vrot.lane.b32.xlu1 %v7283_v37, %s6619_s24  ;;  %v1217_v21 = vpop.f32.mrb[9].mxu1  ;;  %v1226_v17 = vadd.f32 %v5710_v10, %v7233_v13 }
 0x470   : > { %v1218_v54 = vadd.f32 %v1217_v21, %v7233_v13  ;;  %v5711_v20 = vpop.f32.mrb[10].mxu1 }
 0x471   : > { %v1229_v34 = vadd.f32 %v5711_v20, %v7233_v13  ;;  %v1220_v1 = vpop.f32.mrb[11].mxu1 }
 0x472   : > { %v7296_v31 = vpack.c.bf16 %v1218_v54, %v1213_v44  ;;  %v1221_v46 = vadd.f32 %v1220_v1, %v7233_v13 }
 0x473   : > { %v7299_v7 = vpack.c.bf16 %v1229_v34, %v1226_v17  ;;  %1533 = vrot.lane.b32.xlu1 %v7292_v61, %s6619_s24 }
 0x474   : > { %v7303_v59 = vpack.c.bf16 %v1221_v46, %v1221_v46  ;;  %1597 = vrot.lane.b32.xlu0 %v7296_v31, %s6619_s24 }
 0x476   : > { %v5714_v63 = vpop.f32.mrb[12].mxu1 }
 0x477   : > { %1599 = vrot.lane.b32.xlu1 %v7303_v59, %s6619_s24  ;;  %v1233_v43 = vpop.f32.mrb[13].mxu1  ;;  %v1242_v5 = vadd.f32 %v5714_v63, %v7233_v13 }
 0x478   : > { %v1234_v0 = vadd.f32 %v1233_v43, %v7233_v13  ;;  %1663 = vrot.lane.b32.xlu0 %v7299_v7, %s6619_s24  ;;  %v5715_v2 = vpop.f32.mrb[14].mxu1 }
 0x479   : > { %v1236_v32 = vpop.f32.mrb[15].mxu1  ;;  %v1245_v9 = vadd.f32 %v5715_v2, %v7233_v13 }
 0x47a   : > { %v7313_v60 = vpack.c.bf16 %v1234_v0, %v1234_v0  ;;  %v1237_v33 = vadd.f32 %v1236_v32, %v7233_v13 }
 0x47b   : > { %v7321_v55 = vpack.c.bf16 %v1245_v9, %v1245_v9 }
 0x47c   : > { %v7317_v38 = vpack.c.bf16 %v1242_v5, %v1237_v33  ;;  %1665 = vrot.lane.b32.xlu1 %v7313_v60, %s6619_s24 }
 0x47e   : > { %1729 = vrot.lane.b32.xlu0 %v7317_v38, %s6619_s24 }
 0x480   : > { %1731 = vrot.lane.b32.xlu1 %v7321_v55, %s6619_s24 }
 0x482   : > { %2076 = vrot.lane.b32.xlu0 %v7236_v52, %s6620_s25 }
 0x484   : > { %2074 = vrot.lane.b32.xlu1 %v7242_v62, %s6620_s25 }
 0x486   : > { %2199 = vrot.lane.b32.xlu0 %v7256_v22, %s6620_s25 }
 0x488   : > { %2137 = vrot.lane.b32.xlu1 %v7252_v14, %s6620_s25 }
 0x48a   : > { %2139 = vrot.lane.b32.xlu0 %v7268_v49, %s6620_s25 }
 0x48c   : > { %2261 = vrot.lane.b32.xlu1 %v7263_v25, %s6620_s25 }
 0x48e   : > { %2201 = vrot.lane.b32.xlu0 %v7274_v58, %s6620_s25 }
 0x490   : > { %2323 = vrot.lane.b32.xlu1 %v7281_v12, %s6620_s25 }
 0x492   : > { %2325 = vrot.lane.b32.xlu0 %v7292_v61, %s6620_s25 }
 0x494   : > { %2263 = vrot.lane.b32.xlu1 %v7283_v37, %s6620_s25 }
 0x498   : > { %2385 = vrot.lane.b32.xlu1 %v7296_v31, %s6620_s25 }
 0x49c   : > { %2447 = vrot.lane.b32.xlu1 %v7299_v7, %s6620_s25 }
 0x4a0   : > { %2387 = vrot.lane.b32.xlu1 %v7303_v59, %s6620_s25 }
 0x4a4   : > { %2449 = vrot.lane.b32.xlu1 %v7313_v60, %s6620_s25 }
 0x4a8   : > { %2511 = vrot.lane.b32.xlu1 %v7321_v55, %s6620_s25 }
 0x4ac   : > { %2509 = vrot.lane.b32.xlu1 %v7317_v38, %s6620_s25 }
 0x4cc   : > { %v1269_v45 = vpop.permute.xlu1 %1268 }
 0x4cd   : > { %v1281_v27 = vsel %vm1270_vm1, %v1269_v45, 0 }
 0x4cf   : > { %v1267_v13 = vpop.permute.xlu0 %1266 }
 0x4d0   : > { %6064 = vmatprep.subr.msk.bf16.mxu1 %vm1270_vm1, %v1267_v13  ;;  %v1278_v19 = vsel %vm1270_vm1, %v1267_v13, 0 }
 0x4d1   : > { %5717 = vmatpush3.bf16.xpose.msra.mxu1 %v1278_v19 }
 0x4d2   : > { %6065 = vmatprep.subr.msk.bf16.mxu1 %vm1270_vm1, %v1269_v45 }
 0x4d5   : > { %v1334_v4 = vpop.permute.xlu1 %1333 }
 0x4d6   : > { %6066 = vmatprep.subr.msk.bf16.mxu0 %vm1270_vm1, %v1334_v4  ;;  %v1344_v40 = vsel %vm1270_vm1, %v1334_v4, 0  ;;  %v1400_v30 = vpop.permute.xlu0 %1399 }
 0x4d7   : > { %5725 = vmatpush3.bf16.xpose.msra.mxu0 %v1344_v40  ;;  %v1410_v23 = vsel %vm1270_vm1, %v1400_v30, 0 }
 0x4d9   : > { %v1336_v15 = vpop.permute.xlu1 %1335  ;;  %5719 = vmatpush3.bf16.xpose.msra.mxu1 %v1281_v27 }
 0x4da   : > { %6067 = vmatprep.subr.msk.bf16.mxu0 %vm1270_vm1, %v1336_v15  ;;  %6068 = vmatprep.subr.msk.bf16.mxu1 %vm1270_vm1, %v1400_v30  ;;  %v1347_v36 = vsel %vm1270_vm1, %v1336_v15, 0  ;;  %v1466_v35 = vpop.permute.xlu0 %1465 }
 0x4db   : > { %v1476_v10 = vsel %vm1270_vm1, %v1466_v35, 0 }
 0x4dd   : > { %v1402_v41 = vpop.permute.xlu1 %1401 }
 0x4de   : > { %v1413_v44 = vsel %vm1270_vm1, %v1402_v41, 0 }
 0x4df   : > { %5727 = vmatpush3.bf16.xpose.msra.mxu0 %v1347_v36 }
 0x4e0   : > { %5721 = vmatmul.mubr.msk.bf16.vlgmr.msra.gmra.mrb[16].mxu1 %vm1270_vm1, %v7236_v52  ;;  %6070 = vmatprep.subr.msk.bf16.mxu0 %vm1270_vm1, %v1466_v35  ;;  %v1532_v54 = vpop.permute.xlu0 %1531 }
 0x4e1   : > { %5733 = vmatpush3.bf16.xpose.msra.mxu1 %v1410_v23  ;;  %5736 = vmatprep.mubr.msk.bf16.mxu1 %vm1270_vm1, %v7256_v22  ;;  %v1468_v21 = vpop.permute.xlu1 %1467  ;;  %v1542_v34 = vsel %vm1270_vm1, %v1532_v54, 0 }
 0x4e2   : > { %6069 = vmatprep.subr.msk.bf16.mxu1 %vm1270_vm1, %v1402_v41  ;;  %v1479_v20 = vsel %vm1270_vm1, %v1468_v21, 0  ;;  %v784_v41 = vand.u32 127, %v783_v39 }
 0x4e4   : > { %vm785_vm3 = vcmp.lt.s32.totalorder %v784_v41, 17 }
 0x4e5   : > { %v1534_v1 = vpop.permute.xlu1 %1533 }
 0x4e6   : > { %5729 = vmatmul.mubr.msk.bf16.vlgmr.msra.gmra.mrb[24].mxu0 %vm1270_vm1, %v7268_v49  ;;  %v1598_v17 = vpop.permute.xlu0 %1597  ;;  %v1545_v43 = vsel %vm1270_vm1, %v1534_v1, 0 }
 0x4e7   : > { %5741 = vmatpush3.bf16.xpose.msra.mxu0 %v1476_v10  ;;  %5744 = vmatprep.mubr.msk.bf16.mxu0 %vm1270_vm1, %v7263_v25  ;;  %v1608_v46 = vsel %vm1270_vm1, %v1598_v17, 0  ;;  %v6621_v10 = vmov -1e+30  }
 0x4e8   : > { %6071 = vmatprep.subr.msk.bf16.mxu0 %vm1270_vm1, %v1468_v21  ;;  %v7414_v21 = vsel %vm785_vm3, 0.0, %v6621_v10 }
 0x4e9   : > { %5735 = vmatpush3.bf16.xpose.msra.mxu1 %v1413_v44  ;;  %v1600_v63 = vpop.permute.xlu1 %1599  ;;  %9034 = vst [vmem:[#allocation20_spill] sm:$0xff] %v7414_v21 }
 0x4ea   : > { %6072 = vmatprep.subr.msk.bf16.mxu1 %vm1270_vm1, %v1532_v54  ;;  %v1664_v0 = vpop.permute.xlu0 %1663  ;;  %v1611_v32 = vsel %vm1270_vm1, %v1600_v63, 0 }
 0x4eb   : > { %v1674_v9 = vsel %vm1270_vm1, %v1664_v0, 0 }
 0x4ee   : > { %v1666_v2 = vpop.permute.xlu1 %1665 }
 0x4ef   : > { %5743 = vmatpush3.bf16.xpose.msra.mxu0 %v1479_v20  ;;  %v1677_v19 = vsel %vm1270_vm1, %v1666_v2, 0 }
 0x4f0   : > { %5737 = vmatmul.mubr.msk.bf16.vlgmr.msra.gmra.mrb[20].mxu1 %vm1270_vm1, %v7274_v58  ;;  %6074 = vmatprep.subr.msk.bf16.mxu0 %vm1270_vm1, %v1598_v17  ;;  %v1730_v5 = vpop.permute.xlu0 %1729 }
 0x4f1   : > { %5749 = vmatpush3.bf16.xpose.msra.mxu1 %v1542_v34  ;;  %5752 = vmatprep.mubr.msk.bf16.mxu1 %vm1270_vm1, %v7281_v12  ;;  %v1740_v13 = vsel %vm1270_vm1, %v1730_v5, 0 }
 0x4f2   : > { %6073 = vmatprep.subr.msk.bf16.mxu1 %vm1270_vm1, %v1534_v1  ;;  %v1732_v33 = vpop.permute.xlu1 %1731 }
 0x4f3   : > { %v1743_v40 = vsel %vm1270_vm1, %v1732_v33, 0 }
 0x4f4   : > { %v2077_v4 = vpop.permute.xlu0 %2076 }
 0x4f5   : > { %v2087_v15 = vsel %vm2085_vm2, %v2077_v4, 0 }
 0x4f6   : > { %5745 = vmatmul.mubr.msk.bf16.vlgmr.msra.gmra.mrb[28].mxu0 %vm1270_vm1, %v7283_v37  ;;  %v2075_v45 = vpop.permute.xlu1 %2074 }
 0x4f7   : > { %5757 = vmatpush3.bf16.xpose.msra.mxu0 %v1608_v46  ;;  %5760 = vmatprep.mubr.msk.bf16.mxu0 %vm1270_vm1, %v7296_v31 }
 0x4f8   : > { %6075 = vmatprep.subr.msk.bf16.mxu0 %vm1270_vm1, %v1600_v63  ;;  %v7401_v30 = vpop.permute.xlu0 %2199 }
 0x4f9   : > { %5751 = vmatpush3.bf16.xpose.msra.mxu1 %v1545_v43 }
 0x4fa   : > { %6076 = vmatprep.subr.msk.bf16.mxu1 %vm1270_vm1, %v1664_v0  ;;  %v2138_v27 = vpop.permute.xlu1 %2137 }
 0x4fc   : > { %v2140_v36 = vpop.permute.xlu0 %2139 }
 0x4fd   : > { %v2149_v35 = vsel %vm2085_vm2, %v2140_v36, 0 }
 0x4fe   : > { %v7410_v23 = vpop.permute.xlu1 %2261 }
 0x4ff   : > { %5759 = vmatpush3.bf16.xpose.msra.mxu0 %v1611_v32 }
 0x500   : > { %5753 = vmatmul.mubr.msk.bf16.vlgmr.msra.gmra.mrb[24].mxu1 %vm1270_vm1, %v7292_v61  ;;  %6078 = vmatprep.subr.msk.bf16.mxu0 %vm1270_vm1, %v1730_v5 }
 0x501   : > { %5765 = vmatpush3.bf16.xpose.msra.mxu1 %v1674_v9  ;;  %5768 = vmatprep.mubr.msk.bf16.mxu1 %vm1270_vm1, %v7299_v7 }
 0x502   : > { %6077 = vmatprep.subr.msk.bf16.mxu1 %vm1270_vm1, %v1666_v2 }
 0x506   : > { %5761 = vmatmul.mubr.msk.bf16.vlgmr.msra.gmra.mrb[32].mxu0 %vm1270_vm1, %v7303_v59 }
 0x507   : > { %5773 = vmatpush3.bf16.xpose.msra.mxu0 %v1740_v13  ;;  %5776 = vmatprep.mubr.msk.bf16.mxu0 %vm1270_vm1, %v7317_v38 }
 0x508   : > { %6079 = vmatprep.subr.msk.bf16.mxu0 %vm1270_vm1, %v1732_v33 }
 0x509   : > { %5767 = vmatpush3.bf16.xpose.msra.mxu1 %v1677_v19 }
 0x50a   : > { %5780 = vmatprep.subr.bf16.mxu1 %v2075_v45 }
 0x50f   : > { %5775 = vmatpush3.bf16.xpose.msra.mxu0 %v1743_v40 }
 0x510   : > { %5769 = vmatmul.mubr.msk.bf16.vlgmr.msra.gmra.mrb[28].mxu1 %vm1270_vm1, %v7313_v60  ;;  %5788 = vmatprep.subr.bf16.mxu0 %v2138_v27 }
 0x511   : > { %5781 = vmatpush3.bf16.msra.mxu1 %v2075_v45 }
 0x512   : > { %6080 = vmatprep.subr.msk.bf16.mxu1 %vm2085_vm2, %v2077_v4 }
 0x515   : > { %5783 = vmatpush3.bf16.msra.mxu1 %v2087_v15 }
 0x516   : > { %5777 = vmatmul.mubr.msk.bf16.vlgmr.msra.gmra.mrb[36].mxu0 %vm1270_vm1, %v7321_v55  ;;  %5796 = vmatprep.subr.bf16.mxu1 %v7401_v30 }
 0x517   : > { %5789 = vmatpush3.bf16.msra.mxu0 %v2138_v27 }
 0x518   : > { %6081 = vmatprep.subr.msk.bf16.mxu0 %vm2085_vm2, %v2140_v36 }
 0x51b   : > { %5791 = vmatpush3.bf16.msra.mxu0 %v2149_v35 }
 0x51c   : > { %5804 = vmatprep.subr.bf16.mxu0 %v7410_v23 }
 0x5b3   : > { %v5722_v44 = vpop.f32.mrb[16].mxu1 }
 0x5b4   : > { %v7417_v54 = vadd.f32 %v5722_v44, %v7414_v21  ;;  %v1317_v20 = vpop.f32.mrb[17].mxu1 }
 0x5b5   : > { %v5723_v17 = vpop.f32.mrb[18].mxu1  ;;  %v7420_v34 = vadd.f32 %v1317_v20, %v7414_v21 }
 0x5b6   : > { %v1320_v1 = vpop.f32.mrb[19].mxu1  ;;  %v1800_v46 = vsel %vm1793_vm4, %v7417_v54, -inf }
 0x5b7   : > { %v7425_v39 = vadd.f32 %v1320_v1, %v7414_v21  ;;  %1801 = vmax.xlane.f32.xlu0 %v1800_v46  ;;  %v1794_v32 = vsel %vm1793_vm4, %v7420_v34, -inf }
 0x5b9   : > { %v5730_v63 = vpop.f32.mrb[24].mxu0  ;;  %v1797_v43 = vsel %vm1793_vm4, %v7425_v39, -inf }
 0x5ba   : > { %v7430_v0 = vadd.f32 %v5730_v63, %v7414_v21  ;;  %v1383_v2 = vpop.f32.mrb[25].mxu0  ;;  %1798 = vmax.xlane.f32.xlu1 %v1797_v43 }
 0x5bb   : > { %v7435_v5 = vadd.f32 %v1383_v2, %v7414_v21  ;;  %v5731_v9 = vpop.f32.mrb[26].mxu0  ;;  %1795 = vmax.xlane.f32.xlu0 %v1794_v32 }
 0x5bc   : > { %v1386_v33 = vpop.f32.mrb[27].mxu0  ;;  %v1809_v13 = vsel %vm1793_vm4, %v7430_v0, -inf }
 0x5bd   : > { %v1803_v19 = vsel %vm1793_vm4, %v7435_v5, -inf  ;;  %v7442_v45 = vadd.f32 %v1386_v33, %v7414_v21 }
 0x5be   : > { %1810 = vmax.xlane.f32.xlu1 %v1809_v13 }
 0x5bf   : > { %1804 = vmax.xlane.f32.xlu0 %v1803_v19  ;;  %v1806_v4 = vsel %vm1793_vm4, %v7442_v45, -inf }
 0x5c3   : > { %1807 = vmax.xlane.f32.xlu0 %v1806_v4  ;;  %v5738_v40 = vpop.f32.mrb[20].mxu1 }
 0x5c4   : > { %v7447_v27 = vadd.f32 %v5738_v40, %v7414_v21  ;;  %v1449_v15 = vpop.f32.mrb[21].mxu1 }
 0x5c5   : > { %v7450_v36 = vadd.f32 %v1449_v15, %v7414_v21  ;;  %v5739_v35 = vpop.f32.mrb[22].mxu1 }
 0x5c6   : > { %v1452_v41 = vpop.f32.mrb[23].mxu1  ;;  %v1818_v10 = vsel %vm1793_vm4, %v7447_v27, -inf }
 0x5c7   : > { %v7455_v44 = vadd.f32 %v1452_v41, %v7414_v21  ;;  %1819 = vmax.xlane.f32.xlu0 %v1818_v10  ;;  %v1812_v20 = vsel %vm1793_vm4, %v7450_v36, -inf }
 0x5c8   : > { %1813 = vmax.xlane.f32.xlu1 %v1812_v20 }
 0x5c9   : > { %v5746_v17 = vpop.f32.mrb[28].mxu0  ;;  %v1815_v1 = vsel %vm1793_vm4, %v7455_v44, -inf }
 0x5ca   : > { %v7462_v46 = vadd.f32 %v5746_v17, %v7414_v21  ;;  %v1515_v63 = vpop.f32.mrb[29].mxu0 }
 0x5cb   : > { %1816 = vmax.xlane.f32.xlu0 %v1815_v1  ;;  %v5747_v43 = vpop.f32.mrb[30].mxu0  ;;  %v7465_v2 = vadd.f32 %v1515_v63, %v7414_v21 }
 0x5cc   : > { %v1518_v32 = vpop.f32.mrb[31].mxu0  ;;  %v1827_v9 = vsel %vm1793_vm4, %v7462_v46, -inf }
 0x5cd   : > { %v7470_v33 = vadd.f32 %v1518_v32, %v7414_v21  ;;  %1828 = vmax.xlane.f32.xlu1 %v1827_v9  ;;  %v1821_v19 = vsel %vm1793_vm4, %v7465_v2, -inf }
 0x5cf   : > { %v1824_v13 = vsel %vm1793_vm4, %v7470_v33, -inf }
 0x5d0   : > { %1825 = vmax.xlane.f32.xlu0 %v1824_v13 }
 0x5d1   : > { %1822 = vmax.xlane.f32.xlu1 %v1821_v19 }
 0x5d3   : > { %v5754_v4 = vpop.f32.mrb[24].mxu1 }
 0x5d4   : > { %v7477_v40 = vadd.f32 %v5754_v4, %v7414_v21  ;;  %v1581_v15 = vpop.f32.mrb[25].mxu1 }
 0x5d5   : > { %v7480_v35 = vadd.f32 %v1581_v15, %v7414_v21  ;;  %v5755_v41 = vpop.f32.mrb[26].mxu1 }
 0x5d6   : > { %v1584_v10 = vpop.f32.mrb[27].mxu1  ;;  %v1836_v20 = vsel %vm1793_vm4, %v7477_v40, -inf }
 0x5d7   : > { %v7485_v17 = vadd.f32 %v1584_v10, %v7414_v21  ;;  %1837 = vmax.xlane.f32.xlu0 %v1836_v20  ;;  %v1830_v1 = vsel %vm1793_vm4, %v7480_v35, -inf }
 0x5d8   : > { %1831 = vmax.xlane.f32.xlu1 %v1830_v1 }
 0x5d9   : > { %v5762_v63 = vpop.f32.mrb[32].mxu0  ;;  %v1833_v43 = vsel %vm1793_vm4, %v7485_v17, -inf }
 0x5da   : > { %v7492_v32 = vadd.f32 %v5762_v63, %v7414_v21  ;;  %v1647_v9 = vpop.f32.mrb[33].mxu0 }
 0x5db   : > { %1834 = vmax.xlane.f32.xlu0 %v1833_v43  ;;  %v5763_v13 = vpop.f32.mrb[34].mxu0  ;;  %v7495_v19 = vadd.f32 %v1647_v9, %v7414_v21 }
 0x5dc   : > { %v1650_v4 = vpop.f32.mrb[35].mxu0  ;;  %v1845_v15 = vsel %vm1793_vm4, %v7492_v32, -inf }
 0x5dd   : > { %v7500_v41 = vadd.f32 %v1650_v4, %v7414_v21  ;;  %1846 = vmax.xlane.f32.xlu1 %v1845_v15  ;;  %v1839_v20 = vsel %vm1793_vm4, %v7495_v19, -inf }
 0x5df   : > { %v1842_v10 = vsel %vm1793_vm4, %v7500_v41, -inf }
 0x5e0   : > { %1843 = vmax.xlane.f32.xlu0 %v1842_v10 }
 0x5e1   : > { %1840 = vmax.xlane.f32.xlu1 %v1839_v20 }
 0x5e3   : > { %v5770_v1 = vpop.f32.mrb[28].mxu1 }
 0x5e4   : > { %v7507_v63 = vadd.f32 %v5770_v1, %v7414_v21  ;;  %v1713_v43 = vpop.f32.mrb[29].mxu1 }
 0x5e5   : > { %v5771_v9 = vpop.f32.mrb[30].mxu1  ;;  %v7510_v13 = vadd.f32 %v1713_v43, %v7414_v21 }
 0x5e6   : > { %v1716_v4 = vpop.f32.mrb[31].mxu1  ;;  %v1854_v15 = vsel %vm1793_vm4, %v7507_v63, -inf }
 0x5e7   : > { %v7515_v42 = vadd.f32 %v1716_v4, %v7414_v21  ;;  %1855 = vmax.xlane.f32.xlu0 %v1854_v15  ;;  %v1848_v43 = vsel %vm1793_vm4, %v7510_v13, -inf }
 0x5e9   : > { %v5778_v10 = vpop.f32.mrb[36].mxu0  ;;  %v1851_v20 = vsel %vm1793_vm4, %v7515_v42, -inf }
 0x5ea   : > { %v7520_v1 = vadd.f32 %v5778_v10, %v7414_v21  ;;  %1852 = vmax.xlane.f32.xlu1 %v1851_v20  ;;  %v1779_v9 = vpop.f32.mrb[37].mxu0 }
 0x5eb   : > { %1849 = vmax.xlane.f32.xlu0 %v1848_v43  ;;  %v5779_v26 = vpop.f32.mrb[38].mxu0  ;;  %v7527_v15 = vadd.f32 %v1779_v9, %v7414_v21 }
 0x5ec   : > { %v1782_v11 = vpop.f32.mrb[39].mxu0  ;;  %v1863_v4 = vsel %vm1793_vm4, %v7520_v1, -inf  ;;  %v7538_v26 = vpop.permute.xlu1 %2323 }
 0x5ed   : > { %v7530_v24 = vadd.f32 %v1782_v11, %v7414_v21  ;;  %v1857_v20 = vsel %vm1793_vm4, %v7527_v15, -inf }
 0x5ee   : > { %1864 = vmax.xlane.f32.xlu1 %v1863_v4 }
 0x5ef   : > { %v1860_v10 = vsel %vm1793_vm4, %v7530_v24, -inf }
 0x5f0   : > { %1861 = vmax.xlane.f32.xlu0 %v1860_v10  ;;  %v7540_v9 = vpop.permute.xlu1 %2263  ;;  %v7550_v10 = vpop.permute.xlu0 %2201 }
 0x5f2   : > { %1858 = vmax.xlane.f32.xlu1 %v1857_v20 }
 0x5f4   : > { %v7542_v43 = vpop.permute.xlu1 %2385  ;;  %v7554_v20 = vpop.permute.xlu0 %2325 }
 0x5f8   : > { %v7544_v11 = vpop.permute.xlu1 %2447 }
 0x5fc   : > { %v7546_v4 = vpop.permute.xlu1 %2387 }
 0x600   : > { %v7548_v3 = vpop.permute.xlu1 %2449 }
 0x601   : > { %9035 = vst [vmem:[#allocation21_spill] sm:$0xff] %v7548_v3 }
 0x604   : > { %v7552_v56 = vpop.permute.xlu1 %2511 }
 0x605   : > { %9036 = vst [vmem:[#allocation22_spill] sm:$0xff] %v7552_v56 }
 0x606   : > { %2575 = vrot.lane.b32.xlu0 %v7242_v62, %s6622_s26 }
 0x608   : > { %v7556_v53 = vpop.permute.xlu1 %2509 }
 0x644   : > { %v1802_v57 = vpop.xlane.xlu0 %1801 }
 0x645   : > { %v1868_v16 = vsub.f32 %v7417_v54, %v1802_v57 }
 0x647   : > { %v1894_v47 = vmul.f32 1.442695, %v1868_v16  ;;  %v1799_v29 = vpop.xlane.xlu1 %1798 }
 0x648   : > { %v1867_v8 = vsub.f32 %v7425_v39, %v1799_v29  ;;  %v1796_v6 = vpop.xlane.xlu0 %1795 }
 0x649   : > { %6273 = vpow2.f32 %v1894_v47  ;;  %v1866_v18 = vsub.f32 %v7420_v34, %v1796_v6 }
 0x64a   : > { %v1892_v50 = vmul.f32 1.442695, %v1867_v8 }
 0x64b   : > { %v1890_v48 = vmul.f32 1.442695, %v1866_v18  ;;  %v1811_v28 = vpop.xlane.xlu1 %1810 }
 0x64c   : > { %6275 = vpow2.f32 %v1892_v50  ;;  %v1871_v51 = vsub.f32 %v7430_v0, %v1811_v28  ;;  %v1805_v21 = vpop.xlane.xlu0 %1804 }
 0x64d   : > { %6277 = vpow2.f32 %v1890_v48  ;;  %v1869_v56 = vsub.f32 %v7435_v5, %v1805_v21 }
 0x64e   : > { %v1900_v3 = vmul.f32 1.442695, %v1871_v51 }
 0x64f   : > { %v1896_v57 = vmul.f32 1.442695, %v1869_v56 }
 0x650   : > { %6279 = vpow2.f32 %v1900_v3  ;;  %v1808_v16 = vpop.xlane.xlu0 %1807 }
 0x651   : > { %v1870_v29 = vsub.f32 %v7442_v45, %v1808_v16  ;;  %6281 = vpow2.f32 %v1896_v57 }
 0x653   : > { %v7564_v47 = vpop.eup %6273  ;;  %v1898_v6 = vmul.f32 1.442695, %v1870_v29 }
 0x654   : > { %v1820_v8 = vpop.xlane.xlu0 %1819  ;;  %v1944_v50 = vsel %vm1793_vm4, %v7564_v47, 0.0 }
 0x655   : > { %6283 = vpow2.f32 %v1898_v6  ;;  %v1874_v28 = vsub.f32 %v7447_v27, %v1820_v8  ;;  %v1814_v48 = vpop.xlane.xlu1 %1813  ;;  %1945 = vadd.xlane.f32.xlu0 %v1944_v50 }
 0x656   : > { %v7569_v18 = vpop.eup %6275  ;;  %v1872_v3 = vsub.f32 %v7450_v36, %v1814_v48 }
 0x657   : > { %v7572_v56 = vpop.eup %6277  ;;  %v1906_v51 = vmul.f32 1.442695, %v1874_v28  ;;  %v1941_v21 = vsel %vm1793_vm4, %v7569_v18, 0.0 }
 0x658   : > { %v1902_v54 = vmul.f32 1.442695, %v1872_v3  ;;  %1942 = vadd.xlane.f32.xlu1 %v1941_v21  ;;  %v1817_v34 = vpop.xlane.xlu0 %1816  ;;  %v1938_v39 = vsel %vm1793_vm4, %v7572_v56, 0.0 }
 0x659   : > { %6285 = vpow2.f32 %v1906_v51  ;;  %v1873_v0 = vsub.f32 %v7455_v44, %v1817_v34  ;;  %1939 = vadd.xlane.f32.xlu0 %v1938_v39 }
 0x65a   : > { %v7579_v5 = vpop.eup %6279  ;;  %6287 = vpow2.f32 %v1902_v54  ;;  %v1829_v45 = vpop.xlane.xlu1 %1828 }
 0x65b   : > { %v1904_v27 = vmul.f32 1.442695, %v1873_v0  ;;  %v1877_v36 = vsub.f32 %v7462_v46, %v1829_v45  ;;  %v1953_v57 = vsel %vm1793_vm4, %v7579_v5, 0.0  ;;  %v7584_v16 = vpop.eup %6281 }
 0x65c   : > { %1954 = vadd.xlane.f32.xlu1 %v1953_v57  ;;  %v1947_v46 = vsel %vm1793_vm4, %v7584_v16, 0.0 }
 0x65d   : > { %6289 = vpow2.f32 %v1904_v27  ;;  %v1912_v29 = vmul.f32 1.442695, %v1877_v36  ;;  %v1826_v6 = vpop.xlane.xlu0 %1825 }
 0x65e   : > { %v1876_v8 = vsub.f32 %v7470_v33, %v1826_v6  ;;  %v1823_v44 = vpop.xlane.xlu1 %1822 }
 0x65f   : > { %v7587_v50 = vpop.eup %6283  ;;  %6291 = vpow2.f32 %v1912_v29  ;;  %v1875_v28 = vsub.f32 %v7465_v2, %v1823_v44 }
 0x660   : > { %v1910_v48 = vmul.f32 1.442695, %v1876_v8  ;;  %1948 = vadd.xlane.f32.xlu1 %v1947_v46  ;;  %v1950_v3 = vsel %vm1793_vm4, %v7587_v50, 0.0 }
 0x661   : > { %v1908_v51 = vmul.f32 1.442695, %v1875_v28  ;;  %1951 = vadd.xlane.f32.xlu0 %v1950_v3 }
 0x662   : > { %6293 = vpow2.f32 %v1910_v48 }
 0x663   : > { %v7594_v21 = vpop.eup %6285  ;;  %6295 = vpow2.f32 %v1908_v51 }
 0x664   : > { %v7596_v33 = vpop.eup %6287  ;;  %v1838_v54 = vpop.xlane.xlu0 %1837  ;;  %v1962_v2 = vsel %vm1793_vm4, %v7594_v21, 0.0 }
 0x665   : > { %v1880_v34 = vsub.f32 %v7477_v40, %v1838_v54  ;;  %v1832_v39 = vpop.xlane.xlu1 %1831  ;;  %1963 = vadd.xlane.f32.xlu0 %v1962_v2  ;;  %v1956_v0 = vsel %vm1793_vm4, %v7596_v33, 0.0 }
 0x666   : > { %v1878_v45 = vsub.f32 %v7480_v35, %v1832_v39  ;;  %1957 = vadd.xlane.f32.xlu1 %v1956_v0 }
 0x667   : > { %v7604_v27 = vpop.eup %6289  ;;  %v1918_v36 = vmul.f32 1.442695, %v1880_v34 }
 0x668   : > { %v1914_v57 = vmul.f32 1.442695, %v1878_v45  ;;  %v1835_v29 = vpop.xlane.xlu0 %1834  ;;  %v1959_v6 = vsel %vm1793_vm4, %v7604_v27, 0.0 }
 0x669   : > { %v7608_v8 = vpop.eup %6291  ;;  %6297 = vpow2.f32 %v1918_v36  ;;  %v1879_v40 = vsub.f32 %v7485_v17, %v1835_v29  ;;  %1960 = vadd.xlane.f32.xlu0 %v1959_v6 }
 0x66a   : > { %6299 = vpow2.f32 %v1914_v57  ;;  %v1847_v44 = vpop.xlane.xlu1 %1846  ;;  %v1971_v35 = vsel %vm1793_vm4, %v7608_v8, 0.0 }
 0x66b   : > { %v1916_v28 = vmul.f32 1.442695, %v1879_v40  ;;  %v1883_v46 = vsub.f32 %v7492_v32, %v1847_v44  ;;  %1972 = vadd.xlane.f32.xlu1 %v1971_v35 }
 0x66c   : > { %v7614_v48 = vpop.eup %6293 }
 0x66d   : > { %v7616_v3 = vpop.eup %6295  ;;  %6301 = vpow2.f32 %v1916_v28  ;;  %v1924_v51 = vmul.f32 1.442695, %v1883_v46  ;;  %v1844_v54 = vpop.xlane.xlu0 %1843  ;;  %v1968_v17 = vsel %vm1793_vm4, %v7614_v48, 0.0 }
 0x66e   : > { %v1841_v2 = vpop.xlane.xlu1 %1840  ;;  %1969 = vadd.xlane.f32.xlu0 %v1968_v17  ;;  %v1965_v34 = vsel %vm1793_vm4, %v7616_v3, 0.0  ;;  %v1882_v39 = vsub.f32 %v7500_v41, %v1844_v54 }
 0x66f   : > { %6303 = vpow2.f32 %v1924_v51  ;;  %v1881_v32 = vsub.f32 %v7495_v19, %v1841_v2  ;;  %1966 = vadd.xlane.f32.xlu1 %v1965_v34 }
 0x670   : > { %v1922_v36 = vmul.f32 1.442695, %v1882_v39 }
 0x671   : > { %v1920_v0 = vmul.f32 1.442695, %v1881_v32 }
 0x673   : > { %v7624_v45 = vpop.eup %6297  ;;  %6305 = vpow2.f32 %v1920_v0 }
 0x674   : > { %v7626_v57 = vpop.eup %6299  ;;  %v1856_v29 = vpop.xlane.xlu0 %1855  ;;  %v1980_v6 = vsel %vm1793_vm4, %v7624_v45, 0.0  ;;  %6307 = vpow2.f32 %v1922_v36 }
 0x675   : > { %v1886_v40 = vsub.f32 %v7507_v63, %v1856_v29  ;;  %1981 = vadd.xlane.f32.xlu0 %v1980_v6  ;;  %v1974_v41 = vsel %vm1793_vm4, %v7626_v57, 0.0 }
 0x676   : > { %1975 = vadd.xlane.f32.xlu1 %v1974_v41 }
 0x677   : > { %v7633_v19 = vpop.eup %6301  ;;  %v1930_v44 = vmul.f32 1.442695, %v1886_v40  ;;  %v1853_v35 = vpop.xlane.xlu1 %1852 }
 0x678   : > { %v1885_v28 = vsub.f32 %v7515_v42, %v1853_v35  ;;  %v1850_v46 = vpop.xlane.xlu0 %1849  ;;  %v1977_v51 = vsel %vm1793_vm4, %v7633_v19, 0.0 }
 0x679   : > { %v7638_v54 = vpop.eup %6303  ;;  %6309 = vpow2.f32 %v1930_v44  ;;  %v1884_v63 = vsub.f32 %v7510_v13, %v1850_v46  ;;  %1978 = vadd.xlane.f32.xlu0 %v1977_v51 }
 0x67a   : > { %v1928_v17 = vmul.f32 1.442695, %v1885_v28  ;;  %v1989_v32 = vsel %vm1793_vm4, %v7638_v54, 0.0 }
 0x67b   : > { %v1926_v2 = vmul.f32 1.442695, %v1884_v63  ;;  %v1865_v34 = vpop.xlane.xlu1 %1864 }
 0x67c   : > { %6311 = vpow2.f32 %v1928_v17  ;;  %v1889_v39 = vsub.f32 %v7520_v1, %v1865_v34 }
 0x67d   : > { %v7644_v42 = vpop.eup %6305  ;;  %6313 = vpow2.f32 %v1926_v2  ;;  %1990 = vadd.xlane.f32.xlu0 %v1989_v32  ;;  %v1862_v34 = vpop.xlane.xlu0 %1861 }
 0x67e   : > { %v1936_v0 = vmul.f32 1.442695, %v1889_v39  ;;  %v1983_v13 = vsel %vm1793_vm4, %v7644_v42, 0.0  ;;  %v7649_v6 = vpop.eup %6307  ;;  %v1888_v39 = vsub.f32 %v7530_v24, %v1862_v34 }
 0x67f   : > { %v1859_v36 = vpop.xlane.xlu1 %1858  ;;  %v1986_v41 = vsel %vm1793_vm4, %v7649_v6, 0.0 }
 0x680   : > { %6315 = vpow2.f32 %v1936_v0  ;;  %v1887_v29 = vsub.f32 %v7527_v15, %v1859_v36  ;;  %v1934_v32 = vmul.f32 1.442695, %v1888_v39 }
 0x681   : > { %1984 = vadd.xlane.f32.xlu0 %v1983_v13  ;;  %v7716_v36 = vpop.permute.xlu0 %2575 }
 0x682   : > { %v1932_v40 = vmul.f32 1.442695, %v1887_v29 }
 0x683   : > { %v7651_v1 = vpop.eup %6309 }
 0x684   : > { %6317 = vpow2.f32 %v1932_v40  ;;  %v1998_v44 = vsel %vm1793_vm4, %v7651_v1, 0.0 }
 0x685   : > { %1987 = vadd.xlane.f32.xlu0 %v1986_v41  ;;  %1999 = vadd.xlane.f32.xlu1 %v1998_v44  ;;  %6319 = vpow2.f32 %v1934_v32 }
 0x686   : > { %v7657_v35 = vpop.eup %6311 }
 0x687   : > { %v7659_v15 = vpop.eup %6313  ;;  %v1995_v28 = vsel %vm1793_vm4, %v7657_v35, 0.0 }
 0x688   : > { %v1992_v46 = vsel %vm1793_vm4, %v7659_v15, 0.0 }
 0x689   : > { %1996 = vadd.xlane.f32.xlu0 %v1995_v28  ;;  %1993 = vadd.xlane.f32.xlu1 %v1992_v46 }
 0x68a   : > { %v7665_v51 = vpop.eup %6315 }
 0x68b   : > { %v2007_v63 = vsel %vm1793_vm4, %v7665_v51, 0.0 }
 0x68d   : > { %2008 = vadd.xlane.f32.xlu0 %v2007_v63 }
 0x68e   : > { %v7669_v17 = vpop.eup %6317 }
 0x68f   : > { %v2001_v2 = vsel %vm1793_vm4, %v7669_v17, 0.0  ;;  %v7686_v0 = vpop.eup %6319 }
 0x690   : > { %v2004_v24 = vsel %vm1793_vm4, %v7686_v0, 0.0 }
 0x691   : > { %2002 = vadd.xlane.f32.xlu0 %v2001_v2 }
 0x69a   : > { %2577 = vrot.lane.b32.xlu1 %v7236_v52, %s6622_s26 }
 0x6a7   : > { %2643 = vrot.lane.b32.xlu0 %v7252_v14, %s6622_s26 }
 0x6ab   : > { %2645 = vrot.lane.b32.xlu0 %v7268_v49, %s6622_s26 }
 0x6af   : > { %2573 = vrot.lane.b32.xlu0 %v7236_v52, %s6623_s29 }
 0x6b3   : > { %2713 = vrot.lane.b32.xlu0 %v7274_v58, %s6622_s26 }
 0x6b7   : > { %2641 = vrot.lane.b32.xlu0 %v7268_v49, %s6623_s29 }
 0x6bb   : > { %2781 = vrot.lane.b32.xlu0 %v7283_v37, %s6622_s26 }
 0x6be   : > { %2005 = vadd.xlane.f32.xlu1 %v2004_v24 }
 0x6bf   : > { %2709 = vrot.lane.b32.xlu0 %v7274_v58, %s6623_s29 }
 0x6c3   : > { %2849 = vrot.lane.b32.xlu0 %v7292_v61, %s6622_s26 }
 0x6c7   : > { %2777 = vrot.lane.b32.xlu0 %v7283_v37, %s6623_s29 }
 0x6cb   : > { %2917 = vrot.lane.b32.xlu0 %v7303_v59, %s6622_s26 }
 0x6cf   : > { %2845 = vrot.lane.b32.xlu0 %v7292_v61, %s6623_s29  ;;  %2571 = vrot.lane.b32.xlu1 %v7242_v62, %s6623_s29 }
 0x6d3   : > { %2985 = vrot.lane.b32.xlu0 %v7313_v60, %s6622_s26  ;;  %2711 = vrot.lane.b32.xlu1 %v7256_v22, %s6622_s26 }
 0x6d7   : > { %2913 = vrot.lane.b32.xlu0 %v7303_v59, %s6623_s29  ;;  %2639 = vrot.lane.b32.xlu1 %v7252_v14, %s6623_s29 }
 0x6db   : > { %2981 = vrot.lane.b32.xlu0 %v7313_v60, %s6623_s29  ;;  %2779 = vrot.lane.b32.xlu1 %v7263_v25, %s6622_s26 }
 0x6df   : > { %3047 = vrot.lane.b32.xlu0 %v7317_v38, %s6623_s29  ;;  %2707 = vrot.lane.b32.xlu1 %v7256_v22, %s6623_s29 }
 0x6e2   : > { %v1946_v29 = vpop.xlane.xlu0 %1945 }
 0x6e3   : > { %3395 = vrot.lane.b32.xlu0 %v7242_v62, %s6624_s30  ;;  %2847 = vrot.lane.b32.xlu1 %v7281_v12, %s6622_s26  ;;  %6321 = vrcp.f32 %v1946_v29 }
 0x6e5   : > { %v1943_v13 = vpop.xlane.xlu1 %1942 }
 0x6e6   : > { %6323 = vrcp.f32 %v1943_v13  ;;  %v1940_v40 = vpop.xlane.xlu0 %1939 }
 0x6e7   : > { %6325 = vrcp.f32 %v1940_v40  ;;  %3397 = vrot.lane.b32.xlu0 %v7236_v52, %s6624_s30  ;;  %2775 = vrot.lane.b32.xlu1 %v7263_v25, %s6623_s29 }
 0x6e9   : > { %v1955_v41 = vpop.xlane.xlu1 %1954 }
 0x6ea   : > { %6327 = vrcp.f32 %v1955_v41  ;;  %v2211_v41 = vsel %vm2085_vm2, %v7550_v10, 0 }
 0x6eb   : > { %3459 = vrot.lane.b32.xlu0 %v7268_v49, %s6624_s30  ;;  %2915 = vrot.lane.b32.xlu1 %v7296_v31, %s6622_s26 }
 0x6ed   : > { %v1949_v62 = vpop.xlane.xlu1 %1948  ;;  %v6322_v44 = vpop.eup %6321 }
 0x6ee   : > { %6329 = vrcp.f32 %v1949_v62  ;;  %v1952_v28 = vpop.xlane.xlu0 %1951  ;;  %v2036_v49 = vmul.f32 %v6322_v44, %v7564_v47 }
 0x6ef   : > { %6331 = vrcp.f32 %v1952_v28  ;;  %3521 = vrot.lane.b32.xlu0 %v7274_v58, %s6624_s30  ;;  %2843 = vrot.lane.b32.xlu1 %v7281_v12, %s6623_s29 }
 0x6f0   : > { %v6324_v52 = vpop.eup %6323  ;;  %v2059_v32 = vpack.c.bf16 %v2036_v49, %v2036_v49 }
 0x6f1   : > { %v6326_v46 = vpop.eup %6325  ;;  %v2035_v63 = vmul.f32 %v6324_v52, %v7569_v18 }
 0x6f2   : > { %v1964_v2 = vpop.xlane.xlu0 %1963  ;;  %v2034_v34 = vmul.f32 %v6326_v46, %v7572_v56 }
 0x6f3   : > { %v1958_v39 = vpop.xlane.xlu1 %1957  ;;  %3643 = vrot.lane.b32.xlu0 %v7281_v12, %s6624_s30  ;;  %2983 = vrot.lane.b32.xlu1 %v7299_v7, %s6622_s26  ;;  %6333 = vrcp.f32 %v1964_v2  ;;  %v2273_v2 = vsel %vm2085_vm2, %v7540_v9, 0 }
 0x6f4   : > { %v2058_v58 = vpack.c.bf16 %v2035_v63, %v2034_v34  ;;  %6335 = vrcp.f32 %v1958_v39  ;;  %v6328_v24 = vpop.eup %6327 }
 0x6f5   : > { %v2039_v13 = vmul.f32 %v6328_v24, %v7579_v5 }
 0x6f6   : > { %5784 = vmatprep.mubr.msk.bf16.mxu1 %vm1793_vm4, %v2058_v58  ;;  %v1961_v18 = vpop.xlane.xlu0 %1960 }
 0x6f7   : > { %6337 = vrcp.f32 %v1961_v18  ;;  %2911 = vrot.lane.b32.xlu1 %v7296_v31, %s6623_s29  ;;  %5785 = vmatmul.mubr.msk.bf16.vlgmr.msra.gmra.mrb[32].mxu1 %vm1793_vm4, %v2059_v32 }
 0x6f8   : > { %v6330_v47 = vpop.eup %6329  ;;  %5797 = vmatpush3.bf16.msra.mxu1 %v7401_v30  ;;  %v1973_v12 = vpop.xlane.xlu1 %1972 }
 0x6f9   : > { %v6332_v56 = vpop.eup %6331  ;;  %6082 = vmatprep.subr.msk.bf16.mxu1 %vm2085_vm2, %v7550_v10  ;;  %v2037_v29 = vmul.f32 %v6330_v47, %v7584_v16  ;;  %6339 = vrcp.f32 %v1973_v12  ;;  %v2061_v16 = vpack.c.bf16 %v2039_v13, %v2039_v13  ;;  %v2335_v47 = vsel %vm2085_vm2, %v7554_v20, 0 }
 0x6fa   : > { %v2038_v40 = vmul.f32 %v6332_v56, %v7587_v50 }
 0x6fb   : > { %3051 = vrot.lane.b32.xlu1 %v7317_v38, %s6622_s26  ;;  %v1970_v62 = vpop.xlane.xlu0 %1969 }
 0x6fc   : > { %5799 = vmatpush3.bf16.msra.mxu1 %v2211_v41  ;;  %6341 = vrcp.f32 %v1970_v62  ;;  %v1967_v30 = vpop.xlane.xlu1 %1966  ;;  %v2060_v44 = vpack.c.bf16 %v2038_v40, %v2037_v29 }
 0x6fd   : > { %6343 = vrcp.f32 %v1967_v30  ;;  %5812 = vmatprep.subr.bf16.mxu1 %v7538_v26  ;;  %v6334_v28 = vpop.eup %6333 }
 0x6fe   : > { %5792 = vmatprep.mubr.msk.bf16.mxu0 %vm1793_vm4, %v2060_v44  ;;  %v6336_v5 = vpop.eup %6335  ;;  %v2042_v50 = vmul.f32 %v6334_v28, %v7594_v21 }
 0x6ff   : > { %2979 = vrot.lane.b32.xlu1 %v7299_v7, %s6623_s29  ;;  %5793 = vmatmul.mubr.msk.bf16.vlgmr.msra.gmra.mrb[40].mxu0 %vm1793_vm4, %v2061_v16  ;;  %v2040_v46 = vmul.f32 %v6336_v5, %v7596_v33 }
 0x700   : > { %5805 = vmatpush3.bf16.msra.mxu0 %v7410_v23  ;;  %v2063_v21 = vpack.c.bf16 %v2042_v50, %v2042_v50 }
 0x701   : > { %v6338_v10 = vpop.eup %6337  ;;  %6083 = vmatprep.subr.msk.bf16.mxu0 %vm2085_vm2, %v7540_v9 }
 0x702   : > { %v1982_v52 = vpop.xlane.xlu0 %1981  ;;  %v2041_v63 = vmul.f32 %v6338_v10, %v7604_v27 }
 0x703   : > { %v1976_v49 = vpop.xlane.xlu1 %1975  ;;  %3053 = vrot.lane.b32.xlu1 %v7321_v55, %s6622_s26  ;;  %v6340_v34 = vpop.eup %6339  ;;  %6345 = vrcp.f32 %v1982_v52 }
 0x704   : > { %5807 = vmatpush3.bf16.msra.mxu0 %v2273_v2  ;;  %v2062_v23 = vpack.c.bf16 %v2041_v63, %v2040_v46  ;;  %6347 = vrcp.f32 %v1976_v49  ;;  %v2045_v58 = vmul.f32 %v6340_v34, %v7608_v8 }
 0x705   : > { %5820 = vmatprep.subr.bf16.mxu0 %v7542_v43 }
 0x706   : > { %v6342_v39 = vpop.eup %6341  ;;  %5800 = vmatprep.mubr.msk.bf16.mxu1 %vm1793_vm4, %v2062_v23  ;;  %v1979_v33 = vpop.xlane.xlu0 %1978  ;;  %v2065_v12 = vpack.c.bf16 %v2045_v58, %v2045_v58 }
 0x707   : > { %v6344_v27 = vpop.eup %6343  ;;  %6349 = vrcp.f32 %v1979_v33  ;;  %3049 = vrot.lane.b32.xlu1 %v7321_v55, %s6623_s29  ;;  %5801 = vmatmul.mubr.msk.bf16.vlgmr.msra.gmra.mrb[36].mxu1 %vm1793_vm4, %v2063_v21  ;;  %v2044_v9 = vmul.f32 %v6342_v39, %v7614_v48 }
 0x708   : > { %5813 = vmatpush3.bf16.msra.mxu1 %v7538_v26  ;;  %v2043_v32 = vmul.f32 %v6344_v27, %v7616_v3 }
 0x709   : > { %6084 = vmatprep.subr.msk.bf16.mxu1 %vm2085_vm2, %v7554_v20  ;;  %v2397_v20 = vsel %vm2085_vm2, %v7546_v4, 0 }
 0x70a   : > { %v1991_v24 = vpop.xlane.xlu0 %1990  ;;  %v2064_v18 = vpack.c.bf16 %v2044_v9, %v2043_v32 }
 0x70b   : > { %3457 = vrot.lane.b32.xlu1 %v7252_v14, %s6624_s30  ;;  %6351 = vrcp.f32 %v1991_v24 }
 0x70c   : > { %5815 = vmatpush3.bf16.msra.mxu1 %v2335_v47  ;;  %5808 = vmatprep.mubr.msk.bf16.mxu0 %vm1793_vm4, %v2064_v18 }
 0x70d   : > { %5828 = vmatprep.subr.bf16.mxu1 %v7544_v11  ;;  %5809 = vmatmul.mubr.msk.bf16.vlgmr.msra.gmra.mrb[44].mxu0 %vm1793_vm4, %v2065_v12  ;;  %v6346_v26 = vpop.eup %6345 }
 0x70e   : > { %5821 = vmatpush3.bf16.msra.mxu0 %v7542_v43  ;;  %v1985_v8 = vpop.xlane.xlu0 %1984  ;;  %v6348_v48 = vpop.eup %6347  ;;  %v2048_v3 = vmul.f32 %v6346_v26, %v7624_v45 }
 0x70f   : > { %6085 = vmatprep.subr.msk.bf16.mxu0 %vm2085_vm2, %v7546_v4  ;;  %3519 = vrot.lane.b32.xlu1 %v7256_v22, %s6624_s30  ;;  %6353 = vrcp.f32 %v1985_v8  ;;  %v2046_v43 = vmul.f32 %v6348_v48, %v7626_v57  ;;  %v9037_v57 = vld [vmem:[#allocation21_spill] sm:$0xff] }
 0x710   : > { %v2067_v40 = vpack.c.bf16 %v2048_v3, %v2048_v3  ;;  %v2459_v41 = vsel %vm2085_vm2, %v9037_v57, 0 }
 0x711   : > { %v6350_v14 = vpop.eup %6349 }
 0x712   : > { %5823 = vmatpush3.bf16.msra.mxu0 %v2397_v20  ;;  %v2000_v56 = vpop.xlane.xlu1 %1999  ;;  %v1988_v29 = vpop.xlane.xlu0 %1987  ;;  %v2047_v13 = vmul.f32 %v6350_v14, %v7633_v19 }
 0x713   : > { %5836 = vmatprep.subr.bf16.mxu0 %v7556_v53  ;;  %3581 = vrot.lane.b32.xlu1 %v7263_v25, %s6624_s30  ;;  %6355 = vrcp.f32 %v1988_v29 }
 0x714   : > { %v2066_v22 = vpack.c.bf16 %v2047_v13, %v2046_v43  ;;  %6357 = vrcp.f32 %v2000_v56 }
 0x715   : > { %v6352_v19 = vpop.eup %6351 }
 0x716   : > { %v1994_v4 = vpop.xlane.xlu1 %1993  ;;  %5816 = vmatprep.mubr.msk.bf16.mxu1 %vm1793_vm4, %v2066_v22  ;;  %v1997_v45 = vpop.xlane.xlu0 %1996 }
 0x717   : > { %6359 = vrcp.f32 %v1994_v4  ;;  %3583 = vrot.lane.b32.xlu1 %v7283_v37, %s6624_s30  ;;  %5817 = vmatmul.mubr.msk.bf16.vlgmr.msra.gmra.mrb[40].mxu1 %vm1793_vm4, %v2067_v40 }
 0x718   : > { %6361 = vrcp.f32 %v1997_v45  ;;  %5829 = vmatpush3.bf16.msra.mxu1 %v7544_v11  ;;  %v2051_v11 = vmul.f32 %v6352_v19, %v7638_v54 }
 0x719   : > { %6086 = vmatprep.subr.msk.bf16.mxu1 %vm2085_vm2, %v9037_v57  ;;  %v6354_v62 = vpop.eup %6353 }
 0x71a   : > { %v2009_v25 = vpop.xlane.xlu0 %2008  ;;  %v2049_v16 = vmul.f32 %v6354_v62, %v7644_v42  ;;  %v2069_v50 = vpack.c.bf16 %v2051_v11, %v2051_v11 }
 0x71b   : > { %3705 = vrot.lane.b32.xlu1 %v7296_v31, %s6624_s30  ;;  %6363 = vrcp.f32 %v2009_v25 }
 0x71c   : > { %5831 = vmatpush3.bf16.msra.mxu1 %v2459_v41 }
 0x71d   : > { %6088 = vmatprep.subr.msk.bf16.mxu1 %vm1270_vm1, %v7716_v36  ;;  %v6356_v37 = vpop.eup %6355 }
 0x71e   : > { %v2003_v30 = vpop.xlane.xlu0 %2002  ;;  %v6358_v44 = vpop.eup %6357  ;;  %v2050_v31 = vmul.f32 %v6356_v37, %v7649_v6  ;;  %v9038_v6 = vld [vmem:[#allocation22_spill] sm:$0xff] }
 0x71f   : > { %3645 = vrot.lane.b32.xlu1 %v7292_v61, %s6624_s30  ;;  %v2054_v46 = vmul.f32 %v6358_v44, %v7651_v1  ;;  %v2521_v1 = vsel %vm2085_vm2, %v9038_v6, 0  ;;  %6365 = vrcp.f32 %v2003_v30 }
 0x720   : > { %v2068_v5 = vpack.c.bf16 %v2050_v31, %v2049_v16 }
 0x721   : > { %v6360_v28 = vpop.eup %6359  ;;  %v2071_v63 = vpack.c.bf16 %v2054_v46, %v2054_v46 }
 0x722   : > { %v6362_v10 = vpop.eup %6361  ;;  %v2052_v52 = vmul.f32 %v6360_v28, %v7659_v15  ;;  %5824 = vmatprep.mubr.msk.bf16.mxu0 %vm1793_vm4, %v2068_v5  ;;  %v2644_v61 = vpop.permute.xlu0 %2643 }
 0x723   : > { %3707 = vrot.lane.b32.xlu1 %v7303_v59, %s6624_s30  ;;  %v2053_v54 = vmul.f32 %v6362_v10, %v7657_v35  ;;  %5825 = vmatmul.mubr.msk.bf16.vlgmr.msra.gmra.mrb[48].mxu0 %vm1793_vm4, %v2069_v50  ;;  %v2586_v59 = vsel %vm1270_vm1, %v7716_v36, 0  ;;  %v2578_v35 = vpop.permute.xlu1 %2577  ;;  %v2654_v56 = vsel %vm1270_vm1, %v2644_v61, 0 }
 0x724   : > { %5837 = vmatpush3.bf16.msra.mxu0 %v7556_v53  ;;  %v2589_v49 = vsel %vm1270_vm1, %v2578_v35, 0 }
 0x725   : > { %v2070_v42 = vpack.c.bf16 %v2053_v54, %v2052_v52  ;;  %6087 = vmatprep.subr.msk.bf16.mxu0 %vm2085_vm2, %v9038_v6  ;;  %v6364_v27 = vpop.eup %6363 }
 0x726   : > { %v2646_v15 = vpop.permute.xlu0 %2645  ;;  %v2057_v47 = vmul.f32 %v6364_v27, %v7665_v51 }
 0x727   : > { %5832 = vmatprep.mubr.msk.bf16.mxu1 %vm1793_vm4, %v2070_v42  ;;  %v2657_v43 = vsel %vm1270_vm1, %v2646_v15, 0 }
 0x728   : > { %5833 = vmatmul.mubr.msk.bf16.vlgmr.msra.gmra.mrb[44].mxu1 %vm1793_vm4, %v2071_v63  ;;  %5839 = vmatpush3.bf16.msra.mxu0 %v2521_v1  ;;  %v2073_v20 = vpack.c.bf16 %v2057_v47, %v2057_v47 }
 0x729   : > { %5845 = vmatpush3.bf16.xpose.msra.mxu1 %v2586_v59  ;;  %6090 = vmatprep.subr.msk.bf16.mxu0 %vm1270_vm1, %v2644_v61  ;;  %v6366_v58 = vpop.eup %6365 }
 0x72a   : > { %6089 = vmatprep.subr.msk.bf16.mxu1 %vm1270_vm1, %v2578_v35  ;;  %v2574_v53 = vpop.permute.xlu0 %2573  ;;  %v2055_v26 = vmul.f32 %v6366_v58, %v7669_v17 }
 0x72e   : > { %v2714_v2 = vpop.permute.xlu0 %2713 }
 0x72f   : > { %v2725_v51 = vsel %vm1270_vm1, %v2714_v2, 0 }
 0x731   : > { %5847 = vmatpush3.bf16.xpose.msra.mxu1 %v2589_v49 }
 0x732   : > { %v2642_v34 = vpop.permute.xlu0 %2641 }
 0x736   : > { %v2782_v23 = vpop.permute.xlu0 %2781 }
 0x737   : > { %v2793_v37 = vsel %vm1270_vm1, %v2782_v23, 0 }
 0x73a   : > { %v2710_v21 = vpop.permute.xlu0 %2709 }
 0x73e   : > { %v2850_v36 = vpop.permute.xlu0 %2849 }
 0x73f   : > { %v2861_v25 = vsel %vm1270_vm1, %v2850_v36, 0 }
 0x742   : > { %v2778_v32 = vpop.permute.xlu0 %2777 }
 0x746   : > { %v2918_v14 = vpop.permute.xlu0 %2917 }
 0x747   : > { %v2929_v52 = vsel %vm1270_vm1, %v2918_v14, 0 }
 0x74b   : > { %v2006_v39 = vpop.xlane.xlu1 %2005 }
 0x74c   : > { %6367 = vrcp.f32 %v2006_v39 }
 0x74f   : > { %v2572_v33 = vpop.permute.xlu1 %2571 }
 0x750   : > { %5848 = vmatprep.mubr.msk.bf16.mxu1 %vm1270_vm1, %v2572_v33 }
 0x751   : > { %5849 = vmatmul.mubr.msk.bf16.vlgmr.msra.gmra.mrb[48].mxu1 %vm1270_vm1, %v2574_v53 }
 0x753   : > { %v2712_v9 = vpop.permute.xlu1 %2711 }
 0x754   : > { %6092 = vmatprep.subr.msk.bf16.mxu1 %vm1270_vm1, %v2712_v9  ;;  %v2722_v24 = vsel %vm1270_vm1, %v2712_v9, 0 }
 0x755   : > { %5861 = vmatpush3.bf16.xpose.msra.mxu1 %v2722_v24 }
 0x756   : > { %v6368_v18 = vpop.eup %6367  ;;  %6093 = vmatprep.subr.msk.bf16.mxu1 %vm1270_vm1, %v2714_v2 }
 0x757   : > { %v2640_v12 = vpop.permute.xlu1 %2639  ;;  %v2056_v8 = vmul.f32 %v6368_v18, %v7686_v0  ;;  %v2846_v0 = vpop.permute.xlu0 %2845 }
 0x759   : > { %v2072_v48 = vpack.c.bf16 %v2056_v8, %v2055_v26 }
 0x75b   : > { %v2780_v3 = vpop.permute.xlu1 %2779  ;;  %5840 = vmatprep.mubr.msk.bf16.mxu0 %vm1793_vm4, %v2072_v48  ;;  %v2986_v22 = vpop.permute.xlu0 %2985 }
 0x75c   : > { %5841 = vmatmul.mubr.msk.bf16.vlgmr.msra.gmra.mrb[52].mxu0 %vm1793_vm4, %v2073_v20  ;;  %v2790_v57 = vsel %vm1270_vm1, %v2780_v3, 0  ;;  %v2997_v28 = vsel %vm1270_vm1, %v2986_v22, 0 }
 0x75d   : > { %5853 = vmatpush3.bf16.xpose.msra.mxu0 %v2654_v56  ;;  %5856 = vmatprep.mubr.msk.bf16.mxu0 %vm1270_vm1, %v2640_v12 }
 0x75e   : > { %6091 = vmatprep.subr.msk.bf16.mxu0 %vm1270_vm1, %v2646_v15  ;;  %5863 = vmatpush3.bf16.xpose.msra.mxu1 %v2725_v51 }
 0x75f   : > { %v2708_v17 = vpop.permute.xlu1 %2707  ;;  %v2914_v45 = vpop.permute.xlu0 %2913 }
 0x760   : > { %5864 = vmatprep.mubr.msk.bf16.mxu1 %vm1270_vm1, %v2708_v17 }
 0x763   : > { %v2848_v29 = vpop.permute.xlu1 %2847  ;;  %v2982_v41 = vpop.permute.xlu0 %2981 }
 0x764   : > { %6096 = vmatprep.subr.msk.bf16.mxu1 %vm1270_vm1, %v2848_v29  ;;  %v2858_v13 = vsel %vm1270_vm1, %v2848_v29, 0 }
 0x765   : > { %5855 = vmatpush3.bf16.xpose.msra.mxu0 %v2657_v43  ;;  %5865 = vmatmul.mubr.msk.bf16.vlgmr.msra.gmra.mrb[52].mxu1 %vm1270_vm1, %v2710_v21 }
 0x766   : > { %6094 = vmatprep.subr.msk.bf16.mxu0 %vm1270_vm1, %v2780_v3  ;;  %5877 = vmatpush3.bf16.xpose.msra.mxu1 %v2858_v13  ;;  %v9044_v13 = vld [vmem:[#allocation20_spill] sm:$0xff] }
 0x767   : > { %6097 = vmatprep.subr.msk.bf16.mxu1 %vm1270_vm1, %v2850_v36  ;;  %v2776_v40 = vpop.permute.xlu1 %2775  ;;  %v3048_v44 = vpop.permute.xlu0 %3047 }
 0x76b   : > { %v2916_v4 = vpop.permute.xlu1 %2915  ;;  %v3396_v5 = vpop.permute.xlu0 %3395 }
 0x76c   : > { %5857 = vmatmul.mubr.msk.bf16.vlgmr.msra.gmra.mrb[56].mxu0 %vm1270_vm1, %v2642_v34  ;;  %v2926_v31 = vsel %vm1270_vm1, %v2916_v4, 0 }
 0x76d   : > { %5869 = vmatpush3.bf16.xpose.msra.mxu0 %v2790_v57  ;;  %5872 = vmatprep.mubr.msk.bf16.mxu0 %vm1270_vm1, %v2776_v40 }
 0x76e   : > { %6095 = vmatprep.subr.msk.bf16.mxu0 %vm1270_vm1, %v2782_v23  ;;  %5879 = vmatpush3.bf16.xpose.msra.mxu1 %v2861_v25 }
 0x76f   : > { %v2844_v19 = vpop.permute.xlu1 %2843  ;;  %v3398_v46 = vpop.permute.xlu0 %3397 }
 0x770   : > { %5880 = vmatprep.mubr.msk.bf16.mxu1 %vm1270_vm1, %v2844_v19  ;;  %v3407_v61 = vsel %vm2085_vm2, %v3398_v46, 0 }
 0x773   : > { %v2984_v62 = vpop.permute.xlu1 %2983  ;;  %v3460_v59 = vpop.permute.xlu0 %3459 }
 0x774   : > { %6100 = vmatprep.subr.msk.bf16.mxu1 %vm1270_vm1, %v2984_v62  ;;  %v2994_v30 = vsel %vm1270_vm1, %v2984_v62, 0  ;;  %v3469_v35 = vsel %vm2085_vm2, %v3460_v59, 0 }
 0x775   : > { %5871 = vmatpush3.bf16.xpose.msra.mxu0 %v2793_v37  ;;  %5881 = vmatmul.mubr.msk.bf16.vlgmr.msra.gmra.mrb[56].mxu1 %vm1270_vm1, %v2846_v0 }
 0x776   : > { %6098 = vmatprep.subr.msk.bf16.mxu0 %vm1270_vm1, %v2916_v4  ;;  %5893 = vmatpush3.bf16.xpose.msra.mxu1 %v2994_v30 }
 0x777   : > { %6101 = vmatprep.subr.msk.bf16.mxu1 %vm1270_vm1, %v2986_v22  ;;  %v2912_v11 = vpop.permute.xlu1 %2911 }
 0x77b   : > { %v3052_v16 = vpop.permute.xlu1 %3051 }
 0x77c   : > { %5873 = vmatmul.mubr.msk.bf16.vlgmr.msra.gmra.mrb[60].mxu0 %vm1270_vm1, %v2778_v32  ;;  %v3062_v6 = vsel %vm1270_vm1, %v3052_v16, 0 }
 0x77d   : > { %5885 = vmatpush3.bf16.xpose.msra.mxu0 %v2926_v31  ;;  %5888 = vmatprep.mubr.msk.bf16.mxu0 %vm1270_vm1, %v2912_v11 }
 0x77e   : > { %6099 = vmatprep.subr.msk.bf16.mxu0 %vm1270_vm1, %v2918_v14  ;;  %5895 = vmatpush3.bf16.xpose.msra.mxu1 %v2997_v28 }
 0x77f   : > { %5908 = vmatprep.subr.bf16.mxu1 %v3396_v5  ;;  %v2980_v10 = vpop.permute.xlu1 %2979 }
 0x780   : > { %5896 = vmatprep.mubr.msk.bf16.mxu1 %vm1270_vm1, %v2980_v10 }
 0x783   : > { %v3054_v50 = vpop.permute.xlu1 %3053 }
 0x784   : > { %v3065_v1 = vsel %vm1270_vm1, %v3054_v50, 0 }
 0x785   : > { %5887 = vmatpush3.bf16.xpose.msra.mxu0 %v2929_v52  ;;  %5897 = vmatmul.mubr.msk.bf16.vlgmr.msra.gmra.mrb[60].mxu1 %vm1270_vm1, %v2982_v41 }
 0x786   : > { %6102 = vmatprep.subr.msk.bf16.mxu0 %vm1270_vm1, %v3052_v16  ;;  %5909 = vmatpush3.bf16.msra.mxu1 %v3396_v5 }
 0x787   : > { %6104 = vmatprep.subr.msk.bf16.mxu1 %vm2085_vm2, %v3398_v46  ;;  %v3050_v54 = vpop.permute.xlu1 %3049 }
 0x78a   : > { %5911 = vmatpush3.bf16.msra.mxu1 %v3407_v61 }
 0x78b   : > { %v3458_v42 = vpop.permute.xlu1 %3457 }
 0x78c   : > { %5889 = vmatmul.mubr.msk.bf16.vlgmr.msra.gmra.mrb[64].mxu0 %vm1270_vm1, %v2914_v45 }
 0x78d   : > { %5901 = vmatpush3.bf16.xpose.msra.mxu0 %v3062_v6  ;;  %5904 = vmatprep.mubr.msk.bf16.mxu0 %vm1270_vm1, %v3048_v44 }
 0x78e   : > { %6103 = vmatprep.subr.msk.bf16.mxu0 %vm1270_vm1, %v3054_v50 }
 0x78f   : > { %v7890_v63 = vpop.permute.xlu1 %3519 }
 0x790   : > { %5924 = vmatprep.subr.bf16.mxu1 %v7890_v63 }
 0x793   : > { %v7897_v15 = vpop.permute.xlu1 %3581 }
 0x795   : > { %5903 = vmatpush3.bf16.xpose.msra.mxu0 %v3065_v1 }
 0x796   : > { %5916 = vmatprep.subr.bf16.mxu0 %v3458_v42 }
 0x79c   : > { %5905 = vmatmul.mubr.msk.bf16.vlgmr.msra.gmra.mrb[68].mxu0 %vm1270_vm1, %v3050_v54 }
 0x79d   : > { %5917 = vmatpush3.bf16.msra.mxu0 %v3458_v42 }
 0x79e   : > { %6105 = vmatprep.subr.msk.bf16.mxu0 %vm2085_vm2, %v3460_v59 }
 0x7a1   : > { %5919 = vmatpush3.bf16.msra.mxu0 %v3469_v35 }
 0x7a2   : > { %5932 = vmatprep.subr.bf16.mxu0 %v7897_v15 }
 0x7ca   : > { %v7900_v53 = vpop.f32.mrb[32].mxu1 }
 0x7cb   : > { %v7902_v49 = vpop.f32.mrb[33].mxu1 }
 0x7cc   : > { %v5787_v2 = vpop.f32.mrb[34].mxu1 }
 0x7cd   : > { %v7904_v34 = vpop.f32.mrb[35].mxu1 }
 0x7d2   : > { %v7906_v23 = vpop.f32.mrb[40].mxu0 }
 0x7d3   : > { %v7908_v21 = vpop.f32.mrb[41].mxu0 }
 0x7d4   : > { %v5795_v39 = vpop.f32.mrb[42].mxu0 }
 0x7d5   : > { %v7910_v36 = vpop.f32.mrb[43].mxu0 }
 0x7da   : > { %v7912_v33 = vpop.f32.mrb[36].mxu1 }
 0x7db   : > { %v7914_v27 = vpop.f32.mrb[37].mxu1 }
 0x7dc   : > { %v5803_v9 = vpop.f32.mrb[38].mxu1 }
 0x7dd   : > { %v7916_v58 = vpop.f32.mrb[39].mxu1 }
 0x7e0   : > { %v7918_v32 = vpop.f32.mrb[44].mxu0 }
 0x7e1   : > { %v7920_v24 = vpop.f32.mrb[45].mxu0 }
 0x7e2   : > { %v5811_v18 = vpop.f32.mrb[46].mxu0 }
 0x7e3   : > { %v7922_v47 = vpop.f32.mrb[47].mxu0 }
 0x7ea   : > { %v7924_v12 = vpop.f32.mrb[40].mxu1 }
 0x7eb   : > { %v7926_v26 = vpop.f32.mrb[41].mxu1 }
 0x7ec   : > { %v5819_v8 = vpop.f32.mrb[42].mxu1 }
 0x7ed   : > { %v7928_v48 = vpop.f32.mrb[43].mxu1 }
 0x7f6   : > { %v7930_v14 = vpop.f32.mrb[48].mxu0 }
 0x7f7   : > { %9039 = vst [vmem:[#allocation21_spill] sm:$0xff] %v7930_v14  ;;  %v7932_v20 = vpop.f32.mrb[49].mxu0 }
 0x7f8   : > { %v5827_v3 = vpop.f32.mrb[50].mxu0 }
 0x7f9   : > { %v7934_v56 = vpop.f32.mrb[51].mxu0 }
 0x7fa   : > { %9040 = vst [vmem:[#allocation22_spill] sm:$0xff] %v7934_v56 }
 0x7fb   : > { %v7936_v51 = vpop.f32.mrb[44].mxu1 }
 0x7fc   : > { %9041 = vst [vmem:[#allocation23_spill] sm:$0xff] %v7936_v51  ;;  %v7938_v17 = vpop.f32.mrb[45].mxu1 }
 0x7fd   : > { %9042 = vst [vmem:[#allocation24_spill] sm:$0xff] %v7938_v17  ;;  %v5835_v0 = vpop.f32.mrb[46].mxu1 }
 0x7fe   : > { %v7940_v29 = vpop.f32.mrb[47].mxu1 }
 0x7ff   : > { %9043 = vst [vmem:[#allocation25_spill] sm:$0xff] %v7940_v29 }
 0x824   : > { %v5850_v43 = vpop.f32.mrb[48].mxu1 }
 0x825   : > { %v7943_v22 = vadd.f32 %v5850_v43, %v9044_v13  ;;  %v2625_v40 = vpop.f32.mrb[49].mxu1 }
 0x826   : > { %v5851_v4 = vpop.f32.mrb[50].mxu1  ;;  %v7946_v45 = vadd.f32 %v2625_v40, %v9044_v13 }
 0x827   : > { %v2628_v57 = vpop.f32.mrb[51].mxu1  ;;  %v3121_v25 = vsel %vm1793_vm4, %v7943_v22, -inf }
 0x828   : > { %v7951_v19 = vadd.f32 %v2628_v57, %v9044_v13  ;;  %3122 = vmax.xlane.f32.xlu0 %v3121_v25  ;;  %v3115_v62 = vsel %vm1793_vm4, %v7946_v45, -inf }
 0x82a   : > { %v3118_v41 = vsel %vm1793_vm4, %v7951_v19, -inf }
 0x82b   : > { %3119 = vmax.xlane.f32.xlu1 %v3118_v41 }
 0x82c   : > { %3116 = vmax.xlane.f32.xlu0 %v3115_v62 }
 0x82f   : > { %v7957_v37 = vpop.f32.mrb[52].mxu0 }
 0x830   : > { %9045 = vst [vmem:[#allocation20_spill] sm:$0xff] %v7957_v37  ;;  %v7959_v30 = vpop.f32.mrb[53].mxu0 }
 0x831   : > { %9046 = vst [vmem:[#allocation26_spill] sm:$0xff] %v7959_v30  ;;  %v5843_v11 = vpop.f32.mrb[54].mxu0 }
 0x832   : > { %v7961_v44 = vpop.f32.mrb[55].mxu0 }
 0x833   : > { %9047 = vst [vmem:[#allocation27_spill] sm:$0xff] %v7961_v44 }
 0x838   : > { %v5866_v16 = vpop.f32.mrb[52].mxu1 }
 0x839   : > { %v2761_v31 = vpop.f32.mrb[53].mxu1  ;;  %v7982_v2 = vadd.f32 %v5866_v16, %v9044_v13 }
 0x83a   : > { %v5867_v28 = vpop.f32.mrb[54].mxu1  ;;  %v7987_v3 = vadd.f32 %v2761_v31, %v9044_v13 }
 0x83b   : > { %v2764_v5 = vpop.f32.mrb[55].mxu1  ;;  %v3139_v43 = vsel %vm1793_vm4, %v7982_v2, -inf }
 0x83c   : > { %v7970_v61 = vadd.f32 %v2764_v5, %v9044_v13  ;;  %v3133_v4 = vsel %vm1793_vm4, %v7987_v3, -inf }
 0x83e   : > { %v3136_v35 = vsel %vm1793_vm4, %v7970_v61, -inf }
 0x83f   : > { %v5858_v10 = vpop.f32.mrb[56].mxu0 }
 0x840   : > { %v7964_v50 = vadd.f32 %v5858_v10, %v9044_v13  ;;  %v2693_v52 = vpop.f32.mrb[57].mxu0 }
 0x841   : > { %v7967_v46 = vadd.f32 %v2693_v52, %v9044_v13  ;;  %v5859_v54 = vpop.f32.mrb[58].mxu0 }
 0x842   : > { %v2696_v42 = vpop.f32.mrb[59].mxu0  ;;  %v3130_v6 = vsel %vm1793_vm4, %v7964_v50, -inf }
 0x843   : > { %v7975_v1 = vadd.f32 %v2696_v42, %v9044_v13  ;;  %3131 = vmax.xlane.f32.xlu1 %v3130_v6  ;;  %v3124_v59 = vsel %vm1793_vm4, %v7967_v46, -inf }
 0x844   : > { %3125 = vmax.xlane.f32.xlu0 %v3124_v59 }
 0x845   : > { %v3127_v39 = vsel %vm1793_vm4, %v7975_v1, -inf }
 0x847   : > { %3137 = vmax.xlane.f32.xlu1 %v3136_v35 }
 0x848   : > { %3128 = vmax.xlane.f32.xlu0 %v3127_v39  ;;  %v5882_v9 = vpop.f32.mrb[56].mxu1 }
 0x849   : > { %v2897_v18 = vpop.f32.mrb[57].mxu1  ;;  %v8005_v28 = vadd.f32 %v5882_v9, %v9044_v13 }
 0x84a   : > { %v5883_v8 = vpop.f32.mrb[58].mxu1  ;;  %v8015_v42 = vadd.f32 %v2897_v18, %v9044_v13 }
 0x84b   : > { %v2900_v0 = vpop.f32.mrb[59].mxu1  ;;  %v3157_v59 = vsel %vm1793_vm4, %v8005_v28, -inf }
 0x84c   : > { %3140 = vmax.xlane.f32.xlu0 %v3139_v43  ;;  %v8010_v10 = vadd.f32 %v2900_v0, %v9044_v13  ;;  %v3151_v8 = vsel %vm1793_vm4, %v8015_v42, -inf }
 0x84e   : > { %v3154_v39 = vsel %vm1793_vm4, %v8010_v10, -inf }
 0x84f   : > { %v5874_v40 = vpop.f32.mrb[60].mxu0 }
 0x850   : > { %v7994_v57 = vadd.f32 %v5874_v40, %v9044_v13  ;;  %3134 = vmax.xlane.f32.xlu0 %v3133_v4  ;;  %v2829_v25 = vpop.f32.mrb[61].mxu0 }
 0x851   : > { %v5875_v41 = vpop.f32.mrb[62].mxu0  ;;  %v7997_v62 = vadd.f32 %v2829_v25, %v9044_v13 }
 0x852   : > { %v2832_v11 = vpop.f32.mrb[63].mxu0  ;;  %v3148_v16 = vsel %vm1793_vm4, %v7994_v57, -inf }
 0x853   : > { %v8002_v31 = vadd.f32 %v2832_v11, %v9044_v13  ;;  %3149 = vmax.xlane.f32.xlu1 %v3148_v16  ;;  %v3142_v52 = vsel %vm1793_vm4, %v7997_v62, -inf }
 0x855   : > { %v3145_v5 = vsel %vm1793_vm4, %v8002_v31, -inf }
 0x856   : > { %3146 = vmax.xlane.f32.xlu0 %v3145_v5 }
 0x857   : > { %3143 = vmax.xlane.f32.xlu1 %v3142_v52 }
 0x858   : > { %v5898_v54 = vpop.f32.mrb[60].mxu1 }
 0x859   : > { %v3033_v6 = vpop.f32.mrb[61].mxu1  ;;  %v8035_v16 = vadd.f32 %v5898_v54, %v9044_v13 }
 0x85a   : > { %3158 = vmax.xlane.f32.xlu0 %v3157_v59  ;;  %v5899_v35 = vpop.f32.mrb[62].mxu1 }
 0x85b   : > { %3155 = vmax.xlane.f32.xlu1 %v3154_v39  ;;  %v3036_v9 = vpop.f32.mrb[63].mxu1  ;;  %v8045_v35 = vadd.f32 %v3033_v6, %v9044_v13  ;;  %v3175_v39 = vsel %vm1793_vm4, %v8035_v16, -inf }
 0x85c   : > { %v8040_v52 = vadd.f32 %v3036_v9, %v9044_v13 }
 0x85d   : > { %v3169_v9 = vsel %vm1793_vm4, %v8045_v35, -inf }
 0x85e   : > { %3152 = vmax.xlane.f32.xlu0 %v3151_v8  ;;  %v3172_v54 = vsel %vm1793_vm4, %v8040_v52, -inf }
 0x85f   : > { %v5890_v0 = vpop.f32.mrb[64].mxu0 }
 0x860   : > { %v8024_v43 = vadd.f32 %v5890_v0, %v9044_v13  ;;  %v2965_v18 = vpop.f32.mrb[65].mxu0 }
 0x861   : > { %v5891_v40 = vpop.f32.mrb[66].mxu0  ;;  %v8027_v4 = vadd.f32 %v2965_v18, %v9044_v13 }
 0x862   : > { %v2968_v25 = vpop.f32.mrb[67].mxu0  ;;  %v3166_v41 = vsel %vm1793_vm4, %v8024_v43, -inf }
 0x863   : > { %v8032_v11 = vadd.f32 %v2968_v25, %v9044_v13  ;;  %3167 = vmax.xlane.f32.xlu1 %v3166_v41  ;;  %v3160_v59 = vsel %vm1793_vm4, %v8027_v4, -inf }
 0x865   : > { %v3163_v5 = vsel %vm1793_vm4, %v8032_v11, -inf }
 0x866   : > { %3164 = vmax.xlane.f32.xlu0 %v3163_v5 }
 0x867   : > { %3161 = vmax.xlane.f32.xlu1 %v3160_v59 }
 0x86a   : > { %3176 = vmax.xlane.f32.xlu0 %v3175_v39 }
 0x86b   : > { %3173 = vmax.xlane.f32.xlu1 %v3172_v54  ;;  %v8072_v54 = vpop.permute.xlu1 %3583 }
 0x86e   : > { %3170 = vmax.xlane.f32.xlu0 %v3169_v9 }
 0x86f   : > { %v5906_v8 = vpop.f32.mrb[68].mxu0  ;;  %v8074_v9 = vpop.permute.xlu1 %3705 }
 0x870   : > { %v8054_v0 = vadd.f32 %v5906_v8, %v9044_v13  ;;  %v3101_v18 = vpop.f32.mrb[69].mxu0 }
 0x871   : > { %v5907_v40 = vpop.f32.mrb[70].mxu0  ;;  %v8057_v6 = vadd.f32 %v3101_v18, %v9044_v13 }
 0x872   : > { %v3104_v25 = vpop.f32.mrb[71].mxu0  ;;  %v3184_v41 = vsel %vm1793_vm4, %v8054_v0, -inf }
 0x873   : > { %v8062_v5 = vadd.f32 %v3104_v25, %v9044_v13  ;;  %3185 = vmax.xlane.f32.xlu1 %v3184_v41  ;;  %v3178_v39 = vsel %vm1793_vm4, %v8057_v6, -inf  ;;  %v8076_v13 = vpop.permute.xlu0 %3521  ;;  %v8078_v8 = vpop.permute.xlu1 %3645 }
 0x875   : > { %v3181_v59 = vsel %vm1793_vm4, %v8062_v5, -inf }
 0x876   : > { %3182 = vmax.xlane.f32.xlu0 %v3181_v59 }
 0x877   : > { %3179 = vmax.xlane.f32.xlu1 %v3178_v39  ;;  %v8080_v18 = vpop.permute.xlu0 %3643  ;;  %v8082_v40 = vpop.permute.xlu1 %3707 }
 0x888   : > { %3769 = vrot.lane.b32.xlu1 %v7313_v60, %s6624_s30 }
 0x88c   : > { %3767 = vrot.lane.b32.xlu0 %v7299_v7, %s6624_s30 }
 0x8b5   : > { %v3123_v25 = vpop.xlane.xlu0 %3122 }
 0x8b6   : > { %v3189_v41 = vsub.f32 %v7943_v22, %v3123_v25 }
 0x8b8   : > { %v3215_v59 = vmul.f32 1.442695, %v3189_v41  ;;  %v3120_v60 = vpop.xlane.xlu1 %3119 }
 0x8b9   : > { %v3188_v39 = vsub.f32 %v7951_v19, %v3120_v60  ;;  %v3117_v7 = vpop.xlane.xlu0 %3116 }
 0x8ba   : > { %6369 = vpow2.f32 %v3215_v59  ;;  %v3187_v44 = vsub.f32 %v7946_v45, %v3117_v7 }
 0x8bb   : > { %v3213_v37 = vmul.f32 1.442695, %v3188_v39 }
 0x8bc   : > { %v3211_v51 = vmul.f32 1.442695, %v3187_v44 }
 0x8bd   : > { %6371 = vpow2.f32 %v3213_v37 }
 0x8be   : > { %6373 = vpow2.f32 %v3211_v51 }
 0x8c4   : > { %v8087_v30 = vpop.eup %6369 }
 0x8c5   : > { %v3265_v17 = vsel %vm1793_vm4, %v8087_v30, 0.0 }
 0x8c6   : > { %3266 = vadd.xlane.f32.xlu0 %v3265_v17 }
 0x8c7   : > { %v8091_v29 = vpop.eup %6371 }
 0x8c8   : > { %v8093_v22 = vpop.eup %6373  ;;  %v3262_v19 = vsel %vm1793_vm4, %v8091_v29, 0.0 }
 0x8c9   : > { %3263 = vadd.xlane.f32.xlu1 %v3262_v19  ;;  %v3259_v45 = vsel %vm1793_vm4, %v8093_v22, 0.0 }
 0x8ca   : > { %3260 = vadd.xlane.f32.xlu0 %v3259_v45 }
 0x8d0   : > { %v3132_v37 = vpop.xlane.xlu1 %3131 }
 0x8d1   : > { %v3192_v51 = vsub.f32 %v7964_v50, %v3132_v37  ;;  %v3126_v44 = vpop.xlane.xlu0 %3125 }
 0x8d2   : > { %v3190_v25 = vsub.f32 %v7967_v46, %v3126_v44 }
 0x8d3   : > { %v3221_v41 = vmul.f32 1.442695, %v3192_v51 }
 0x8d4   : > { %v3217_v17 = vmul.f32 1.442695, %v3190_v25  ;;  %v3138_v59 = vpop.xlane.xlu1 %3137 }
 0x8d5   : > { %6375 = vpow2.f32 %v3221_v41  ;;  %v3194_v60 = vsub.f32 %v7970_v61, %v3138_v59  ;;  %v3129_v39 = vpop.xlane.xlu0 %3128 }
 0x8d6   : > { %v3191_v7 = vsub.f32 %v7975_v1, %v3129_v39  ;;  %6377 = vpow2.f32 %v3217_v17 }
 0x8d7   : > { %v3225_v19 = vmul.f32 1.442695, %v3194_v60 }
 0x8d8   : > { %v3219_v56 = vmul.f32 1.442695, %v3191_v7 }
 0x8d9   : > { %v3141_v14 = vpop.xlane.xlu0 %3140 }
 0x8da   : > { %6379 = vpow2.f32 %v3219_v56  ;;  %v3195_v45 = vsub.f32 %v7982_v2, %v3141_v14 }
 0x8db   : > { %6381 = vpow2.f32 %v3225_v19 }
 0x8dc   : > { %v3227_v50 = vmul.f32 1.442695, %v3195_v45 }
 0x8dd   : > { %v3135_v37 = vpop.xlane.xlu0 %3134 }
 0x8de   : > { %6383 = vpow2.f32 %v3227_v50  ;;  %v3193_v46 = vsub.f32 %v7987_v3, %v3135_v37 }
 0x8df   : > { %v8105_v51 = vpop.eup %6375 }
 0x8e0   : > { %v3223_v44 = vmul.f32 1.442695, %v3193_v46  ;;  %v3150_v61 = vpop.xlane.xlu1 %3149  ;;  %v3274_v1 = vsel %vm1793_vm4, %v8105_v51, 0.0  ;;  %v8109_v25 = vpop.eup %6377 }
 0x8e1   : > { %v3198_v41 = vsub.f32 %v7994_v57, %v3150_v61  ;;  %3275 = vadd.xlane.f32.xlu1 %v3274_v1  ;;  %v3268_v59 = vsel %vm1793_vm4, %v8109_v25, 0.0 }
 0x8e2   : > { %6385 = vpow2.f32 %v3223_v44 }
 0x8e3   : > { %v3233_v14 = vmul.f32 1.442695, %v3198_v41  ;;  %v3147_v56 = vpop.xlane.xlu0 %3146 }
 0x8e4   : > { %v8112_v2 = vpop.eup %6379  ;;  %v3197_v17 = vsub.f32 %v8002_v31, %v3147_v56  ;;  %v3144_v3 = vpop.xlane.xlu1 %3143 }
 0x8e5   : > { %v8117_v60 = vpop.eup %6381  ;;  %6387 = vpow2.f32 %v3233_v14  ;;  %v3196_v39 = vsub.f32 %v7997_v62, %v3144_v3  ;;  %3269 = vadd.xlane.f32.xlu1 %v3268_v59  ;;  %v3271_v57 = vsel %vm1793_vm4, %v8112_v2, 0.0 }
 0x8e6   : > { %v3231_v7 = vmul.f32 1.442695, %v3197_v17  ;;  %3272 = vadd.xlane.f32.xlu0 %v3271_v57  ;;  %v3280_v46 = vsel %vm1793_vm4, %v8117_v60, 0.0 }
 0x8e7   : > { %v3229_v19 = vmul.f32 1.442695, %v3196_v39  ;;  %v3159_v45 = vpop.xlane.xlu0 %3158 }
 0x8e8   : > { %v8122_v50 = vpop.eup %6383  ;;  %6389 = vpow2.f32 %v3231_v7  ;;  %v3201_v31 = vsub.f32 %v8005_v28, %v3159_v45  ;;  %v3156_v37 = vpop.xlane.xlu1 %3155 }
 0x8e9   : > { %6391 = vpow2.f32 %v3229_v19  ;;  %3281 = vadd.xlane.f32.xlu1 %v3280_v46  ;;  %v3283_v62 = vsel %vm1793_vm4, %v8122_v50, 0.0  ;;  %v3200_v61 = vsub.f32 %v8010_v10, %v3156_v37 }
 0x8ea   : > { %v3239_v44 = vmul.f32 1.442695, %v3201_v31  ;;  %3284 = vadd.xlane.f32.xlu0 %v3283_v62 }
 0x8eb   : > { %v3153_v1 = vpop.xlane.xlu0 %3152  ;;  %v3237_v3 = vmul.f32 1.442695, %v3200_v61 }
 0x8ec   : > { %v8130_v41 = vpop.eup %6385  ;;  %6393 = vpow2.f32 %v3239_v44  ;;  %v3199_v14 = vsub.f32 %v8015_v42, %v3153_v1 }
 0x8ed   : > { %v3277_v28 = vsel %vm1793_vm4, %v8130_v41, 0.0 }
 0x8ee   : > { %v3235_v56 = vmul.f32 1.442695, %v3199_v14  ;;  %3278 = vadd.xlane.f32.xlu0 %v3277_v28 }
 0x8ef   : > { %v8135_v17 = vpop.eup %6387 }
 0x8f0   : > { %6395 = vpow2.f32 %v3235_v56  ;;  %v3168_v59 = vpop.xlane.xlu1 %3167  ;;  %v3292_v39 = vsel %vm1793_vm4, %v8135_v17, 0.0 }
 0x8f1   : > { %v3204_v10 = vsub.f32 %v8024_v43, %v3168_v59  ;;  %3293 = vadd.xlane.f32.xlu1 %v3292_v39  ;;  %6397 = vpow2.f32 %v3237_v3 }
 0x8f2   : > { %v8140_v57 = vpop.eup %6389 }
 0x8f3   : > { %v8142_v7 = vpop.eup %6391  ;;  %v3245_v42 = vmul.f32 1.442695, %v3204_v10  ;;  %v3165_v19 = vpop.xlane.xlu0 %3164  ;;  %v3289_v45 = vsel %vm1793_vm4, %v8140_v57, 0.0 }
 0x8f4   : > { %v3203_v31 = vsub.f32 %v8032_v11, %v3165_v19  ;;  %v3162_v37 = vpop.xlane.xlu1 %3161  ;;  %3290 = vadd.xlane.f32.xlu0 %v3289_v45  ;;  %v3286_v46 = vsel %vm1793_vm4, %v8142_v7, 0.0 }
 0x8f5   : > { %6399 = vpow2.f32 %v3245_v42  ;;  %v3202_v43 = vsub.f32 %v8027_v4, %v3162_v37  ;;  %3287 = vadd.xlane.f32.xlu1 %v3286_v46 }
 0x8f6   : > { %v8150_v62 = vpop.eup %6393  ;;  %v3243_v44 = vmul.f32 1.442695, %v3203_v31 }
 0x8f7   : > { %v3241_v61 = vmul.f32 1.442695, %v3202_v43  ;;  %v3177_v1 = vpop.xlane.xlu0 %3176  ;;  %v3301_v14 = vsel %vm1793_vm4, %v8150_v62, 0.0 }
 0x8f8   : > { %6401 = vpow2.f32 %v3243_v44  ;;  %v3207_v11 = vsub.f32 %v8035_v16, %v3177_v1  ;;  %v3174_v28 = vpop.xlane.xlu1 %3173 }
 0x8f9   : > { %6403 = vpow2.f32 %v3241_v61  ;;  %v3206_v56 = vsub.f32 %v8040_v52, %v3174_v28  ;;  %3302 = vadd.xlane.f32.xlu1 %v3301_v14 }
 0x8fa   : > { %v8156_v3 = vpop.eup %6395  ;;  %v3251_v4 = vmul.f32 1.442695, %v3207_v11 }
 0x8fb   : > { %v3249_v59 = vmul.f32 1.442695, %v3206_v56  ;;  %v3171_v39 = vpop.xlane.xlu0 %3170  ;;  %v3295_v10 = vsel %vm1793_vm4, %v8156_v3, 0.0  ;;  %v8161_v19 = vpop.eup %6397 }
 0x8fc   : > { %6405 = vpow2.f32 %v3251_v4  ;;  %v3205_v42 = vsub.f32 %v8045_v35, %v3171_v39  ;;  %v3298_v37 = vsel %vm1793_vm4, %v8161_v19, 0.0 }
 0x8fd   : > { %3296 = vadd.xlane.f32.xlu1 %v3295_v10  ;;  %6407 = vpow2.f32 %v3249_v59 }
 0x8fe   : > { %v3247_v16 = vmul.f32 1.442695, %v3205_v42 }
 0x8ff   : > { %v8163_v45 = vpop.eup %6399 }
 0x900   : > { %6409 = vpow2.f32 %v3247_v16  ;;  %v3186_v52 = vpop.xlane.xlu1 %3185  ;;  %v3310_v31 = vsel %vm1793_vm4, %v8163_v45, 0.0 }
 0x901   : > { %v3210_v46 = vsub.f32 %v8054_v0, %v3186_v52  ;;  %3311 = vadd.xlane.f32.xlu0 %v3310_v31  ;;  %3299 = vadd.xlane.f32.xlu1 %v3298_v37 }
 0x902   : > { %v8170_v35 = vpop.eup %6401 }
 0x903   : > { %v8172_v43 = vpop.eup %6403  ;;  %v3257_v44 = vmul.f32 1.442695, %v3210_v46  ;;  %v3183_v61 = vpop.xlane.xlu0 %3182  ;;  %v3307_v1 = vsel %vm1793_vm4, %v8170_v35, 0.0 }
 0x904   : > { %v3209_v14 = vsub.f32 %v8062_v5, %v3183_v61  ;;  %v3180_v11 = vpop.xlane.xlu1 %3179  ;;  %v3304_v28 = vsel %vm1793_vm4, %v8172_v43, 0.0 }
 0x905   : > { %6411 = vpow2.f32 %v3257_v44  ;;  %v3208_v0 = vsub.f32 %v8057_v6, %v3180_v11  ;;  %3305 = vadd.xlane.f32.xlu0 %v3304_v28  ;;  %3308 = vadd.xlane.f32.xlu1 %v3307_v1 }
 0x906   : > { %v8180_v56 = vpop.eup %6405  ;;  %v3255_v4 = vmul.f32 1.442695, %v3209_v14 }
 0x907   : > { %v3253_v59 = vmul.f32 1.442695, %v3208_v0  ;;  %v3319_v39 = vsel %vm1793_vm4, %v8180_v56, 0.0  ;;  %v8184_v10 = vpop.eup %6407  ;;  %v8208_v61 = vpop.permute.xlu0 %3767 }
 0x908   : > { %6413 = vpow2.f32 %v3255_v4  ;;  %v3316_v6 = vsel %vm1793_vm4, %v8184_v10, 0.0  ;;  %v8210_v1 = vpop.permute.xlu1 %3769 }
 0x909   : > { %6415 = vpow2.f32 %v3253_v59  ;;  %3320 = vadd.xlane.f32.xlu0 %v3319_v39 }
 0x90a   : > { %v8186_v5 = vpop.eup %6409 }
 0x90b   : > { %v3313_v42 = vsel %vm1793_vm4, %v8186_v5, 0.0 }
 0x90c   : > { %3314 = vadd.xlane.f32.xlu1 %v3313_v42 }
 0x90d   : > { %3317 = vadd.xlane.f32.xlu0 %v3316_v6 }
 0x90f   : > { %v8192_v16 = vpop.eup %6411 }
 0x910   : > { %v3328_v52 = vsel %vm1793_vm4, %v8192_v16, 0.0 }
 0x911   : > { %3329 = vadd.xlane.f32.xlu0 %v3328_v52  ;;  %v3531_v52 = vsel %vm2085_vm2, %v8076_v13, 0 }
 0x912   : > { %v8196_v31 = vpop.eup %6413 }
 0x913   : > { %v8198_v37 = vpop.eup %6415  ;;  %v3325_v46 = vsel %vm1793_vm4, %v8196_v31, 0.0 }
 0x914   : > { %v3322_v44 = vsel %vm1793_vm4, %v8198_v37, 0.0 }
 0x915   : > { %3323 = vadd.xlane.f32.xlu1 %v3322_v44  ;;  %3326 = vadd.xlane.f32.xlu0 %v3325_v46 }
 0x926   : > { %3831 = vrot.lane.b32.xlu1 %v7321_v55, %s6624_s30 }
 0x92b   : > { %3829 = vrot.lane.b32.xlu0 %v7317_v38, %s6624_s30  ;;  %s5292_s30 = sshll.u32 %s5285_s28, 3 }
 0x92c   : > { %p305_p4 = scmp.lt.s32.totalorder %s5292_s30, 15 }
 0x92e   : > { %s9077_s30 = smov (!%p305_p4, %s5292_s30), 15 }
 0x953   : > { %v3267_v14 = vpop.xlane.xlu0 %3266 }
 0x954   : > { %6417 = vrcp.f32 %v3267_v14 }
 0x956   : > { %v3264_v11 = vpop.xlane.xlu1 %3263 }
 0x957   : > { %6419 = vrcp.f32 %v3264_v11  ;;  %v3261_v28 = vpop.xlane.xlu0 %3260 }
 0x958   : > { %6421 = vrcp.f32 %v3261_v28 }
 0x95e   : > { %v6418_v0 = vpop.eup %6417 }
 0x95f   : > { %v3357_v39 = vmul.f32 %v6418_v0, %v8087_v30 }
 0x961   : > { %v6420_v4 = vpop.eup %6419  ;;  %v3380_v6 = vpack.c.bf16 %v3357_v39, %v3357_v39 }
 0x962   : > { %v6422_v59 = vpop.eup %6421  ;;  %v3356_v55 = vmul.f32 %v6420_v4, %v8091_v29 }
 0x963   : > { %v3355_v42 = vmul.f32 %v6422_v59, %v8093_v22 }
 0x965   : > { %v3379_v38 = vpack.c.bf16 %v3356_v55, %v3355_v42 }
 0x967   : > { %5912 = vmatprep.mubr.msk.bf16.mxu1 %vm1793_vm4, %v3379_v38 }
 0x968   : > { %5913 = vmatmul.mubr.msk.bf16.vlgmr.msra.gmra.mrb[64].mxu1 %vm1793_vm4, %v3380_v6 }
 0x969   : > { %5925 = vmatpush3.bf16.msra.mxu1 %v7890_v63 }
 0x96a   : > { %6106 = vmatprep.subr.msk.bf16.mxu1 %vm2085_vm2, %v8076_v13 }
 0x96d   : > { %5927 = vmatpush3.bf16.msra.mxu1 %v3531_v52 }
 0x96e   : > { %v3276_v30 = vpop.xlane.xlu1 %3275  ;;  %5940 = vmatprep.subr.bf16.mxu1 %v8080_v18 }
 0x96f   : > { %6423 = vrcp.f32 %v3276_v30 }
 0x972   : > { %v3270_v29 = vpop.xlane.xlu1 %3269 }
 0x973   : > { %6425 = vrcp.f32 %v3270_v29  ;;  %v3273_v22 = vpop.xlane.xlu0 %3272 }
 0x974   : > { %6427 = vrcp.f32 %v3273_v22  ;;  %v3593_v22 = vsel %vm2085_vm2, %v8072_v54, 0 }
 0x976   : > { %v3282_v46 = vpop.xlane.xlu1 %3281 }
 0x977   : > { %v3285_v44 = vpop.xlane.xlu0 %3284 }
 0x978   : > { %6429 = vrcp.f32 %v3285_v44 }
 0x979   : > { %6431 = vrcp.f32 %v3282_v46  ;;  %v6424_v63 = vpop.eup %6423 }
 0x97a   : > { %v3360_v13 = vmul.f32 %v6424_v63, %v8105_v51 }
 0x97b   : > { %v3279_v14 = vpop.xlane.xlu0 %3278 }
 0x97c   : > { %6433 = vrcp.f32 %v3279_v14  ;;  %v3382_v38 = vpack.c.bf16 %v3360_v13, %v3360_v13  ;;  %v3655_v13 = vsel %vm2085_vm2, %v8078_v8, 0 }
 0x97d   : > { %v6426_v11 = vpop.eup %6425 }
 0x97e   : > { %v6428_v28 = vpop.eup %6427  ;;  %v3294_v0 = vpop.xlane.xlu1 %3293  ;;  %v3358_v4 = vmul.f32 %v6426_v11, %v8109_v25 }
 0x97f   : > { %v3359_v59 = vmul.f32 %v6428_v28, %v8112_v2  ;;  %6435 = vrcp.f32 %v3294_v0 }
 0x981   : > { %v3291_v39 = vpop.xlane.xlu0 %3290  ;;  %v3381_v55 = vpack.c.bf16 %v3359_v59, %v3358_v4  ;;  %v3717_v59 = vsel %vm2085_vm2, %v8082_v40, 0 }
 0x982   : > { %6437 = vrcp.f32 %v3291_v39  ;;  %v3288_v42 = vpop.xlane.xlu1 %3287  ;;  %v6430_v6 = vpop.eup %6429 }
 0x983   : > { %6439 = vrcp.f32 %v3288_v42  ;;  %5920 = vmatprep.mubr.msk.bf16.mxu0 %vm1793_vm4, %v3381_v55  ;;  %v6432_v52 = vpop.eup %6431  ;;  %v3363_v25 = vmul.f32 %v6430_v6, %v8122_v50 }
 0x984   : > { %5921 = vmatmul.mubr.msk.bf16.vlgmr.msra.gmra.mrb[72].mxu0 %vm1793_vm4, %v3382_v38  ;;  %v3362_v29 = vmul.f32 %v6432_v52, %v8117_v60 }
 0x985   : > { %5933 = vmatpush3.bf16.msra.mxu0 %v7897_v15  ;;  %v3384_v63 = vpack.c.bf16 %v3363_v25, %v3363_v25 }
 0x986   : > { %v6434_v51 = vpop.eup %6433  ;;  %6107 = vmatprep.subr.msk.bf16.mxu0 %vm2085_vm2, %v8072_v54  ;;  %v3303_v2 = vpop.xlane.xlu1 %3302 }
 0x987   : > { %v3361_v30 = vmul.f32 %v6434_v51, %v8130_v41  ;;  %6441 = vrcp.f32 %v3303_v2 }
 0x989   : > { %5935 = vmatpush3.bf16.msra.mxu0 %v3593_v22  ;;  %v3383_v46 = vpack.c.bf16 %v3362_v29, %v3361_v30  ;;  %v6436_v44 = vpop.eup %6435 }
 0x98a   : > { %5948 = vmatprep.subr.bf16.mxu0 %v8074_v9  ;;  %v3297_v15 = vpop.xlane.xlu1 %3296  ;;  %v3366_v41 = vmul.f32 %v6436_v44, %v8135_v17 }
 0x98b   : > { %5928 = vmatprep.mubr.msk.bf16.mxu1 %vm1793_vm4, %v3383_v46  ;;  %6443 = vrcp.f32 %v3297_v15  ;;  %v3779_v15 = vsel %vm2085_vm2, %v8210_v1, 0 }
 0x98c   : > { %v6438_v50 = vpop.eup %6437  ;;  %5929 = vmatmul.mubr.msk.bf16.vlgmr.msra.gmra.mrb[68].mxu1 %vm1793_vm4, %v3384_v63  ;;  %v3386_v17 = vpack.c.bf16 %v3366_v41, %v3366_v41 }
 0x98d   : > { %v6440_v14 = vpop.eup %6439  ;;  %5941 = vmatpush3.bf16.msra.mxu1 %v8080_v18  ;;  %v3365_v54 = vmul.f32 %v6438_v50, %v8140_v57 }
 0x98e   : > { %6108 = vmatprep.subr.msk.bf16.mxu1 %vm2085_vm2, %v8078_v8  ;;  %v3300_v60 = vpop.xlane.xlu1 %3299  ;;  %v3312_v11 = vpop.xlane.xlu0 %3311  ;;  %v3364_v28 = vmul.f32 %v6440_v14, %v8142_v7 }
 0x98f   : > { %6445 = vrcp.f32 %v3300_v60 }
 0x990   : > { %v3385_v0 = vpack.c.bf16 %v3365_v54, %v3364_v28  ;;  %6447 = vrcp.f32 %v3312_v11 }
 0x991   : > { %5943 = vmatpush3.bf16.msra.mxu1 %v3655_v13  ;;  %v6442_v8 = vpop.eup %6441 }
 0x992   : > { %5956 = vmatprep.subr.bf16.mxu1 %v8208_v61  ;;  %v3309_v18 = vpop.xlane.xlu1 %3308  ;;  %5936 = vmatprep.mubr.msk.bf16.mxu0 %vm1793_vm4, %v3385_v0  ;;  %v3306_v57 = vpop.xlane.xlu0 %3305  ;;  %v3369_v55 = vmul.f32 %v6442_v8, %v8150_v62 }
 0x993   : > { %6449 = vrcp.f32 %v3309_v18  ;;  %5937 = vmatmul.mubr.msk.bf16.vlgmr.msra.gmra.mrb[76].mxu0 %vm1793_vm4, %v3386_v17  ;;  %v6197_v18 = vld [vmem:[%s8988_s5] sm:$0xff]  }
 0x994   : > { %6451 = vrcp.f32 %v3306_v57  ;;  %5949 = vmatpush3.bf16.msra.mxu0 %v8074_v9  ;;  %v3388_v2 = vpack.c.bf16 %v3369_v55, %v3369_v55 }
 0x995   : > { %6109 = vmatprep.subr.msk.bf16.mxu0 %vm2085_vm2, %v8082_v40  ;;  %v6444_v4 = vpop.eup %6443 }
 0x996   : > { %v3321_v7 = vpop.xlane.xlu0 %3320  ;;  %v3367_v6 = vmul.f32 %v6444_v4, %v8156_v3 }
 0x997   : > { %6453 = vrcp.f32 %v3321_v7 }
 0x998   : > { %5951 = vmatpush3.bf16.msra.mxu0 %v3717_v59 }
 0x999   : > { %v6446_v39 = vpop.eup %6445  ;;  %v3315_v42 = vpop.xlane.xlu1 %3314 }
 0x99a   : > { %6455 = vrcp.f32 %v3315_v42  ;;  %v3318_v38 = vpop.xlane.xlu0 %3317  ;;  %v3368_v9 = vmul.f32 %v6446_v39, %v8161_v19  ;;  %v6448_v52 = vpop.eup %6447 }
 0x99b   : > { %6457 = vrcp.f32 %v3318_v38  ;;  %v3372_v40 = vmul.f32 %v6448_v52, %v8163_v45 }
 0x99c   : > { %v3387_v51 = vpack.c.bf16 %v3368_v9, %v3367_v6 }
 0x99d   : > { %v6450_v25 = vpop.eup %6449  ;;  %v3390_v45 = vpack.c.bf16 %v3372_v40, %v3372_v40 }
 0x99e   : > { %v6452_v30 = vpop.eup %6451  ;;  %5944 = vmatprep.mubr.msk.bf16.mxu1 %vm1793_vm4, %v3387_v51  ;;  %v3330_v29 = vpop.xlane.xlu0 %3329  ;;  %v3371_v62 = vmul.f32 %v6450_v25, %v8170_v35 }
 0x99f   : > { %5945 = vmatmul.mubr.msk.bf16.vlgmr.msra.gmra.mrb[72].mxu1 %vm1793_vm4, %v3388_v2  ;;  %v3370_v22 = vmul.f32 %v6452_v30, %v8172_v43  ;;  %6459 = vrcp.f32 %v3330_v29 }
 0x9a0   : > { %5957 = vmatpush3.bf16.msra.mxu1 %v8208_v61 }
 0x9a1   : > { %6110 = vmatprep.subr.msk.bf16.mxu1 %vm2085_vm2, %v8210_v1  ;;  %v3389_v3 = vpack.c.bf16 %v3371_v62, %v3370_v22  ;;  %v6454_v19 = vpop.eup %6453 }
 0x9a2   : > { %v3324_v46 = vpop.xlane.xlu1 %3323  ;;  %v3327_v44 = vpop.xlane.xlu0 %3326  ;;  %v3375_v61 = vmul.f32 %v6454_v19, %v8180_v56 }
 0x9a3   : > { %6461 = vrcp.f32 %v3324_v46  ;;  %5952 = vmatprep.mubr.msk.bf16.mxu0 %vm1793_vm4, %v3389_v3 }
 0x9a4   : > { %v6456_v35 = vpop.eup %6455  ;;  %6463 = vrcp.f32 %v3327_v44  ;;  %5953 = vmatmul.mubr.msk.bf16.vlgmr.msra.gmra.mrb[80].mxu0 %vm1793_vm4, %v3390_v45  ;;  %5959 = vmatpush3.bf16.msra.mxu1 %v3779_v15  ;;  %v3392_v54 = vpack.c.bf16 %v3375_v61, %v3375_v61 }
 0x9a5   : > { %v6458_v43 = vpop.eup %6457  ;;  %v3373_v63 = vmul.f32 %v6456_v35, %v8186_v5  ;;  %5972 = vmatprep.subr.bf16.mxu1 %v6197_v18 }
 0x9a6   : > { %v3830_v50 = vpop.permute.xlu0 %3829  ;;  %v3374_v14 = vmul.f32 %v6458_v43, %v8184_v10  ;;  %v3832_v41 = vpop.permute.xlu1 %3831 }
 0x9a7   : > { %5964 = vmatprep.subr.bf16.mxu0 %v3830_v50  ;;  %v3841_v11 = vsel %vm2085_vm2, %v3832_v41, 0 }
 0x9a8   : > { %5965 = vmatpush3.bf16.msra.mxu0 %v3830_v50  ;;  %v3391_v1 = vpack.c.bf16 %v3374_v14, %v3373_v63 }
 0x9a9   : > { %6111 = vmatprep.subr.msk.bf16.mxu0 %vm2085_vm2, %v3832_v41  ;;  %v6460_v60 = vpop.eup %6459 }
 0x9aa   : > { %5960 = vmatprep.mubr.msk.bf16.mxu1 %vm1793_vm4, %v3391_v1  ;;  %v3378_v28 = vmul.f32 %v6460_v60, %v8192_v16 }
 0x9ab   : > { %5961 = vmatmul.mubr.msk.bf16.vlgmr.msra.gmra.mrb[76].mxu1 %vm1793_vm4, %v3392_v54 }
 0x9ac   : > { %5967 = vmatpush3.bf16.msra.mxu0 %v3841_v11  ;;  %v3394_v17 = vpack.c.bf16 %v3378_v28, %v3378_v28  ;;  %5973 = vmatpush3.bf16.msra.mxu1 %v6197_v18 }
 0x9ad   : > { %v6462_v56 = vpop.eup %6461 }
 0x9ae   : > { %v6464_v5 = vpop.eup %6463  ;;  %v3376_v10 = vmul.f32 %v6462_v56, %v8198_v37 }
 0x9af   : > { %v3377_v13 = vmul.f32 %v6464_v5, %v8196_v31  ;;  %v6198_v31 = vld [vmem:[%s8988_s5 + $0x8] sm:$0xff]  }
 0x9b0   : > { %5974 = vmatprep.subr.bf16.mxu1 %v6198_v31 }
 0x9b1   : > { %v3393_v0 = vpack.c.bf16 %v3377_v13, %v3376_v10  ;;  %5975 = vmatpush3.bf16.msra.mxu1 %v6198_v31 }
 0x9b3   : > { %5968 = vmatprep.mubr.msk.bf16.mxu0 %vm1793_vm4, %v3393_v0 }
 0x9b4   : > { %5969 = vmatmul.mubr.msk.bf16.vlgmr.msra.gmra.mrb[84].mxu0 %vm1793_vm4, %v3394_v17 }
 0xa3b   : > { %v5914_v57 = vpop.f32.mrb[64].mxu1 }
 0xa3c   : > { %v3443_v8 = vpop.f32.mrb[65].mxu1 }
 0xa3d   : > { %v5915_v7 = vpop.f32.mrb[66].mxu1 }
 0xa3e   : > { %v3446_v16 = vpop.f32.mrb[67].mxu1 }
 0xa3f   : > { %v6127_v4 = vpack.i.bf16 %v3446_v16, %v3443_v8 }
 0xa41   : > { %6128 = vrot.lane.b32.xlu0 %v6127_v4, %s6625_s11 }
 0xa57   : > { %v5922_v37 = vpop.f32.mrb[72].mxu0 }
 0xa58   : > { %v3505_v59 = vpop.f32.mrb[73].mxu0 }
 0xa59   : > { %v6132_v39 = vpack.i.bf16 %v3505_v59, %v5914_v57  ;;  %v5923_v55 = vpop.f32.mrb[74].mxu0 }
 0xa5a   : > { %v3508_v42 = vpop.f32.mrb[75].mxu0 }
 0xa5b   : > { %v6137_v38 = vpack.i.bf16 %v5922_v37, %v3508_v42  ;;  %6133 = vrot.lane.b32.xlu1 %v6132_v39, %s6625_s11 }
 0xa5d   : > { %6138 = vrot.lane.b32.xlu0 %v6137_v38, %s6625_s11 }
 0xa5f   : > { %v5930_v6 = vpop.f32.mrb[68].mxu1 }
 0xa60   : > { %v3567_v9 = vpop.f32.mrb[69].mxu1 }
 0xa61   : > { %v5931_v52 = vpop.f32.mrb[70].mxu1 }
 0xa62   : > { %v3570_v51 = vpop.f32.mrb[71].mxu1 }
 0xa63   : > { %v6142_v25 = vpack.i.bf16 %v3570_v51, %v3567_v9 }
 0xa65   : > { %6143 = vrot.lane.b32.xlu1 %v6142_v25, %s6625_s11 }
 0xa66   : > { %v5938_v2 = vpop.f32.mrb[76].mxu0 }
 0xa67   : > { %v3629_v30 = vpop.f32.mrb[77].mxu0 }
 0xa68   : > { %v6147_v40 = vpack.i.bf16 %v3629_v30, %v5930_v6  ;;  %v5939_v29 = vpop.f32.mrb[78].mxu0 }
 0xa69   : > { %v3632_v62 = vpop.f32.mrb[79].mxu0 }
 0xa6a   : > { %v6152_v22 = vpack.i.bf16 %v5938_v2, %v3632_v62  ;;  %6148 = vrot.lane.b32.xlu0 %v6147_v40, %s6625_s11 }
 0xa6c   : > { %6153 = vrot.lane.b32.xlu1 %v6152_v22, %s6625_s11 }
 0xa72   : > { %v5946_v3 = vpop.f32.mrb[72].mxu1 }
 0xa73   : > { %v3691_v19 = vpop.f32.mrb[73].mxu1 }
 0xa74   : > { %v5947_v46 = vpop.f32.mrb[74].mxu1 }
 0xa75   : > { %v3694_v44 = vpop.f32.mrb[75].mxu1 }
 0xa76   : > { %v6157_v45 = vpack.i.bf16 %v3694_v44, %v3691_v19 }
 0xa77   : > { %v5954_v15 = vpop.f32.mrb[80].mxu0 }
 0xa78   : > { %v3753_v35 = vpop.f32.mrb[81].mxu0  ;;  %6158 = vrot.lane.b32.xlu0 %v6157_v45, %s6625_s11 }
 0xa79   : > { %v6162_v43 = vpack.i.bf16 %v3753_v35, %v5946_v3  ;;  %v5955_v61 = vpop.f32.mrb[82].mxu0 }
 0xa7a   : > { %v3756_v63 = vpop.f32.mrb[83].mxu0 }
 0xa7b   : > { %v6167_v50 = vpack.i.bf16 %v5954_v15, %v3756_v63  ;;  %6163 = vrot.lane.b32.xlu1 %v6162_v43, %s6625_s11 }
 0xa7d   : > { %6168 = vrot.lane.b32.xlu0 %v6167_v50, %s6625_s11 }
 0xa7e   : > { %v5962_v14 = vpop.f32.mrb[76].mxu1 }
 0xa7f   : > { %v3815_v41 = vpop.f32.mrb[77].mxu1 }
 0xa80   : > { %v5963_v1 = vpop.f32.mrb[78].mxu1 }
 0xa81   : > { %v3818_v54 = vpop.f32.mrb[79].mxu1 }
 0xa82   : > { %v6172_v60 = vpack.i.bf16 %v3818_v54, %v3815_v41 }
 0xa84   : > { %6173 = vrot.lane.b32.xlu1 %v6172_v60, %s6625_s11 }
 0xa87   : > { %v5970_v11 = vpop.f32.mrb[84].mxu0 }
 0xa88   : > { %v3877_v56 = vpop.f32.mrb[85].mxu0 }
 0xa89   : > { %v6177_v5 = vpack.i.bf16 %v3877_v56, %v5962_v14  ;;  %v5971_v28 = vpop.f32.mrb[86].mxu0 }
 0xa8a   : > { %v3880_v10 = vpop.f32.mrb[87].mxu0  ;;  %v9051_v28 = vld [vmem:[#allocation24_spill] sm:$0xff] }
 0xa8b   : > { %v6182_v13 = vpack.i.bf16 %v5970_v11, %v3880_v10  ;;  %6178 = vrot.lane.b32.xlu0 %v6177_v5, %s6625_s11 }
 0xa8d   : > { %6183 = vrot.lane.b32.xlu1 %v6182_v13, %s6625_s11  ;;  %s5453_s11 = sshll.u32 %s9077_s30, 4 }
 0xa8e   : > { %s8915_s28 = scalar_lea.vmem %s8991_s8, %s5453_s11 }
 0xab3   : > { %v6129_v0 = vpop.permute.xlu0 %6128 }
 0xab4   : > { %v6131_v17 = vunpack.i.h.bf16 %v6129_v0  ;;  %v6130_v18 = vunpack.i.l.bf16 %v6129_v0 }
 0xab6   : > { %v3988_v57 = vsel %vm1270_vm1, %v7904_v34, %v6131_v17  ;;  %v3987_v8 = vsel %vm1270_vm1, %v7902_v49, %v6130_v18 }
 0xab7   : > { %v4011_v7 = vpack.c.bf16 %v3988_v57, %v3987_v8  ;;  %v9052_v8 = vld [vmem:[#allocation26_spill] sm:$0xff] }
 0xab9   : > { %5976 = vmatprep.mubr.msk.bf16.mxu1 %vm518_vm0, %v4011_v7 }
 0xacd   : > { %v6134_v16 = vpop.permute.xlu1 %6133 }
 0xace   : > { %v6136_v4 = vunpack.i.h.bf16 %v6134_v16  ;;  %v6135_v31 = vunpack.i.l.bf16 %v6134_v16  ;;  %v9053_v16 = vld [vmem:[#allocation23_spill] sm:$0xff] }
 0xacf   : > { %v6139_v37 = vpop.permute.xlu0 %6138 }
 0xad0   : > { %v3990_v59 = vsel %vm1270_vm1, %v7908_v21, %v6136_v4  ;;  %v3989_v39 = vsel %vm1270_vm1, %v7900_v53, %v6135_v31  ;;  %v6141_v55 = vunpack.i.h.bf16 %v6139_v37  ;;  %v6140_v42 = vunpack.i.l.bf16 %v6139_v37 }
 0xad1   : > { %v4012_v38 = vpack.c.bf16 %v3990_v59, %v3989_v39  ;;  %v9054_v39 = vld [vmem:[#allocation20_spill] sm:$0xff] }
 0xad2   : > { %v3992_v34 = vsel %vm1270_vm1, %v7906_v23, %v6141_v55  ;;  %v3991_v49 = vsel %vm1270_vm1, %v7910_v36, %v6140_v42  ;;  %v9055_v42 = vld [vmem:[#allocation27_spill] sm:$0xff] }
 0xad3   : > { %v4013_v6 = vpack.c.bf16 %v3992_v34, %v3991_v49  ;;  %5977 = vmatmul.mubr.msk.bf16.vlgmr.msra.gmra.mrb[80].mxu1 %vm518_vm0, %v4012_v38  ;;  %v9056_v49 = vld [vmem:[#allocation19_spill] sm:$0xff] }
 0xad5   : > { %5980 = vmatprep.mubr.msk.bf16.mxu1 %vm518_vm0, %v4013_v6  ;;  %v4029_v6 = vsub.s32 3, %v9056_v49 }
 0xad7   : > { %v6144_v9 = vpop.permute.xlu1 %6143 }
 0xad8   : > { %v6146_v52 = vunpack.i.h.bf16 %v6144_v9  ;;  %v6145_v21 = vunpack.i.l.bf16 %v6144_v9  ;;  %v8364_v9 = vld [vmem:[%s8986_s3] sm:$0xff] }
 0xada   : > { %v3994_v53 = vsel %vm1270_vm1, %v7916_v58, %v6146_v52  ;;  %v3993_v51 = vsel %vm1270_vm1, %v7914_v27, %v6145_v21  ;;  %v8367_v52 = vrot.slane %v8364_v9, %v4029_v6 }
 0xadb   : > { %v4014_v25 = vpack.c.bf16 %v3994_v53, %v3993_v51 }
 0xadc   : > { %v6149_v2 = vpop.permute.xlu0 %6148 }
 0xadd   : > { %v6151_v23 = vunpack.i.h.bf16 %v6149_v2  ;;  %v6150_v30 = vunpack.i.l.bf16 %v6149_v2  ;;  %5981 = vmatmul.mubr.msk.bf16.gmra.mrb[84].mxu1 %vm518_vm0, %v4014_v25 }
 0xade   : > { %v6154_v36 = vpop.permute.xlu1 %6153 }
 0xadf   : > { %v3996_v40 = vsel %vm1270_vm1, %v7920_v24, %v6151_v23  ;;  %v3995_v29 = vsel %vm1270_vm1, %v7912_v33, %v6150_v30  ;;  %v6156_v62 = vunpack.i.h.bf16 %v6154_v36  ;;  %v6155_v22 = vunpack.i.l.bf16 %v6154_v36  ;;  %v9057_v30 = vld [vmem:[#allocation2_spill] sm:$0xff] }
 0xae0   : > { %v4015_v3 = vpack.c.bf16 %v3996_v40, %v3995_v29  ;;  %v9058_v29 = vld [vmem:[#allocation3_spill] sm:$0xff] }
 0xae1   : > { %v3998_v58 = vsel %vm1270_vm1, %v7918_v32, %v6156_v62  ;;  %v3997_v27 = vsel %vm1270_vm1, %v7922_v47, %v6155_v22 }
 0xae2   : > { %v4016_v19 = vpack.c.bf16 %v3998_v58, %v3997_v27  ;;  %5984 = vmatprep.mubr.msk.bf16.mxu1 %vm518_vm0, %v4015_v3  ;;  %v9059_v3 = vld [vmem:[#allocation4_spill] sm:$0xff] }
 0xae5   : > { %5985 = vmatmul.mubr.msk.bf16.gmra.mrb[88].mxu1 %vm518_vm0, %v4016_v19 }
 0xaea   : > { %v6159_v46 = vpop.permute.xlu0 %6158 }
 0xaeb   : > { %v6161_v44 = vunpack.i.h.bf16 %v6159_v46  ;;  %v6160_v24 = vunpack.i.l.bf16 %v6159_v46  ;;  %v9060_v46 = vld [vmem:[#allocation6_spill] sm:$0xff] }
 0xaed   : > { %v4000_v33 = vsel %vm1270_vm1, %v7928_v48, %v6161_v44  ;;  %v3999_v45 = vsel %vm1270_vm1, %v7926_v26, %v6160_v24  ;;  %v6164_v15 = vpop.permute.xlu1 %6163  ;;  %v9048_v48 = vld [vmem:[#allocation21_spill] sm:$0xff]  ;;  %v9049_v26 = vld [vmem:[#allocation22_spill] sm:$0xff] }
 0xaee   : > { %v4017_v35 = vpack.c.bf16 %v4000_v33, %v3999_v45  ;;  %v6166_v32 = vunpack.i.h.bf16 %v6164_v15  ;;  %v6165_v43 = vunpack.i.l.bf16 %v6164_v15 }
 0xaef   : > { %v6169_v61 = vpop.permute.xlu0 %6168 }
 0xaf0   : > { %v4002_v47 = vsel %vm1270_vm1, %v7932_v20, %v6166_v32  ;;  %v4001_v63 = vsel %vm1270_vm1, %v7924_v12, %v6165_v43  ;;  %v6171_v50 = vunpack.i.h.bf16 %v6169_v61  ;;  %v6170_v14 = vunpack.i.l.bf16 %v6169_v61  ;;  %5988 = vmatprep.mubr.msk.bf16.mxu1 %vm518_vm0, %v4017_v35  ;;  %v9050_v12 = vld [vmem:[#allocation25_spill] sm:$0xff] }
 0xaf1   : > { %v4018_v41 = vpack.c.bf16 %v4002_v47, %v4001_v63  ;;  %v9061_v47 = vld [vmem:[#allocation5_spill] sm:$0xff] }
 0xaf2   : > { %v4004_v1 = vsel %vm1270_vm1, %v9048_v48, %v6171_v50  ;;  %v4003_v54 = vsel %vm1270_vm1, %v9049_v26, %v6170_v14  ;;  %v9062_v48 = vld [vmem:[#allocation8_spill] sm:$0xff]  ;;  %v9063_v26 = vld [vmem:[#allocation7_spill] sm:$0xff] }
 0xaf3   : > { %v4019_v60 = vpack.c.bf16 %v4004_v1, %v4003_v54  ;;  %5989 = vmatmul.mubr.msk.bf16.gmra.mrb[92].mxu1 %vm518_vm0, %v4018_v41 }
 0xaf5   : > { %5992 = vmatprep.mubr.msk.bf16.mxu1 %vm518_vm0, %v4019_v60 }
 0xaf6   : > { %v6174_v20 = vpop.permute.xlu1 %6173 }
 0xaf7   : > { %v6176_v11 = vunpack.i.h.bf16 %v6174_v20  ;;  %v6175_v56 = vunpack.i.l.bf16 %v6174_v20 }
 0xaf9   : > { %v4006_v5 = vsel %vm1270_vm1, %v9050_v12, %v6176_v11  ;;  %v4005_v10 = vsel %vm1270_vm1, %v9051_v28, %v6175_v56 }
 0xafa   : > { %v4020_v13 = vpack.c.bf16 %v4006_v5, %v4005_v10 }
 0xafc   : > { %5993 = vmatmul.mubr.msk.bf16.gmra.mrb[96].mxu1 %vm518_vm0, %v4020_v13 }
 0xafd   : > { %v6179_v0 = vpop.permute.xlu0 %6178 }
 0xafe   : > { %v6181_v17 = vunpack.i.h.bf16 %v6179_v0  ;;  %v6180_v18 = vunpack.i.l.bf16 %v6179_v0 }
 0xaff   : > { %v6184_v57 = vpop.permute.xlu1 %6183 }
 0xb00   : > { %v4008_v7 = vsel %vm1270_vm1, %v9052_v8, %v6181_v17  ;;  %v4007_v4 = vsel %vm1270_vm1, %v9053_v16, %v6180_v18  ;;  %v6186_v31 = vunpack.i.h.bf16 %v6184_v57  ;;  %v6185_v37 = vunpack.i.l.bf16 %v6184_v57  ;;  %v9064_v8 = vld [vmem:[#allocation10_spill] sm:$0xff]  ;;  %v9065_v16 = vld [vmem:[#allocation9_spill] sm:$0xff] }
 0xb01   : > { %v4021_v59 = vpack.c.bf16 %v4008_v7, %v4007_v4 }
 0xb02   : > { %v4010_v55 = vsel %vm1270_vm1, %v9054_v39, %v6186_v31  ;;  %v4009_v38 = vsel %vm1270_vm1, %v9055_v42, %v6185_v37 }
 0xb03   : > { %v4022_v34 = vpack.c.bf16 %v4010_v55, %v4009_v38  ;;  %5996 = vmatprep.mubr.msk.bf16.mxu1 %vm518_vm0, %v4021_v59 }
 0xb05   : > { %5997 = vmatmul.mubr.msk.bf16.gmra.mrb[100].mxu1 %vm518_vm0, %v4022_v34 }
 0xba6   : > { %v5978_v21 = vpop.f32.mrb[80].mxu1 }
 0xba7   : > { %v4113_v53 = vpop.f32.mrb[81].mxu1  ;;  %v4122_v51 = vadd.f32 %v5978_v21, %v8367_v52 }
 0xba8   : > { %v4114_v25 = vadd.f32 %v4113_v53, %v8367_v52  ;;  %v5979_v2 = vpop.f32.mrb[82].mxu1 }
 0xba9   : > { %v4116_v23 = vpop.f32.mrb[83].mxu1  ;;  %v8376_v62 = vadd.f32 %v4122_v51, %v9058_v29  ;;  %v4125_v22 = vadd.f32 %v5979_v2, %v8367_v52  ;;  %v9066_v51 = vld [vmem:[#allocation12_spill] sm:$0xff] }
 0xbaa   : > { %v8372_v36 = vadd.f32 %v4114_v25, %v9057_v30  ;;  %v4117_v40 = vadd.f32 %v4116_v23, %v8367_v52 }
 0xbab   : > { %v8387_v44 = vadd.f32 %v4125_v22, %v9060_v46  ;;  %v4238_v33 = vsel %vm518_vm0, %v8376_v62, 0.0 }
 0xbac   : > { %v8380_v58 = vadd.f32 %v4117_v40, %v9059_v3  ;;  %v4232_v27 = vsel %vm518_vm0, %v8372_v36, 0.0  ;;  %v9067_v40 = vld [vmem:[#allocation11_spill] sm:$0xff] }
 0xbad   : > { %4233 = vadd.xlane.f32.xlu0 %v4232_v27  ;;  %v4241_v14 = vsel %vm518_vm0, %v8387_v44, 0.0  ;;  %v9068_v27 = vld [vmem:[#allocation14_spill] sm:$0xff] }
 0xbae   : > { %v4235_v19 = vsel %vm518_vm0, %v8380_v58, 0.0 }
 0xbaf   : > { %4236 = vadd.xlane.f32.xlu1 %v4235_v19 }
 0xbb0   : > { %v5982_v24 = vpop.f32.mrb[84].mxu1 }
 0xbb1   : > { %v4129_v45 = vpop.f32.mrb[85].mxu1  ;;  %4239 = vadd.xlane.f32.xlu0 %v4238_v33  ;;  %v4138_v32 = vadd.f32 %v5982_v24, %v8367_v52 }
 0xbb2   : > { %v4130_v15 = vadd.f32 %v4129_v45, %v8367_v52  ;;  %v5983_v35 = vpop.f32.mrb[86].mxu1 }
 0xbb3   : > { %v4141_v43 = vadd.f32 %v5983_v35, %v8367_v52  ;;  %v4132_v61 = vpop.f32.mrb[87].mxu1  ;;  %v8404_v1 = vadd.f32 %v4138_v32, %v9062_v48 }
 0xbb4   : > { %v8395_v63 = vadd.f32 %v4130_v15, %v9061_v47  ;;  %v4133_v50 = vadd.f32 %v4132_v61, %v8367_v52  ;;  %v9069_v47 = vld [vmem:[#allocation13_spill] sm:$0xff] }
 0xbb5   : > { %4242 = vadd.xlane.f32.xlu0 %v4241_v14  ;;  %v8407_v54 = vadd.f32 %v4141_v43, %v9063_v26  ;;  %v4250_v13 = vsel %vm518_vm0, %v8404_v1, 0.0  ;;  %v9070_v26 = vld [vmem:[#allocation16_spill] sm:$0xff] }
 0xbb6   : > { %v8401_v41 = vadd.f32 %v4133_v50, %v9058_v29  ;;  %v4244_v11 = vsel %vm518_vm0, %v8395_v63, 0.0 }
 0xbb7   : > { %v4253_v10 = vsel %vm518_vm0, %v8407_v54, 0.0 }
 0xbb8   : > { %v5986_v60 = vpop.f32.mrb[88].mxu1  ;;  %v4247_v20 = vsel %vm518_vm0, %v8401_v41, 0.0 }
 0xbb9   : > { %v4145_v56 = vpop.f32.mrb[89].mxu1  ;;  %4248 = vadd.xlane.f32.xlu1 %v4247_v20  ;;  %4245 = vadd.xlane.f32.xlu0 %v4244_v11  ;;  %v4154_v0 = vadd.f32 %v5986_v60, %v8367_v52 }
 0xbba   : > { %v4146_v12 = vadd.f32 %v4145_v56, %v8367_v52  ;;  %v5987_v5 = vpop.f32.mrb[90].mxu1  ;;  %v9071_v56 = vld [vmem:[#allocation15_spill] sm:$0xff] }
 0xbbb   : > { %v4148_v28 = vpop.f32.mrb[91].mxu1  ;;  %v4157_v18 = vadd.f32 %v5987_v5, %v8367_v52  ;;  %v8428_v4 = vadd.f32 %v4154_v0, %v9065_v16 }
 0xbbc   : > { %v8420_v17 = vadd.f32 %v4146_v12, %v9058_v29  ;;  %v4149_v57 = vadd.f32 %v4148_v28, %v8367_v52 }
 0xbbd   : > { %4254 = vadd.xlane.f32.xlu1 %v4253_v10  ;;  %4251 = vadd.xlane.f32.xlu0 %v4250_v13  ;;  %v8431_v31 = vadd.f32 %v4157_v18, %v9058_v29  ;;  %v4262_v55 = vsel %vm518_vm0, %v8428_v4, 0.0 }
 0xbbe   : > { %v8425_v7 = vadd.f32 %v4149_v57, %v9064_v8  ;;  %v4256_v59 = vsel %vm518_vm0, %v8420_v17, 0.0 }
 0xbbf   : > { %v4265_v39 = vsel %vm518_vm0, %v8431_v31, 0.0 }
 0xbc0   : > { %v4259_v37 = vsel %vm518_vm0, %v8425_v7, 0.0 }
 0xbc1   : > { %4260 = vadd.xlane.f32.xlu1 %v4259_v37  ;;  %4257 = vadd.xlane.f32.xlu0 %v4256_v59 }
 0xbc5   : > { %4266 = vadd.xlane.f32.xlu1 %v4265_v39  ;;  %4263 = vadd.xlane.f32.xlu0 %v4262_v55  ;;  %v9072_v55 = vld [vmem:[#allocation17_spill] sm:$0xff] }
 0xbc6   : > { %v5990_v42 = vpop.f32.mrb[92].mxu1 }
 0xbc7   : > { %v4161_v38 = vpop.f32.mrb[93].mxu1  ;;  %v4170_v34 = vadd.f32 %v5990_v42, %v8367_v52 }
 0xbc8   : > { %v4162_v6 = vadd.f32 %v4161_v38, %v8367_v52  ;;  %v5991_v21 = vpop.f32.mrb[94].mxu1  ;;  %v9073_v38 = vld [vmem:[#allocation18_spill] sm:$0xff] }
 0xbc9   : > { %v4164_v53 = vpop.f32.mrb[95].mxu1  ;;  %v4173_v2 = vadd.f32 %v5991_v21, %v8367_v52  ;;  %v8449_v30 = vadd.f32 %v4170_v34, %v9058_v29 }
 0xbca   : > { %v8444_v25 = vadd.f32 %v4162_v6, %v9066_v51  ;;  %v4165_v23 = vadd.f32 %v4164_v53, %v8367_v52 }
 0xbcb   : > { %v8457_v19 = vadd.f32 %v4173_v2, %v9068_v27  ;;  %v4274_v45 = vsel %vm518_vm0, %v8449_v30, 0.0 }
 0xbcc   : > { %v8452_v22 = vadd.f32 %v4165_v23, %v9067_v40  ;;  %v4268_v3 = vsel %vm518_vm0, %v8444_v25, 0.0 }
 0xbcd   : > { %4269 = vadd.xlane.f32.xlu0 %v4268_v3  ;;  %v4277_v61 = vsel %vm518_vm0, %v8457_v19, 0.0 }
 0xbce   : > { %v4271_v46 = vsel %vm518_vm0, %v8452_v22, 0.0 }
 0xbcf   : > { %4272 = vadd.xlane.f32.xlu1 %v4271_v46  ;;  %v5994_v24 = vpop.f32.mrb[96].mxu1 }
 0xbd0   : > { %v4177_v33 = vpop.f32.mrb[97].mxu1  ;;  %v4186_v15 = vadd.f32 %v5994_v24, %v8367_v52 }
 0xbd1   : > { %v4178_v35 = vadd.f32 %v4177_v33, %v8367_v52  ;;  %4275 = vadd.xlane.f32.xlu0 %v4274_v45  ;;  %v5995_v32 = vpop.f32.mrb[98].mxu1 }
 0xbd2   : > { %v4180_v43 = vpop.f32.mrb[99].mxu1  ;;  %v4189_v14 = vadd.f32 %v5995_v32, %v8367_v52  ;;  %v8473_v60 = vadd.f32 %v4186_v15, %v9070_v26 }
 0xbd3   : > { %v8468_v50 = vadd.f32 %v4178_v35, %v9069_v47  ;;  %v4181_v48 = vadd.f32 %v4180_v43, %v8367_v52  ;;  %4278 = vadd.xlane.f32.xlu1 %v4277_v61 }
 0xbd4   : > { %v8481_v12 = vadd.f32 %v4189_v14, %v9071_v56  ;;  %v4286_v13 = vsel %vm518_vm0, %v8473_v60, 0.0 }
 0xbd5   : > { %v8476_v20 = vadd.f32 %v4181_v48, %v9058_v29  ;;  %v4280_v11 = vsel %vm518_vm0, %v8468_v50, 0.0 }
 0xbd6   : > { %4281 = vadd.xlane.f32.xlu0 %v4280_v11  ;;  %v4289_v16 = vsel %vm518_vm0, %v8481_v12, 0.0 }
 0xbd7   : > { %v4283_v5 = vsel %vm518_vm0, %v8476_v20, 0.0 }
 0xbd8   : > { %v5998_v28 = vpop.f32.mrb[100].mxu1  ;;  %4284 = vadd.xlane.f32.xlu1 %v4283_v5 }
 0xbd9   : > { %v4193_v10 = vpop.f32.mrb[101].mxu1  ;;  %v4202_v0 = vadd.f32 %v5998_v28, %v8367_v52 }
 0xbda   : > { %v4194_v18 = vadd.f32 %v4193_v10, %v8367_v52  ;;  %v5999_v57 = vpop.f32.mrb[102].mxu1  ;;  %4287 = vadd.xlane.f32.xlu0 %v4286_v13 }
 0xbdb   : > { %v4196_v8 = vpop.f32.mrb[103].mxu1  ;;  %v4205_v59 = vadd.f32 %v5999_v57, %v8367_v52  ;;  %v8497_v42 = vadd.f32 %v4202_v0, %v9072_v55 }
 0xbdc   : > { %v8492_v37 = vadd.f32 %v4194_v18, %v9058_v29  ;;  %v4197_v39 = vadd.f32 %v4196_v8, %v8367_v52  ;;  %4290 = vadd.xlane.f32.xlu1 %v4289_v16 }
 0xbdd   : > { %v8505_v21 = vadd.f32 %v4205_v59, %v9058_v29  ;;  %v4298_v52 = vsel %vm518_vm0, %v8497_v42, 0.0 }
 0xbde   : > { %v8500_v34 = vadd.f32 %v4197_v39, %v9073_v38  ;;  %v4292_v6 = vsel %vm518_vm0, %v8492_v37, 0.0 }
 0xbdf   : > { %4293 = vadd.xlane.f32.xlu0 %v4292_v6  ;;  %v4301_v51 = vsel %vm518_vm0, %v8505_v21, 0.0 }
 0xbe0   : > { %v4295_v53 = vsel %vm518_vm0, %v8500_v34, 0.0 }
 0xbe1   : > { %4296 = vadd.xlane.f32.xlu1 %v4295_v53 }
 0xbe3   : > { %4299 = vadd.xlane.f32.xlu0 %v4298_v52 }
 0xbe5   : > { %4302 = vadd.xlane.f32.xlu1 %v4301_v51 }
 0xc3a   : > { %v4234_v2 = vpop.xlane.xlu0 %4233 }
 0xc3b   : > { %v4304_v23 = vmul.f32 0.03125, %v4234_v2 }
 0xc3c   : > { %v4237_v40 = vpop.xlane.xlu1 %4236 }
 0xc3d   : > { %v8514_v3 = vsub.f32 %v8372_v36, %v4304_v23  ;;  %v4305_v29 = vmul.f32 0.03125, %v4237_v40 }
 0xc3e   : > { %v4240_v27 = vpop.xlane.xlu0 %4239 }
 0xc3f   : > { %v8517_v46 = vsub.f32 %v8380_v58, %v4305_v29  ;;  %v4306_v24 = vmul.f32 0.03125, %v4240_v27  ;;  %v4352_v33 = vmul.f32 %v8514_v3, %v8514_v3 }
 0xc41   : > { %v8522_v45 = vsub.f32 %v8376_v62, %v4306_v24  ;;  %v4376_v15 = vsel %vm518_vm0, %v4352_v33, 0.0  ;;  %v4353_v35 = vmul.f32 %v8517_v46, %v8517_v46 }
 0xc42   : > { %4377 = vadd.xlane.f32.xlu0 %v4376_v15  ;;  %v4243_v32 = vpop.xlane.xlu0 %4242 }
 0xc43   : > { %v4307_v43 = vmul.f32 0.03125, %v4243_v32  ;;  %v4379_v61 = vsel %vm518_vm0, %v4353_v35, 0.0  ;;  %v4354_v47 = vmul.f32 %v8522_v45, %v8522_v45 }
 0xc44   : > { %4380 = vadd.xlane.f32.xlu1 %v4379_v61 }
 0xc45   : > { %v8531_v14 = vsub.f32 %v8387_v44, %v4307_v43  ;;  %v4382_v62 = vsel %vm518_vm0, %v4354_v47, 0.0 }
 0xc46   : > { %v4249_v48 = vpop.xlane.xlu1 %4248  ;;  %4383 = vadd.xlane.f32.xlu0 %v4382_v62  ;;  %v4246_v26 = vpop.xlane.xlu0 %4245 }
 0xc47   : > { %v4309_v11 = vmul.f32 0.03125, %v4249_v48  ;;  %v4308_v56 = vmul.f32 0.03125, %v4246_v26  ;;  %v4355_v5 = vmul.f32 %v8531_v14, %v8531_v14 }
 0xc49   : > { %v8537_v28 = vsub.f32 %v8401_v41, %v4309_v11  ;;  %v8540_v10 = vsub.f32 %v8395_v63, %v4308_v56  ;;  %v4385_v13 = vsel %vm518_vm0, %v4355_v5, 0.0 }
 0xc4a   : > { %v4255_v0 = vpop.xlane.xlu1 %4254  ;;  %4386 = vadd.xlane.f32.xlu1 %v4385_v13  ;;  %v4252_v18 = vpop.xlane.xlu0 %4251 }
 0xc4b   : > { %v4311_v57 = vmul.f32 0.03125, %v4255_v0  ;;  %v4310_v8 = vmul.f32 0.03125, %v4252_v18  ;;  %v4357_v16 = vmul.f32 %v8537_v28, %v8537_v28  ;;  %v4356_v59 = vmul.f32 %v8540_v10, %v8540_v10 }
 0xc4d   : > { %v8548_v39 = vsub.f32 %v8407_v54, %v4311_v57  ;;  %v8551_v41 = vsub.f32 %v8404_v1, %v4310_v8  ;;  %v4391_v55 = vsel %vm518_vm0, %v4357_v16, 0.0  ;;  %v4388_v38 = vsel %vm518_vm0, %v4356_v59, 0.0 }
 0xc4e   : > { %v4261_v6 = vpop.xlane.xlu1 %4260  ;;  %4392 = vadd.xlane.f32.xlu1 %v4391_v55  ;;  %4389 = vadd.xlane.f32.xlu0 %v4388_v38  ;;  %v4258_v53 = vpop.xlane.xlu0 %4257 }
 0xc4f   : > { %v4313_v52 = vmul.f32 0.03125, %v4261_v6  ;;  %v4312_v51 = vmul.f32 0.03125, %v4258_v53  ;;  %v4359_v2 = vmul.f32 %v8548_v39, %v8548_v39  ;;  %v4358_v23 = vmul.f32 %v8551_v41, %v8551_v41 }
 0xc51   : > { %v8560_v40 = vsub.f32 %v8425_v7, %v4313_v52  ;;  %v8563_v29 = vsub.f32 %v8420_v17, %v4312_v51  ;;  %v4397_v27 = vsel %vm518_vm0, %v4359_v2, 0.0  ;;  %v4394_v24 = vsel %vm518_vm0, %v4358_v23, 0.0 }
 0xc52   : > { %v4267_v33 = vpop.xlane.xlu1 %4266  ;;  %4398 = vadd.xlane.f32.xlu1 %v4397_v27  ;;  %4395 = vadd.xlane.f32.xlu0 %v4394_v24  ;;  %v4264_v15 = vpop.xlane.xlu0 %4263 }
 0xc53   : > { %v4315_v35 = vmul.f32 0.03125, %v4267_v33  ;;  %v4314_v32 = vmul.f32 0.03125, %v4264_v15  ;;  %v4361_v43 = vmul.f32 %v8560_v40, %v8560_v40  ;;  %v4360_v61 = vmul.f32 %v8563_v29, %v8563_v29 }
 0xc55   : > { %v8572_v47 = vsub.f32 %v8431_v31, %v4315_v35  ;;  %v8575_v17 = vsub.f32 %v8428_v4, %v4314_v32  ;;  %v4403_v62 = vsel %vm518_vm0, %v4361_v43, 0.0  ;;  %v4400_v48 = vsel %vm518_vm0, %v4360_v61, 0.0  ;;  %v6199_v61 = vld [vmem:[%s8989_s6] sm:$0xff]  }
 0xc56   : > { %4404 = vadd.xlane.f32.xlu1 %v4403_v62  ;;  %4401 = vadd.xlane.f32.xlu0 %v4400_v48 }
 0xc57   : > { %v4363_v26 = vmul.f32 %v8572_v47, %v8572_v47  ;;  %v4362_v11 = vmul.f32 %v8575_v17, %v8575_v17  ;;  %6000 = vmatprep.subr.bf16.mxu0 %v6199_v61 }
 0xc58   : > { %6001 = vmatpush3.bf16.msra.mxu0 %v6199_v61 }
 0xc59   : > { %v4409_v56 = vsel %vm518_vm0, %v4363_v26, 0.0  ;;  %v4406_v31 = vsel %vm518_vm0, %v4362_v11, 0.0 }
 0xc5a   : > { %v4270_v5 = vpop.xlane.xlu0 %4269  ;;  %4410 = vadd.xlane.f32.xlu1 %v4409_v56  ;;  %4407 = vadd.xlane.f32.xlu0 %v4406_v31 }
 0xc5b   : > { %v4316_v13 = vmul.f32 0.03125, %v4270_v5 }
 0xc5c   : > { %v4273_v0 = vpop.xlane.xlu1 %4272 }
 0xc5d   : > { %v8586_v18 = vsub.f32 %v8444_v25, %v4316_v13  ;;  %v4317_v57 = vmul.f32 0.03125, %v4273_v0 }
 0xc5e   : > { %v4276_v8 = vpop.xlane.xlu0 %4275 }
 0xc5f   : > { %v8589_v16 = vsub.f32 %v8452_v22, %v4317_v57  ;;  %v4318_v59 = vmul.f32 0.03125, %v4276_v8  ;;  %v4364_v55 = vmul.f32 %v8586_v18, %v8586_v18 }
 0xc60   : > { %v4279_v38 = vpop.xlane.xlu1 %4278 }
 0xc61   : > { %v8594_v6 = vsub.f32 %v8449_v30, %v4318_v59  ;;  %v4319_v53 = vmul.f32 0.03125, %v4279_v38  ;;  %v4412_v52 = vsel %vm518_vm0, %v4364_v55, 0.0  ;;  %v4365_v51 = vmul.f32 %v8589_v16, %v8589_v16 }
 0xc62   : > { %4413 = vadd.xlane.f32.xlu0 %v4412_v52 }
 0xc63   : > { %v8600_v2 = vsub.f32 %v8457_v19, %v4319_v53  ;;  %v4415_v23 = vsel %vm518_vm0, %v4365_v51, 0.0  ;;  %v4282_v27 = vpop.xlane.xlu0 %4281  ;;  %v4366_v24 = vmul.f32 %v8594_v6, %v8594_v6 }
 0xc64   : > { %4416 = vadd.xlane.f32.xlu1 %v4415_v23  ;;  %v4320_v33 = vmul.f32 0.03125, %v4282_v27 }
 0xc65   : > { %v4285_v30 = vpop.xlane.xlu1 %4284  ;;  %v4418_v15 = vsel %vm518_vm0, %v4366_v24, 0.0  ;;  %v4367_v35 = vmul.f32 %v8600_v2, %v8600_v2 }
 0xc66   : > { %v8609_v32 = vsub.f32 %v8468_v50, %v4320_v33  ;;  %v4321_v43 = vmul.f32 0.03125, %v4285_v30  ;;  %4419 = vadd.xlane.f32.xlu0 %v4418_v15 }
 0xc67   : > { %v4421_v62 = vsel %vm518_vm0, %v4367_v35, 0.0  ;;  %v4288_v48 = vpop.xlane.xlu0 %4287 }
 0xc68   : > { %v8616_v26 = vsub.f32 %v8476_v20, %v4321_v43  ;;  %4422 = vadd.xlane.f32.xlu1 %v4421_v62  ;;  %v4322_v11 = vmul.f32 0.03125, %v4288_v48  ;;  %v4368_v56 = vmul.f32 %v8609_v32, %v8609_v32  ;;  %v6200_v20 = vld [vmem:[%s8989_s6 + $0x8] sm:$0xff]  }
 0xc69   : > { %v4291_v31 = vpop.xlane.xlu1 %4290  ;;  %6002 = vmatprep.subr.bf16.mxu0 %v6200_v20 }
 0xc6a   : > { %v8621_v5 = vsub.f32 %v8473_v60, %v4322_v11  ;;  %v4323_v13 = vmul.f32 0.03125, %v4291_v31  ;;  %v4424_v0 = vsel %vm518_vm0, %v4368_v56, 0.0  ;;  %v4369_v57 = vmul.f32 %v8616_v26, %v8616_v26  ;;  %6003 = vmatpush3.bf16.msra.mxu0 %v6200_v20 }
 0xc6b   : > { %4425 = vadd.xlane.f32.xlu0 %v4424_v0 }
 0xc6c   : > { %v8630_v8 = vsub.f32 %v8481_v12, %v4323_v13  ;;  %v4294_v59 = vpop.xlane.xlu0 %4293  ;;  %v4427_v55 = vsel %vm518_vm0, %v4369_v57, 0.0  ;;  %v4370_v38 = vmul.f32 %v8621_v5, %v8621_v5 }
 0xc6d   : > { %v4324_v53 = vmul.f32 0.03125, %v4294_v59  ;;  %4428 = vadd.xlane.f32.xlu1 %v4427_v55 }
 0xc6e   : > { %v4297_v52 = vpop.xlane.xlu1 %4296  ;;  %v4430_v51 = vsel %vm518_vm0, %v4370_v38, 0.0  ;;  %v4371_v23 = vmul.f32 %v8630_v8, %v8630_v8 }
 0xc6f   : > { %v8639_v27 = vsub.f32 %v8492_v37, %v4324_v53  ;;  %v4325_v24 = vmul.f32 0.03125, %v4297_v52  ;;  %4431 = vadd.xlane.f32.xlu0 %v4430_v51 }
 0xc70   : > { %v4300_v33 = vpop.xlane.xlu0 %4299  ;;  %v4433_v30 = vsel %vm518_vm0, %v4371_v23, 0.0 }
 0xc71   : > { %v8643_v15 = vsub.f32 %v8500_v34, %v4325_v24  ;;  %v4326_v35 = vmul.f32 0.03125, %v4300_v33  ;;  %4434 = vadd.xlane.f32.xlu1 %v4433_v30  ;;  %v4372_v43 = vmul.f32 %v8639_v27, %v8639_v27 }
 0xc72   : > { %v4303_v61 = vpop.xlane.xlu1 %4302 }
 0xc73   : > { %v8648_v62 = vsub.f32 %v8497_v42, %v4326_v35  ;;  %v4327_v48 = vmul.f32 0.03125, %v4303_v61  ;;  %v4436_v37 = vsel %vm518_vm0, %v4372_v43, 0.0  ;;  %v4373_v11 = vmul.f32 %v8643_v15, %v8643_v15 }
 0xc74   : > { %4437 = vadd.xlane.f32.xlu0 %v4436_v37  ;;  %v4546_v35 = vsub.s32 4, %v9056_v49 }
 0xc75   : > { %v8654_v56 = vsub.f32 %v8505_v21, %v4327_v48  ;;  %v4439_v31 = vsel %vm518_vm0, %v4373_v11, 0.0  ;;  %v4374_v13 = vmul.f32 %v8648_v62, %v8648_v62 }
 0xc76   : > { %4440 = vadd.xlane.f32.xlu1 %v4439_v31  ;;  %v8665_v31 = vrot.slane %v8364_v9, %v4546_v35 }
 0xc77   : > { %v4442_v0 = vsel %vm518_vm0, %v4374_v13, 0.0  ;;  %v4375_v57 = vmul.f32 %v8654_v56, %v8654_v56  ;;  %v4574_v13 = vsub.s32 5, %v9056_v49 }
 0xc78   : > { %4443 = vadd.xlane.f32.xlu0 %v4442_v0 }
 0xc79   : > { %v4445_v20 = vsel %vm518_vm0, %v4375_v57, 0.0 }
 0xc7a   : > { %4446 = vadd.xlane.f32.xlu1 %v4445_v20 }
 0xccf   : > { %v4378_v59 = vpop.xlane.xlu0 %4377 }
 0xcd0   : > { %v4448_v55 = vmul.f32 0.03125, %v4378_v59 }
 0xcd1   : > { %v4381_v38 = vpop.xlane.xlu1 %4380 }
 0xcd2   : > { %v4472_v21 = vadd.f32 1e-05, %v4448_v55  ;;  %v4449_v53 = vmul.f32 0.03125, %v4381_v38 }
 0xcd3   : > { %v4384_v52 = vpop.xlane.xlu0 %4383 }
 0xcd4   : > { %6465 = vrsqrt.f32 %v4472_v21  ;;  %v4473_v51 = vadd.f32 1e-05, %v4449_v53  ;;  %v4450_v23 = vmul.f32 0.03125, %v4384_v52 }
 0xcd6   : > { %6467 = vrsqrt.f32 %v4473_v51  ;;  %v4474_v24 = vadd.f32 1e-05, %v4450_v23  ;;  %v8670_v51 = vrot.slane %v8364_v9, %v4574_v13 }
 0xcd7   : > { %v4387_v33 = vpop.xlane.xlu1 %4386 }
 0xcd8   : > { %6469 = vrsqrt.f32 %v4474_v24  ;;  %v4451_v30 = vmul.f32 0.03125, %v4387_v33 }
 0xcda   : > { %v4475_v43 = vadd.f32 1e-05, %v4451_v30 }
 0xcdb   : > { %v4393_v61 = vpop.xlane.xlu1 %4392  ;;  %v4390_v48 = vpop.xlane.xlu0 %4389 }
 0xcdc   : > { %6471 = vrsqrt.f32 %v4475_v43  ;;  %v4453_v37 = vmul.f32 0.03125, %v4393_v61  ;;  %v4452_v11 = vmul.f32 0.03125, %v4390_v48 }
 0xcde   : > { %v6466_v0 = vpop.eup %6465  ;;  %v4477_v57 = vadd.f32 1e-05, %v4453_v37  ;;  %v4476_v20 = vadd.f32 1e-05, %v4452_v11 }
 0xcdf   : > { %v4520_v59 = vmul.f32 %v6466_v0, %v8514_v3  ;;  %v4399_v55 = vpop.xlane.xlu1 %4398  ;;  %v4396_v38 = vpop.xlane.xlu0 %4395 }
 0xce0   : > { %v6468_v21 = vpop.eup %6467  ;;  %6473 = vrsqrt.f32 %v4477_v57  ;;  %v4455_v53 = vmul.f32 0.03125, %v4399_v55  ;;  %v4454_v52 = vmul.f32 0.03125, %v4396_v38 }
 0xce1   : > { %v4521_v23 = vmul.f32 %v6468_v21, %v8517_v46  ;;  %6475 = vrsqrt.f32 %v4476_v20  ;;  %v4548_v24 = vmul.f32 %v8665_v31, %v4520_v59 }
 0xce2   : > { %v6470_v33 = vpop.eup %6469  ;;  %v4479_v30 = vadd.f32 1e-05, %v4455_v53  ;;  %v4478_v35 = vadd.f32 1e-05, %v4454_v52 }
 0xce3   : > { %v4522_v43 = vmul.f32 %v6470_v33, %v8522_v45  ;;  %v4405_v3 = vpop.xlane.xlu1 %4404  ;;  %v4402_v61 = vpop.xlane.xlu0 %4401  ;;  %v4549_v48 = vmul.f32 %v8665_v31, %v4521_v23  ;;  %v4576_v13 = vadd.f32 %v8670_v51, %v4548_v24 }
 0xce4   : > { %6477 = vrsqrt.f32 %v4479_v30  ;;  %v4457_v37 = vmul.f32 0.03125, %v4405_v3  ;;  %v4456_v11 = vmul.f32 0.03125, %v4402_v61 }
 0xce5   : > { %6479 = vrsqrt.f32 %v4478_v35  ;;  %v4577_v46 = vadd.f32 %v8670_v51, %v4549_v48  ;;  %v4550_v59 = vmul.f32 %v8665_v31, %v4522_v43 }
 0xce6   : > { %v6472_v0 = vpop.eup %6471  ;;  %v4481_v57 = vadd.f32 1e-05, %v4457_v37  ;;  %v4480_v20 = vadd.f32 1e-05, %v4456_v11 }
 0xce7   : > { %v4523_v55 = vmul.f32 %v6472_v0, %v8531_v14  ;;  %v4411_v45 = vpop.xlane.xlu1 %4410  ;;  %v4408_v38 = vpop.xlane.xlu0 %4407  ;;  %v4600_v21 = vpack.c.bf16 %v4577_v46, %v4576_v13  ;;  %v4578_v43 = vadd.f32 %v8670_v51, %v4550_v59 }
 0xce8   : > { %6481 = vrsqrt.f32 %v4481_v57  ;;  %v4459_v53 = vmul.f32 0.03125, %v4411_v45  ;;  %v4458_v52 = vmul.f32 0.03125, %v4408_v38 }
 0xce9   : > { %v4551_v23 = vmul.f32 %v8665_v31, %v4523_v55  ;;  %6483 = vrsqrt.f32 %v4480_v20  ;;  %6004 = vmatprep.mubr.msk.bf16.mxu0 %vm518_vm0, %v4600_v21 }
 0xcea   : > { %v6474_v24 = vpop.eup %6473  ;;  %v4483_v33 = vadd.f32 1e-05, %v4459_v53  ;;  %v4482_v30 = vadd.f32 1e-05, %v4458_v52 }
 0xceb   : > { %v6476_v35 = vpop.eup %6475  ;;  %v4525_v3 = vmul.f32 %v6474_v24, %v8537_v28  ;;  %v4579_v14 = vadd.f32 %v8670_v51, %v4551_v23 }
 0xcec   : > { %v4524_v61 = vmul.f32 %v6476_v35, %v8540_v10  ;;  %6485 = vrsqrt.f32 %v4483_v33 }
 0xced   : > { %6487 = vrsqrt.f32 %v4482_v30  ;;  %v4601_v48 = vpack.c.bf16 %v4579_v14, %v4578_v43  ;;  %v4553_v37 = vmul.f32 %v8665_v31, %v4525_v3 }
 0xcee   : > { %v6478_v11 = vpop.eup %6477  ;;  %v4552_v13 = vmul.f32 %v8665_v31, %v4524_v61 }
 0xcef   : > { %v6480_v46 = vpop.eup %6479  ;;  %v4527_v0 = vmul.f32 %v6478_v11, %v8548_v39  ;;  %v4414_v57 = vpop.xlane.xlu0 %4413  ;;  %6005 = vmatmul.mubr.msk.bf16.vlgmr.msra.gmra.mrb[88].mxu0 %vm518_vm0, %v4601_v48  ;;  %v4581_v28 = vadd.f32 %v8670_v51, %v4553_v37 }
 0xcf0   : > { %v4526_v20 = vmul.f32 %v6480_v46, %v8551_v41  ;;  %v4460_v59 = vmul.f32 0.03125, %v4414_v57  ;;  %v4580_v10 = vadd.f32 %v8670_v51, %v4552_v13 }
 0xcf1   : > { %v4417_v55 = vpop.xlane.xlu1 %4416  ;;  %v4555_v45 = vmul.f32 %v8665_v31, %v4527_v0 }
 0xcf2   : > { %v6482_v38 = vpop.eup %6481  ;;  %v4484_v21 = vadd.f32 1e-05, %v4460_v59  ;;  %v4461_v53 = vmul.f32 0.03125, %v4417_v55  ;;  %v4602_v52 = vpack.c.bf16 %v4581_v28, %v4580_v10  ;;  %v4554_v23 = vmul.f32 %v8665_v31, %v4526_v20 }
 0xcf3   : > { %v6484_v39 = vpop.eup %6483  ;;  %v4529_v24 = vmul.f32 %v6482_v38, %v8560_v40  ;;  %v4420_v33 = vpop.xlane.xlu0 %4419  ;;  %v4583_v30 = vadd.f32 %v8670_v51, %v4555_v45 }
 0xcf4   : > { %v4528_v41 = vmul.f32 %v6484_v39, %v8563_v29  ;;  %6489 = vrsqrt.f32 %v4484_v21  ;;  %v4485_v35 = vadd.f32 1e-05, %v4461_v53  ;;  %v4462_v3 = vmul.f32 0.03125, %v4420_v33  ;;  %6008 = vmatprep.mubr.msk.bf16.mxu0 %vm518_vm0, %v4602_v52 }
 0xcf5   : > { %v4423_v43 = vpop.xlane.xlu1 %4422  ;;  %v4582_v14 = vadd.f32 %v8670_v51, %v4554_v23  ;;  %v4557_v61 = vmul.f32 %v8665_v31, %v4529_v24 }
 0xcf6   : > { %v6486_v48 = vpop.eup %6485  ;;  %6491 = vrsqrt.f32 %v4485_v35  ;;  %v4486_v37 = vadd.f32 1e-05, %v4462_v3  ;;  %v4463_v11 = vmul.f32 0.03125, %v4423_v43  ;;  %v4556_v40 = vmul.f32 %v8665_v31, %v4528_v41 }
 0xcf7   : > { %v6488_v13 = vpop.eup %6487  ;;  %v4531_v46 = vmul.f32 %v6486_v48, %v8572_v47  ;;  %v4603_v29 = vpack.c.bf16 %v4583_v30, %v4582_v14  ;;  %v4585_v0 = vadd.f32 %v8670_v51, %v4557_v61 }
 0xcf8   : > { %v4530_v57 = vmul.f32 %v6488_v13, %v8575_v17  ;;  %6493 = vrsqrt.f32 %v4486_v37  ;;  %v4487_v28 = vadd.f32 1e-05, %v4463_v11  ;;  %v4426_v20 = vpop.xlane.xlu0 %4425  ;;  %v4584_v59 = vadd.f32 %v8670_v51, %v4556_v40 }
 0xcf9   : > { %6009 = vmatmul.mubr.msk.bf16.gmra.mrb[92].mxu0 %vm518_vm0, %v4603_v29  ;;  %v4464_v10 = vmul.f32 0.03125, %v4426_v20  ;;  %v4559_v55 = vmul.f32 %v8665_v31, %v4531_v46 }
 0xcfa   : > { %6495 = vrsqrt.f32 %v4487_v28  ;;  %v4429_v45 = vpop.xlane.xlu1 %4428  ;;  %v4604_v38 = vpack.c.bf16 %v4585_v0, %v4584_v59  ;;  %v4558_v47 = vmul.f32 %v8665_v31, %v4530_v57 }
 0xcfb   : > { %v4488_v21 = vadd.f32 1e-05, %v4464_v10  ;;  %v4465_v53 = vmul.f32 0.03125, %v4429_v45  ;;  %v4587_v52 = vadd.f32 %v8670_v51, %v4559_v55 }
 0xcfc   : > { %6012 = vmatprep.mubr.msk.bf16.mxu0 %vm518_vm0, %v4604_v38  ;;  %v4432_v17 = vpop.xlane.xlu0 %4431  ;;  %v4586_v23 = vadd.f32 %v8670_v51, %v4558_v47 }
 0xcfd   : > { %6497 = vrsqrt.f32 %v4488_v21  ;;  %v4489_v39 = vadd.f32 1e-05, %v4465_v53  ;;  %v4466_v24 = vmul.f32 0.03125, %v4432_v17 }
 0xcfe   : > { %v6490_v33 = vpop.eup %6489  ;;  %v4435_v30 = vpop.xlane.xlu1 %4434  ;;  %v4605_v41 = vpack.c.bf16 %v4587_v52, %v4586_v23 }
 0xcff   : > { %v4532_v35 = vmul.f32 %v6490_v33, %v8586_v18  ;;  %6499 = vrsqrt.f32 %v4489_v39  ;;  %v4490_v3 = vadd.f32 1e-05, %v4466_v24  ;;  %v4467_v43 = vmul.f32 0.03125, %v4435_v30 }
 0xd00   : > { %v6492_v14 = vpop.eup %6491 }
 0xd01   : > { %v4533_v61 = vmul.f32 %v6492_v14, %v8589_v16  ;;  %6501 = vrsqrt.f32 %v4490_v3  ;;  %v4491_v48 = vadd.f32 1e-05, %v4467_v43  ;;  %6013 = vmatmul.mubr.msk.bf16.gmra.mrb[96].mxu0 %vm518_vm0, %v4605_v41  ;;  %v4438_v37 = vpop.xlane.xlu0 %4437  ;;  %v4560_v11 = vmul.f32 %v8665_v31, %v4532_v35 }
 0xd02   : > { %v6494_v40 = vpop.eup %6493  ;;  %v4468_v13 = vmul.f32 0.03125, %v4438_v37 }
 0xd03   : > { %v4534_v46 = vmul.f32 %v6494_v40, %v8594_v6  ;;  %6503 = vrsqrt.f32 %v4491_v48  ;;  %v4441_v29 = vpop.xlane.xlu1 %4440  ;;  %v4561_v18 = vmul.f32 %v8665_v31, %v4533_v61  ;;  %v4588_v59 = vadd.f32 %v8670_v51, %v4560_v11 }
 0xd04   : > { %v6496_v0 = vpop.eup %6495  ;;  %v4492_v57 = vadd.f32 1e-05, %v4468_v13  ;;  %v4469_v28 = vmul.f32 0.03125, %v4441_v29 }
 0xd05   : > { %v4535_v16 = vmul.f32 %v6496_v0, %v8600_v2  ;;  %v4444_v20 = vpop.xlane.xlu0 %4443  ;;  %v4589_v10 = vadd.f32 %v8670_v51, %v4561_v18  ;;  %v4562_v55 = vmul.f32 %v8665_v31, %v4534_v46 }
 0xd06   : > { %6505 = vrsqrt.f32 %v4492_v57  ;;  %v4493_v45 = vadd.f32 1e-05, %v4469_v28  ;;  %v4470_v38 = vmul.f32 0.03125, %v4444_v20 }
 0xd07   : > { %v6498_v6 = vpop.eup %6497  ;;  %v4447_v47 = vpop.xlane.xlu1 %4446  ;;  %v4606_v21 = vpack.c.bf16 %v4589_v10, %v4588_v59  ;;  %v4563_v53 = vmul.f32 %v8665_v31, %v4535_v16  ;;  %v4590_v39 = vadd.f32 %v8670_v51, %v4562_v55 }
 0xd08   : > { %v4536_v52 = vmul.f32 %v6498_v6, %v8609_v32  ;;  %6507 = vrsqrt.f32 %v4493_v45  ;;  %v4494_v17 = vadd.f32 1e-05, %v4470_v38  ;;  %v4471_v2 = vmul.f32 0.03125, %v4447_v47 }
 0xd09   : > { %v6500_v23 = vpop.eup %6499  ;;  %6016 = vmatprep.mubr.msk.bf16.mxu0 %vm518_vm0, %v4606_v21  ;;  %v4591_v24 = vadd.f32 %v8670_v51, %v4563_v53  ;;  %v6202_v21 = vld [vmem:[%s8990_s7 + $0x8] sm:$0xff]   ;;  %v4618_v53 = vsub.s32 6, %v9056_v49 }
 0xd0a   : > { %v4537_v33 = vmul.f32 %v6500_v23, %v8616_v26  ;;  %6509 = vrsqrt.f32 %v4494_v17  ;;  %v4495_v30 = vadd.f32 1e-05, %v4471_v2  ;;  %v4564_v41 = vmul.f32 %v8665_v31, %v4536_v52 }
 0xd0b   : > { %v6502_v35 = vpop.eup %6501  ;;  %v4607_v3 = vpack.c.bf16 %v4591_v24, %v4590_v39  ;;  %v8769_v52 = vrot.slane %v8364_v9, %v4618_v53 }
 0xd0c   : > { %v4538_v32 = vmul.f32 %v6502_v35, %v8621_v5  ;;  %6511 = vrsqrt.f32 %v4495_v30  ;;  %v4565_v43 = vmul.f32 %v8665_v31, %v4537_v33  ;;  %v4592_v48 = vadd.f32 %v8670_v51, %v4564_v41 }
 0xd0d   : > { %v6504_v14 = vpop.eup %6503  ;;  %6017 = vmatmul.mubr.msk.bf16.gmra.mrb[100].mxu0 %vm518_vm0, %v4607_v3 }
 0xd0e   : > { %v4539_v61 = vmul.f32 %v6504_v14, %v8630_v8  ;;  %v4593_v26 = vadd.f32 %v8670_v51, %v4565_v43  ;;  %v4566_v37 = vmul.f32 %v8665_v31, %v4538_v32 }
 0xd10   : > { %v6506_v11 = vpop.eup %6505  ;;  %v4608_v40 = vpack.c.bf16 %v4593_v26, %v4592_v48  ;;  %v4567_v13 = vmul.f32 %v8665_v31, %v4539_v61  ;;  %v4594_v29 = vadd.f32 %v8670_v51, %v4566_v37 }
 0xd11   : > { %v4540_v5 = vmul.f32 %v6506_v11, %v8639_v27 }
 0xd12   : > { %v6508_v46 = vpop.eup %6507  ;;  %6020 = vmatprep.mubr.msk.bf16.mxu0 %vm518_vm0, %v4608_v40  ;;  %v4595_v18 = vadd.f32 %v8670_v51, %v4567_v13 }
 0xd13   : > { %v4541_v8 = vmul.f32 %v6508_v46, %v8643_v15  ;;  %v4568_v0 = vmul.f32 %v8665_v31, %v4540_v5 }
 0xd14   : > { %v6510_v57 = vpop.eup %6509  ;;  %v4609_v28 = vpack.c.bf16 %v4595_v18, %v4594_v29 }
 0xd15   : > { %v4542_v16 = vmul.f32 %v6510_v57, %v8648_v62  ;;  %v4569_v20 = vmul.f32 %v8665_v31, %v4541_v8  ;;  %v4596_v10 = vadd.f32 %v8670_v51, %v4568_v0 }
 0xd16   : > { %v6512_v59 = vpop.eup %6511  ;;  %6021 = vmatmul.mubr.msk.bf16.gmra.mrb[104].mxu0 %vm518_vm0, %v4609_v28 }
 0xd17   : > { %v4543_v27 = vmul.f32 %v6512_v59, %v8654_v56  ;;  %v4597_v55 = vadd.f32 %v8670_v51, %v4569_v20  ;;  %v4570_v45 = vmul.f32 %v8665_v31, %v4542_v16  ;;  %v6201_v56 = vld [vmem:[%s8990_s7] sm:$0xff]  }
 0xd18   : > { %6028 = vmatprep.subr.bf16.mxu1 %v6201_v56 }
 0xd19   : > { %v4610_v15 = vpack.c.bf16 %v4597_v55, %v4596_v10  ;;  %v4571_v38 = vmul.f32 %v8665_v31, %v4543_v27  ;;  %v4598_v62 = vadd.f32 %v8670_v51, %v4570_v45  ;;  %6029 = vmatpush3.bf16.msra.mxu1 %v6201_v56  ;;  %v6203_v31 = vld [vmem:[%s8990_s7 + $0x10] sm:$0xff]  }
 0xd1a   : > { %6030 = vmatprep.subr.bf16.mxu1 %v6202_v21 }
 0xd1b   : > { %6024 = vmatprep.mubr.msk.bf16.mxu0 %vm518_vm0, %v4610_v15  ;;  %v4599_v6 = vadd.f32 %v8670_v51, %v4571_v38  ;;  %v6204_v51 = vld [vmem:[%s8990_s7 + $0x18] sm:$0xff]  }
 0xd1d   : > { %v4611_v47 = vpack.c.bf16 %v4599_v6, %v4598_v62  ;;  %6031 = vmatpush3.bf16.msra.mxu1 %v6202_v21 }
 0xd1e   : > { %6032 = vmatprep.subr.bf16.mxu1 %v6203_v31 }
 0xd1f   : > { %6025 = vmatmul.mubr.msk.bf16.gmra.mrb[108].mxu0 %vm518_vm0, %v4611_v47 }
 0xd21   : > { %6033 = vmatpush3.bf16.msra.mxu1 %v6203_v31 }
 0xd22   : > { %6034 = vmatprep.subr.bf16.mxu1 %v6204_v51 }
 0xd25   : > { %6035 = vmatpush3.bf16.msra.mxu1 %v6204_v51 }
 0xdc2   : > { %v6006_v17 = vpop.f32.mrb[88].mxu0 }
 0xdc3   : > { %v8772_v2 = vadd.f32 %v6006_v17, %v8769_v52  ;;  %v4702_v23 = vpop.f32.mrb[89].mxu0 }
 0xdc4   : > { %v8775_v39 = vadd.f32 %v4702_v23, %v8769_v52  ;;  %v6007_v24 = vpop.f32.mrb[90].mxu0 }
 0xdc5   : > { %v5413_v33 = vmul.f32 -1.702, %v8772_v2  ;;  %v8779_v30 = vadd.f32 %v6007_v24, %v8769_v52  ;;  %v4705_v41 = vpop.f32.mrb[91].mxu0 }
 0xdc6   : > { %v5411_v35 = vmul.f32 -1.702, %v8775_v39  ;;  %v8783_v9 = vadd.f32 %v4705_v41, %v8769_v52 }
 0xdc7   : > { %v4849_v3 = vmul.f32 1.442695, %v5413_v33  ;;  %v5414_v32 = vmul.f32 -1.702, %v8779_v30 }
 0xdc8   : > { %v4845_v43 = vmul.f32 1.442695, %v5411_v35  ;;  %v5412_v14 = vmul.f32 -1.702, %v8783_v9 }
 0xdc9   : > { %6513 = vpow2.f32 %v4849_v3  ;;  %v4851_v61 = vmul.f32 1.442695, %v5414_v32 }
 0xdca   : > { %6515 = vpow2.f32 %v4845_v43  ;;  %v4847_v48 = vmul.f32 1.442695, %v5412_v14 }
 0xdcb   : > { %6517 = vpow2.f32 %v4851_v61 }
 0xdcc   : > { %6519 = vpow2.f32 %v4847_v48  ;;  %v6010_v26 = vpop.f32.mrb[92].mxu0 }
 0xdcd   : > { %v8788_v37 = vadd.f32 %v6010_v26, %v8769_v52  ;;  %v4718_v11 = vpop.f32.mrb[93].mxu0 }
 0xdce   : > { %v8791_v40 = vadd.f32 %v4718_v11, %v8769_v52  ;;  %v6011_v13 = vpop.f32.mrb[94].mxu0 }
 0xdcf   : > { %v5417_v5 = vmul.f32 -1.702, %v8788_v37  ;;  %v8795_v46 = vadd.f32 %v6011_v13, %v8769_v52  ;;  %v4721_v29 = vpop.f32.mrb[95].mxu0 }
 0xdd0   : > { %v5415_v18 = vmul.f32 -1.702, %v8791_v40  ;;  %v8799_v8 = vadd.f32 %v4721_v29, %v8769_v52 }
 0xdd1   : > { %v4857_v0 = vmul.f32 1.442695, %v5417_v5  ;;  %v5418_v57 = vmul.f32 -1.702, %v8795_v46 }
 0xdd2   : > { %v4853_v28 = vmul.f32 1.442695, %v5415_v18  ;;  %v5416_v16 = vmul.f32 -1.702, %v8799_v8 }
 0xdd3   : > { %v6514_v20 = vpop.eup %6513  ;;  %6521 = vpow2.f32 %v4857_v0  ;;  %v4859_v59 = vmul.f32 1.442695, %v5418_v57 }
 0xdd4   : > { %v6516_v27 = vpop.eup %6515  ;;  %v4895_v10 = vadd.f32 1.0, %v6514_v20  ;;  %6523 = vpow2.f32 %v4853_v28  ;;  %v6014_v55 = vpop.f32.mrb[96].mxu0  ;;  %v4855_v56 = vmul.f32 1.442695, %v5416_v16 }
 0xdd5   : > { %v6518_v45 = vpop.eup %6517  ;;  %v4893_v15 = vadd.f32 1.0, %v6516_v27  ;;  %6525 = vpow2.f32 %v4859_v59  ;;  %v8804_v38 = vadd.f32 %v6014_v55, %v8769_v52  ;;  %v4734_v62 = vpop.f32.mrb[97].mxu0 }
 0xdd6   : > { %v6520_v6 = vpop.eup %6519  ;;  %6527 = vrcp.f32 %v4895_v10  ;;  %v4896_v47 = vadd.f32 1.0, %v6518_v45  ;;  %v8807_v21 = vadd.f32 %v4734_v62, %v8769_v52  ;;  %v6015_v31 = vpop.f32.mrb[98].mxu0 }
 0xdd7   : > { %6529 = vrcp.f32 %v4893_v15  ;;  %v4894_v51 = vadd.f32 1.0, %v6520_v6  ;;  %v5421_v53 = vmul.f32 -1.702, %v8804_v38  ;;  %v8811_v17 = vadd.f32 %v6015_v31, %v8769_v52  ;;  %v4737_v23 = vpop.f32.mrb[99].mxu0 }
 0xdd8   : > { %6531 = vrcp.f32 %v4896_v47  ;;  %v5419_v24 = vmul.f32 -1.702, %v8807_v21  ;;  %v8815_v33 = vadd.f32 %v4737_v23, %v8769_v52 }
 0xdd9   : > { %6533 = vrcp.f32 %v4894_v51  ;;  %v4865_v41 = vmul.f32 1.442695, %v5421_v53  ;;  %v5422_v35 = vmul.f32 -1.702, %v8811_v17 }
 0xdda   : > { %6535 = vpow2.f32 %v4855_v56  ;;  %v4861_v3 = vmul.f32 1.442695, %v5419_v24  ;;  %v5420_v32 = vmul.f32 -1.702, %v8815_v33 }
 0xddb   : > { %6537 = vpow2.f32 %v4865_v41  ;;  %v4867_v43 = vmul.f32 1.442695, %v5422_v35 }
 0xddc   : > { %6539 = vpow2.f32 %v4861_v3  ;;  %v4863_v14 = vmul.f32 1.442695, %v5420_v32 }
 0xddd   : > { %v6522_v61 = vpop.eup %6521  ;;  %6541 = vpow2.f32 %v4867_v43 }
 0xdde   : > { %v6524_v48 = vpop.eup %6523  ;;  %v4899_v26 = vadd.f32 1.0, %v6522_v61  ;;  %6543 = vpow2.f32 %v4863_v14 }
 0xddf   : > { %v6526_v11 = vpop.eup %6525  ;;  %v4897_v0 = vadd.f32 1.0, %v6524_v48 }
 0xde0   : > { %v6528_v13 = vpop.eup %6527  ;;  %6545 = vrcp.f32 %v4899_v26  ;;  %v4900_v5 = vadd.f32 1.0, %v6526_v11  ;;  %v6018_v29 = vpop.f32.mrb[100].mxu0 }
 0xde1   : > { %v6530_v18 = vpop.eup %6529  ;;  %v8820_v57 = vadd.f32 %v6018_v29, %v8769_v52  ;;  %v4750_v28 = vpop.f32.mrb[101].mxu0  ;;  %v4967_v10 = vmul.f32 %v6528_v13, %v8772_v2 }
 0xde2   : > { %v6532_v16 = vpop.eup %6531  ;;  %6547 = vrcp.f32 %v4900_v5  ;;  %v8823_v20 = vadd.f32 %v4750_v28, %v8769_v52  ;;  %v6019_v59 = vpop.f32.mrb[102].mxu0  ;;  %v4965_v6 = vmul.f32 %v6530_v18, %v8775_v39 }
 0xde3   : > { %v6534_v27 = vpop.eup %6533  ;;  %v4968_v55 = vmul.f32 %v6532_v16, %v8779_v30  ;;  %v8828_v45 = vadd.f32 %v6019_v59, %v8769_v52  ;;  %v4753_v15 = vpop.f32.mrb[103].mxu0  ;;  %v5425_v56 = vmul.f32 -1.702, %v8820_v57  ;;  %6549 = vrcp.f32 %v4897_v0 }
 0xde4   : > { %v6536_v62 = vpop.eup %6535  ;;  %v4966_v47 = vmul.f32 %v6534_v27, %v8783_v9  ;;  %v8834_v31 = vadd.f32 %v4753_v15, %v8769_v52  ;;  %v5423_v30 = vmul.f32 -1.702, %v8823_v20 }
 0xde5   : > { %v6538_v51 = vpop.eup %6537  ;;  %v4990_v53 = vpack.c.bf16 %v4968_v55, %v4967_v10  ;;  %v4898_v2 = vadd.f32 1.0, %v6536_v62  ;;  %v5426_v35 = vmul.f32 -1.702, %v8828_v45  ;;  %v4873_v14 = vmul.f32 1.442695, %v5425_v56 }
 0xde6   : > { %v6540_v23 = vpop.eup %6539  ;;  %v4989_v24 = vpack.c.bf16 %v4966_v47, %v4965_v6  ;;  %v4903_v41 = vadd.f32 1.0, %v6538_v51  ;;  %v5424_v9 = vmul.f32 -1.702, %v8834_v31  ;;  %v4869_v48 = vmul.f32 1.442695, %v5423_v30 }
 0xde7   : > { %v6542_v3 = vpop.eup %6541  ;;  %6551 = vrcp.f32 %v4898_v2  ;;  %v4901_v39 = vadd.f32 1.0, %v6540_v23  ;;  %v4875_v13 = vmul.f32 1.442695, %v5426_v35 }
 0xde8   : > { %v6544_v32 = vpop.eup %6543  ;;  %6553 = vrcp.f32 %v4903_v41  ;;  %v4904_v43 = vadd.f32 1.0, %v6542_v3  ;;  %6036 = vmatprep.mubr.msk.bf16.mxu1 %vm5037_vm5, %v4989_v24  ;;  %v4871_v18 = vmul.f32 1.442695, %v5424_v9 }
 0xde9   : > { %6555 = vrcp.f32 %v4901_v39  ;;  %v4902_v61 = vadd.f32 1.0, %v6544_v32  ;;  %v6022_v26 = vpop.f32.mrb[104].mxu0  ;;  %6037 = vmatmul.mubr.msk.bf16.vlgmr.msra.gmra.mrb[104].mxu1 %vm5037_vm5, %v4990_v53 }
 0xdea   : > { %v6546_v11 = vpop.eup %6545  ;;  %6557 = vrcp.f32 %v4904_v43  ;;  %v8842_v5 = vadd.f32 %v6022_v26, %v8769_v52  ;;  %v4766_v29 = vpop.f32.mrb[105].mxu0 }
 0xdeb   : > { %6559 = vrcp.f32 %v4902_v61  ;;  %v8845_v0 = vadd.f32 %v4766_v29, %v8769_v52  ;;  %v6023_v28 = vpop.f32.mrb[106].mxu0  ;;  %v4971_v59 = vmul.f32 %v6546_v11, %v8788_v37 }
 0xdec   : > { %v6548_v16 = vpop.eup %6547  ;;  %6561 = vpow2.f32 %v4873_v14  ;;  %v5429_v27 = vmul.f32 -1.702, %v8842_v5  ;;  %v8850_v10 = vadd.f32 %v6023_v28, %v8769_v52  ;;  %v4769_v55 = vpop.f32.mrb[107].mxu0 }
 0xded   : > { %v4972_v15 = vmul.f32 %v6548_v16, %v8795_v46  ;;  %6563 = vpow2.f32 %v4869_v48  ;;  %v5427_v62 = vmul.f32 -1.702, %v8845_v0  ;;  %v8855_v6 = vadd.f32 %v4769_v55, %v8769_v52  ;;  %v6550_v37 = vpop.eup %6549 }
 0xdee   : > { %6565 = vpow2.f32 %v4875_v13  ;;  %v4881_v47 = vmul.f32 1.442695, %v5429_v27  ;;  %v5430_v56 = vmul.f32 -1.702, %v8850_v10  ;;  %v4969_v41 = vmul.f32 %v6550_v37, %v8791_v40 }
 0xdef   : > { %v4992_v51 = vpack.c.bf16 %v4972_v15, %v4971_v59  ;;  %6567 = vpow2.f32 %v4871_v18  ;;  %v4877_v53 = vmul.f32 1.442695, %v5427_v62  ;;  %v5428_v2 = vmul.f32 -1.702, %v8855_v6 }
 0xdf0   : > { %6569 = vpow2.f32 %v4881_v47  ;;  %v4883_v30 = vmul.f32 1.442695, %v5430_v56 }
 0xdf1   : > { %v6552_v23 = vpop.eup %6551  ;;  %6571 = vpow2.f32 %v4877_v53  ;;  %v4879_v46 = vmul.f32 1.442695, %v5428_v2 }
 0xdf2   : > { %v6554_v24 = vpop.eup %6553  ;;  %v4970_v35 = vmul.f32 %v6552_v23, %v8799_v8  ;;  %6573 = vpow2.f32 %v4883_v30  ;;  %v6026_v3 = vpop.f32.mrb[108].mxu0 }
 0xdf3   : > { %v6556_v39 = vpop.eup %6555  ;;  %6575 = vpow2.f32 %v4879_v46  ;;  %v4782_v9 = vpop.f32.mrb[109].mxu0  ;;  %v4975_v48 = vmul.f32 %v6554_v24, %v8804_v38  ;;  %v8864_v11 = vadd.f32 %v6026_v3, %v8769_v52 }
 0xdf4   : > { %v6558_v32 = vpop.eup %6557  ;;  %v4991_v43 = vpack.c.bf16 %v4970_v35, %v4969_v41  ;;  %v6027_v14 = vpop.f32.mrb[110].mxu0  ;;  %v4973_v8 = vmul.f32 %v6556_v39, %v8807_v21  ;;  %v8870_v18 = vadd.f32 %v4782_v9, %v8769_v52 }
 0xdf5   : > { %v6560_v61 = vpop.eup %6559  ;;  %v4976_v26 = vmul.f32 %v6558_v32, %v8811_v17  ;;  %v4785_v13 = vpop.f32.mrb[111].mxu0  ;;  %v8874_v38 = vadd.f32 %v6027_v14, %v8769_v52  ;;  %v5433_v62 = vmul.f32 -1.702, %v8864_v11 }
 0xdf6   : > { %v6562_v40 = vpop.eup %6561  ;;  %v4974_v29 = vmul.f32 %v6560_v61, %v8815_v33  ;;  %6040 = vmatprep.mubr.msk.bf16.mxu1 %vm5037_vm5, %v4991_v43  ;;  %v8877_v21 = vadd.f32 %v4785_v13, %v8769_v52  ;;  %v5431_v37 = vmul.f32 -1.702, %v8870_v18 }
 0xdf7   : > { %v6564_v28 = vpop.eup %6563  ;;  %v4994_v16 = vpack.c.bf16 %v4976_v26, %v4975_v48  ;;  %v4907_v59 = vadd.f32 1.0, %v6562_v40  ;;  %6041 = vmatmul.mubr.msk.bf16.gmra.mrb[108].mxu1 %vm5037_vm5, %v4992_v51  ;;  %v5434_v2 = vmul.f32 -1.702, %v8874_v38  ;;  %v4889_v41 = vmul.f32 1.442695, %v5433_v62 }
 0xdf8   : > { %v6566_v17 = vpop.eup %6565  ;;  %v4993_v27 = vpack.c.bf16 %v4974_v29, %v4973_v8  ;;  %v4905_v55 = vadd.f32 1.0, %v6564_v28  ;;  %v5432_v23 = vmul.f32 -1.702, %v8877_v21  ;;  %v4885_v3 = vmul.f32 1.442695, %v5431_v37 }
 0xdf9   : > { %v6568_v33 = vpop.eup %6567  ;;  %6577 = vrcp.f32 %v4907_v59  ;;  %v4908_v15 = vadd.f32 1.0, %v6566_v17  ;;  %v4891_v39 = vmul.f32 1.442695, %v5434_v2 }
 0xdfa   : > { %v6570_v47 = vpop.eup %6569  ;;  %6579 = vrcp.f32 %v4905_v55  ;;  %v4906_v56 = vadd.f32 1.0, %v6568_v33  ;;  %6044 = vmatprep.mubr.msk.bf16.mxu1 %vm5037_vm5, %v4993_v27  ;;  %v4887_v9 = vmul.f32 1.442695, %v5432_v23 }
 0xdfb   : > { %v6572_v51 = vpop.eup %6571  ;;  %6581 = vrcp.f32 %v4908_v15  ;;  %v4911_v53 = vadd.f32 1.0, %v6570_v47 }
 0xdfc   : > { %v6574_v30 = vpop.eup %6573  ;;  %6583 = vrcp.f32 %v4906_v56  ;;  %v4909_v52 = vadd.f32 1.0, %v6572_v51 }
 0xdfd   : > { %v6576_v46 = vpop.eup %6575  ;;  %6585 = vrcp.f32 %v4911_v53  ;;  %v4912_v24 = vadd.f32 1.0, %v6574_v30 }
 0xdfe   : > { %6587 = vrcp.f32 %v4909_v52  ;;  %v4910_v35 = vadd.f32 1.0, %v6576_v46 }
 0xdff   : > { %6589 = vrcp.f32 %v4912_v24  ;;  %6045 = vmatmul.mubr.msk.bf16.gmra.mrb[112].mxu1 %vm5037_vm5, %v4994_v16 }
 0xe00   : > { %6591 = vrcp.f32 %v4910_v35 }
 0xe01   : > { %6593 = vpow2.f32 %v4889_v41  ;;  %v5011_v41 = vsub.s32 7, %v9056_v49 }
 0xe02   : > { %6595 = vpow2.f32 %v4885_v3 }
 0xe03   : > { %v6578_v32 = vpop.eup %6577  ;;  %6597 = vpow2.f32 %v4891_v39 }
 0xe04   : > { %v6580_v43 = vpop.eup %6579  ;;  %6599 = vpow2.f32 %v4887_v9  ;;  %v4979_v48 = vmul.f32 %v6578_v32, %v8820_v57 }
 0xe05   : > { %v6582_v14 = vpop.eup %6581  ;;  %v4977_v40 = vmul.f32 %v6580_v43, %v8823_v20 }
 0xe06   : > { %v6584_v61 = vpop.eup %6583  ;;  %v4980_v26 = vmul.f32 %v6582_v14, %v8828_v45 }
 0xe07   : > { %v6586_v13 = vpop.eup %6585  ;;  %v4978_v8 = vmul.f32 %v6584_v61, %v8834_v31 }
 0xe08   : > { %v6588_v29 = vpop.eup %6587  ;;  %v4996_v28 = vpack.c.bf16 %v4980_v26, %v4979_v48  ;;  %v4983_v27 = vmul.f32 %v6586_v13, %v8842_v5 }
 0xe09   : > { %v6590_v16 = vpop.eup %6589  ;;  %v4995_v59 = vpack.c.bf16 %v4978_v8, %v4977_v40  ;;  %v4981_v15 = vmul.f32 %v6588_v29, %v8845_v0 }
 0xe0a   : > { %v6592_v17 = vpop.eup %6591  ;;  %v4984_v55 = vmul.f32 %v6590_v16, %v8850_v10 }
 0xe0b   : > { %v6594_v33 = vpop.eup %6593  ;;  %v4982_v57 = vmul.f32 %v6592_v17, %v8855_v6  ;;  %6048 = vmatprep.mubr.msk.bf16.mxu1 %vm5037_vm5, %v4995_v59 }
 0xe0c   : > { %v6596_v45 = vpop.eup %6595  ;;  %v4998_v20 = vpack.c.bf16 %v4984_v55, %v4983_v27  ;;  %v4915_v62 = vadd.f32 1.0, %v6594_v33  ;;  %6049 = vmatmul.mubr.msk.bf16.gmra.mrb[116].mxu1 %vm5037_vm5, %v4996_v28 }
 0xe0d   : > { %v6598_v31 = vpop.eup %6597  ;;  %v4997_v47 = vpack.c.bf16 %v4982_v57, %v4981_v15  ;;  %v4913_v56 = vadd.f32 1.0, %v6596_v45 }
 0xe0e   : > { %v6600_v37 = vpop.eup %6599  ;;  %6601 = vrcp.f32 %v4915_v62  ;;  %v4916_v5 = vadd.f32 1.0, %v6598_v31 }
 0xe0f   : > { %6603 = vrcp.f32 %v4913_v56  ;;  %v4914_v10 = vadd.f32 1.0, %v6600_v37  ;;  %6052 = vmatprep.mubr.msk.bf16.mxu1 %vm5037_vm5, %v4997_v47 }
 0xe10   : > { %6605 = vrcp.f32 %v4916_v5 }
 0xe11   : > { %6607 = vrcp.f32 %v4914_v10 }
 0xe14   : > { %6053 = vmatmul.mubr.msk.bf16.gmra.mrb[120].mxu1 %vm5037_vm5, %v4998_v20 }
 0xe18   : > { %v6602_v0 = vpop.eup %6601 }
 0xe19   : > { %v6604_v6 = vpop.eup %6603  ;;  %v4987_v2 = vmul.f32 %v6602_v0, %v8864_v11  ;;  %v6610_v11 = vld [vmem:[%s8986_s3] sm:$0xff] }
 0xe1a   : > { %v6606_v51 = vpop.eup %6605  ;;  %v4985_v52 = vmul.f32 %v6604_v6, %v8870_v18 }
 0xe1b   : > { %v6608_v53 = vpop.eup %6607  ;;  %v4988_v30 = vmul.f32 %v6606_v51, %v8874_v38  ;;  %v8909_v38 = vrot.slane %v6610_v11, %v5011_v41 }
 0xe1c   : > { %v4986_v23 = vmul.f32 %v6608_v53, %v8877_v21 }
 0xe1d   : > { %v5000_v46 = vpack.c.bf16 %v4988_v30, %v4987_v2 }
 0xe1e   : > { %v4999_v24 = vpack.c.bf16 %v4986_v23, %v4985_v52 }
 0xe20   : > { %6056 = vmatprep.mubr.msk.bf16.mxu1 %vm5037_vm5, %v4999_v24 }
 0xe21   : > { %6057 = vmatmul.mubr.msk.bf16.gmra.mrb[124].mxu1 %vm5037_vm5, %v5000_v46 }
 0xebc   : > { %v6038_v18 = vpop.f32.mrb[104].mxu1 }
 0xebd   : > { %v5108_v21 = vpop.f32.mrb[105].mxu1 }
 0xebe   : > { %v5109_v35 = vadd.f32 %v5108_v21, %v8909_v38  ;;  %v6039_v3 = vpop.f32.mrb[106].mxu1 }
 0xebf   : > { %v5119_v49 = vadd.f32 %v6039_v3, %v8909_v38  ;;  %v5111_v39 = vpop.f32.mrb[107].mxu1 }
 0xec0   : > { %v5195_v9 = vadd.f32 %v5109_v35, %v8372_v36  ;;  %v5112_v32 = vadd.f32 %v5111_v39, %v8909_v38 }
 0xec1   : > { %v5197_v43 = vadd.f32 %v5119_v49, %v8387_v44 }
 0xec2   : > { %5211 = vst.msk [vmem:[%s8915_s28] sm:$0xff] %vm518_vm0, %v5195_v9  ;;  %v5196_v14 = vadd.f32 %v5112_v32, %v8380_v58 }
 0xec3   : > { %5213 = vst.msk [vmem:[%s8915_s28 + $0x10] sm:$0xff] %vm518_vm0, %v5197_v43 }
 0xec4   : > { %5212 = vst.msk [vmem:[%s8915_s28 + $0x8] sm:$0xff] %vm518_vm0, %v5196_v14 }
 0xeca   : > { %v6042_v61 = vpop.f32.mrb[108].mxu1 }
 0xecb   : > { %v5131_v48 = vadd.f32 %v6042_v61, %v8909_v38  ;;  %v5123_v26 = vpop.f32.mrb[109].mxu1 }
 0xecc   : > { %v5124_v36 = vadd.f32 %v5123_v26, %v8909_v38  ;;  %v6043_v13 = vpop.f32.mrb[110].mxu1 }
 0xecd   : > { %v5199_v44 = vadd.f32 %v5131_v48, %v8404_v1  ;;  %v5134_v40 = vadd.f32 %v6043_v13, %v8909_v38  ;;  %v5126_v8 = vpop.f32.mrb[111].mxu1 }
 0xece   : > { %v5198_v58 = vadd.f32 %v5124_v36, %v8395_v63 }
 0xecf   : > { %5215 = vst.msk [vmem:[%s8915_s28 + $0x20] sm:$0xff] %vm518_vm0, %v5199_v44  ;;  %v5200_v29 = vadd.f32 %v5134_v40, %v8407_v54 }
 0xed0   : > { %5214 = vst.msk [vmem:[%s8915_s28 + $0x18] sm:$0xff] %vm518_vm0, %v5198_v58 }
 0xed1   : > { %5216 = vst.msk [vmem:[%s8915_s28 + $0x28] sm:$0xff] %vm518_vm0, %v5200_v29 }
 0xed2   : > { %v6046_v28 = vpop.f32.mrb[112].mxu1 }
 0xed3   : > { %v5146_v16 = vadd.f32 %v6046_v28, %v8909_v38  ;;  %v5138_v59 = vpop.f32.mrb[113].mxu1 }
 0xed4   : > { %v6047_v17 = vpop.f32.mrb[114].mxu1 }
 0xed5   : > { %v5202_v1 = vadd.f32 %v5146_v16, %v8428_v4  ;;  %v5140_v27 = vpop.f32.mrb[115].mxu1 }
 0xed6   : > { %v5141_v63 = vadd.f32 %v5140_v27, %v8909_v38 }
 0xed7   : > { %5218 = vst.msk [vmem:[%s8915_s28 + $0x38] sm:$0xff] %vm518_vm0, %v5202_v1 }
 0xed8   : > { %v5201_v54 = vadd.f32 %v5141_v63, %v8425_v7 }
 0xeda   : > { %5217 = vst.msk [vmem:[%s8915_s28 + $0x30] sm:$0xff] %vm518_vm0, %v5201_v54 }
 0xedf   : > { %v6050_v55 = vpop.f32.mrb[116].mxu1 }
 0xee0   : > { %v5152_v33 = vpop.f32.mrb[117].mxu1 }
 0xee1   : > { %v5153_v15 = vadd.f32 %v5152_v33, %v8909_v38  ;;  %v6051_v57 = vpop.f32.mrb[118].mxu1 }
 0xee2   : > { %v5163_v45 = vadd.f32 %v6051_v57, %v8909_v38  ;;  %v5155_v20 = vpop.f32.mrb[119].mxu1 }
 0xee3   : > { %v5203_v4 = vadd.f32 %v5153_v15, %v8444_v25  ;;  %v5156_v62 = vadd.f32 %v5155_v20, %v8909_v38 }
 0xee4   : > { %v5205_v31 = vadd.f32 %v5163_v45, %v8457_v19 }
 0xee5   : > { %5219 = vst.msk [vmem:[%s8915_s28 + $0x40] sm:$0xff] %vm518_vm0, %v5203_v4  ;;  %v5204_v7 = vadd.f32 %v5156_v62, %v8452_v22 }
 0xee6   : > { %5221 = vst.msk [vmem:[%s8915_s28 + $0x50] sm:$0xff] %vm518_vm0, %v5205_v31 }
 0xee7   : > { %5220 = vst.msk [vmem:[%s8915_s28 + $0x48] sm:$0xff] %vm518_vm0, %v5204_v7  ;;  %v6054_v47 = vpop.f32.mrb[120].mxu1 }
 0xee8   : > { %v5175_v56 = vadd.f32 %v6054_v47, %v8909_v38  ;;  %v5167_v37 = vpop.f32.mrb[121].mxu1 }
 0xee9   : > { %v5168_v25 = vadd.f32 %v5167_v37, %v8909_v38  ;;  %v6055_v5 = vpop.f32.mrb[122].mxu1 }
 0xeea   : > { %v5207_v19 = vadd.f32 %v5175_v56, %v8473_v60  ;;  %v5178_v10 = vadd.f32 %v6055_v5, %v8909_v38  ;;  %v5170_v0 = vpop.f32.mrb[123].mxu1 }
 0xeeb   : > { %v5206_v22 = vadd.f32 %v5168_v25, %v8468_v50 }
 0xeec   : > { %5223 = vst.msk [vmem:[%s8915_s28 + $0x60] sm:$0xff] %vm518_vm0, %v5207_v19  ;;  %v5208_v6 = vadd.f32 %v5178_v10, %v8481_v12 }
 0xeed   : > { %5222 = vst.msk [vmem:[%s8915_s28 + $0x58] sm:$0xff] %vm518_vm0, %v5206_v22 }
 0xeee   : > { %5224 = vst.msk [vmem:[%s8915_s28 + $0x68] sm:$0xff] %vm518_vm0, %v5208_v6 }
 0xef4   : > { %v6058_v51 = vpop.f32.mrb[124].mxu1 }
 0xef5   : > { %v5190_v53 = vadd.f32 %v6058_v51, %v8909_v38  ;;  %v5182_v2 = vpop.f32.mrb[125].mxu1 }
 0xef6   : > { %v6059_v30 = vpop.f32.mrb[126].mxu1 }
 0xef7   : > { %v5210_v60 = vadd.f32 %v5190_v53, %v8497_v42  ;;  %v5184_v52 = vpop.f32.mrb[127].mxu1 }
 0xef8   : > { %v5185_v23 = vadd.f32 %v5184_v52, %v8909_v38 }
 0xef9   : > { %5226 = vst.msk [vmem:[%s8915_s28 + $0x78] sm:$0xff] %vm518_vm0, %v5210_v60 }
 0xefa   : > { %v5209_v50 = vadd.f32 %v5185_v23, %v8500_v34 }
 0xefc   : > { %5225 = vst.msk [vmem:[%s8915_s28 + $0x70] sm:$0xff] %vm518_vm0, %v5209_v50 }
 0xefd PF: > { %s18_s27 = sadd.s32 1, %s6617_s27  }
 0xefe   : > { %p15_p5 = scmp.ge.s32.totalorder %s18_s27, 4  }
 0xf00   :  { %17 = sbr.rel (!%p15_p5) target bundleno = 1 (0x1), region = 82 }

</bundles_post_ra>
